<compile_context>
chip_gen: v7x
topology: tpu7x:2x2x1
jax: 0.10.0
libtpu: 0.0.40
codegen_flags: <defaults>
</compile_context>

<pallas_src>
import jax
import jax.numpy as jnp
from jax.experimental import pallas as pl
from jax.experimental.pallas import tpu as pltpu


# ----------------------------------------------------------------------------
# Fused kernel:  GCN1+ReLU -> GCN2+ReLU -> LSTM (unrolled) -> Linear (padded)
# One grid step == one graph; weights are shared (same block every step).
# ----------------------------------------------------------------------------
def grnn_fused_kernel(a_ref, x_ref, w1_ref, b1_ref, w2_ref, b2_ref,
                      wih_ref, whh_ref, bg_ref, wfc_ref, bfc_ref, o_ref):
    bf16 = jnp.bfloat16
    lanes = whh_ref.shape[1] // 4          # 128: per-gate lane-padded width
    seq = x_ref.shape[0]                   # number of nodes == LSTM seq len

    a = a_ref[...]                                             # (N, N) bf16

    # --- GraphConv 1 + ReLU: relu(A_norm @ (X @ W1) + b1) ---
    xw1 = jnp.dot(x_ref[...], w1_ref[...], preferred_element_type=jnp.float32)
    x1 = jnp.maximum(
        jnp.dot(a, xw1.astype(bf16), preferred_element_type=jnp.float32)
        + b1_ref[...], 0.0)                                    # (N, H1) f32

    # --- GraphConv 2 + ReLU ---
    xw2 = jnp.dot(x1.astype(bf16), w2_ref[...],
                  preferred_element_type=jnp.float32)
    x2 = jnp.maximum(
        jnp.dot(a, xw2.astype(bf16), preferred_element_type=jnp.float32)
        + b2_ref[...], 0.0)                                    # (N, H2) f32

    # --- LSTM input projection, hoisted out of the recurrence ---
    # Gates lane-padded: each gate occupies its own 128-lane block.
    xg = (jnp.dot(x2.astype(bf16), wih_ref[...],
                  preferred_element_type=jnp.float32)
          + bg_ref[...])                                       # (N, 4*128) f32

    whh = whh_ref[...]                                         # (128, 4*128) bf16
    h = jnp.zeros((1, lanes), jnp.float32)                     # lane-padded state
    c = jnp.zeros((1, lanes), jnp.float32)

    # --- fully-unrolled recurrence (seq small and static) ---
    # PyTorch gate order in stacked weights: [i, f, g, o].
    # Padded lanes: gates==0 there, so i/f/o==0.5, g==0, and c/h stay exactly 0.
    hs = []
    for t in range(seq):
        # NOTE: W_hh stays a plain jnp.dot; explicit MXU weight-residency
        # (matmul_push_rhs/acc/pop) skipped for safety per review option.
        gates = xg[t:t + 1, :] + jnp.dot(
            h.astype(bf16), whh, preferred_element_type=jnp.float32)
        sig = jax.nn.sigmoid(gates)                 # one EUP pass for i/f/o
        i_g = sig[:, 0 * lanes:1 * lanes]
        f_g = sig[:, 1 * lanes:2 * lanes]
        o_g = sig[:, 3 * lanes:4 * lanes]
        g_g = jnp.tanh(gates[:, 2 * lanes:3 * lanes])
        c = f_g * c + i_g * g_g
        h = o_g * jnp.tanh(c)
        hs.append(h)                                # keep history in vregs

    hall = jnp.concatenate(hs, axis=0)              # (N, 128) f32, no VMEM stores

    # --- Final Linear on all hidden states at once, lane-dense (padded) store ---
    o_ref[...] = (jnp.dot(hall.astype(bf16), wfc_ref[...],
                          preferred_element_type=jnp.float32)
                  + bfc_ref[...])


# ----------------------------------------------------------------------------
# Wrappers
# ----------------------------------------------------------------------------
def grnn_forward_batched(a_norm, features, params):
    """Batch of graphs: a_norm (B,N,N), features (B,N,F) -> (B,N,num_classes)."""
    bsz, n, f_in = features.shape
    hid = params["w_hh"].shape[1]          # lstm_hidden
    num_classes = params["w_fc"].shape[0]
    lanes = 128                            # per-gate lane padding
    c_pad = 128                            # lane-dense FC output width

    bf16 = jnp.bfloat16
    a = a_norm.astype(bf16)
    x = features.astype(bf16)
    w1 = params["w1"].astype(bf16)                      # (F_in, H1)
    b1 = params["b1"].reshape(1, -1)                    # (1, H1)   f32
    w2 = params["w2"].astype(bf16)                      # (H1, H2)
    b2 = params["b2"].reshape(1, -1)                    # (1, H2)   f32

    # --- lane-padded LSTM weights: gate g lives at lanes [g*128, g*128+hid) ---
    wih_t = params["w_ih"].T                            # (H2, 4*hid)
    whh_t = params["w_hh"].T                            # (hid, 4*hid)
    b_gate = params["b_ih"] + params["b_hh"]            # (4*hid,)
    h2 = wih_t.shape[0]

    wih_pad = jnp.zeros((h2, 4 * lanes), jnp.float32)
    whh_pad = jnp.zeros((lanes, 4 * lanes), jnp.float32)
    bg_pad = jnp.zeros((1, 4 * lanes), jnp.float32)
    for g in range(4):
        wih_pad = wih_pad.at[:, g * lanes:g * lanes + hid].set(
            wih_t[:, g * hid:(g + 1) * hid])
        whh_pad = whh_pad.at[:hid, g * lanes:g * lanes + hid].set(
            whh_t[:, g * hid:(g + 1) * hid])
        bg_pad = bg_pad.at[0, g * lanes:g * lanes + hid].set(
            b_gate[g * hid:(g + 1) * hid])
    wih_pad = wih_pad.astype(bf16)
    whh_pad = whh_pad.astype(bf16)

    # FC weight/bias padded to (128, 128); rows >= hid multiply zeros in h.
    wfc_pad = jnp.zeros((lanes, c_pad), jnp.float32)
    wfc_pad = wfc_pad.at[:hid, :num_classes].set(params["w_fc"].T).astype(bf16)
    bfc_pad = jnp.zeros((1, c_pad), jnp.float32)
    bfc_pad = bfc_pad.at[0, :num_classes].set(params["b_fc"])

    out_pad = pl.pallas_call(
        grnn_fused_kernel,
        out_shape=jax.ShapeDtypeStruct((bsz, n, c_pad), jnp.float32),
        grid=(bsz,),
        in_specs=[
            pl.BlockSpec((None, n, n), lambda b: (b, 0, 0)),        # A_norm
            pl.BlockSpec((None, n, f_in), lambda b: (b, 0, 0)),     # features
            pl.BlockSpec(w1.shape, lambda b: (0, 0)),
            pl.BlockSpec(b1.shape, lambda b: (0, 0)),
            pl.BlockSpec(w2.shape, lambda b: (0, 0)),
            pl.BlockSpec(b2.shape, lambda b: (0, 0)),
            pl.BlockSpec(wih_pad.shape, lambda b: (0, 0)),
            pl.BlockSpec(whh_pad.shape, lambda b: (0, 0)),
            pl.BlockSpec(bg_pad.shape, lambda b: (0, 0)),
            pl.BlockSpec(wfc_pad.shape, lambda b: (0, 0)),
            pl.BlockSpec(bfc_pad.shape, lambda b: (0, 0)),
        ],
        out_specs=pl.BlockSpec((None, n, c_pad), lambda b: (b, 0, 0)),
        compiler_params=pltpu.CompilerParams(
            dimension_semantics=("parallel",)),     # v7x: shard graphs over TCs
    )(a, x, w1, b1, w2, b2, wih_pad, whh_pad, bg_pad, wfc_pad, bfc_pad)

    return out_pad[:, :, :num_classes]


def grnn_forward(a_norm, features, params):
    """Single graph (matches the PyTorch module's forward)."""
    return grnn_forward_batched(a_norm[None], features[None], params)[0]


# ----------------------------------------------------------------------------
# Pure-JAX reference (same math, f32) for a correctness sanity check.
# ----------------------------------------------------------------------------
def grnn_reference(a_norm, features, params):
    x1 = jax.nn.relu(a_norm @ (features @ params["w1"]) + params["b1"])
    x2 = jax.nn.relu(a_norm @ (x1 @ params["w2"]) + params["b2"])
    hid = params["w_hh"].shape[1]
    w_ih, w_hh = params["w_ih"], params["w_hh"]
    b = params["b_ih"] + params["b_hh"]
    h = jnp.zeros((hid,), jnp.float32)
    c = jnp.zeros((hid,), jnp.float32)
    hs = []
    for t in range(x2.shape[0]):
        gates = w_ih @ x2[t] + w_hh @ h + b
        i = jax.nn.sigmoid(gates[0:hid])
        f = jax.nn.sigmoid(gates[hid:2 * hid])
        g = jnp.tanh(gates[2 * hid:3 * hid])
        o = jax.nn.sigmoid(gates[3 * hid:4 * hid])
        c = f * c + i * g
        h = o * jnp.tanh(c)
        hs.append(h)
    hall = jnp.stack(hs)
    return hall @ params["w_fc"].T + params["b_fc"]


def make_params(key, in_feats, h1, h2, lstm_hidden, num_classes):
    ks = jax.random.split(key, 9)
    s = 0.1
    return {
        "w1": s * jax.random.normal(ks[0], (in_feats, h1), jnp.float32),
        "b1": s * jax.random.normal(ks[1], (h1,), jnp.float32),
        "w2": s * jax.random.normal(ks[2], (h1, h2), jnp.float32),
        "b2": s * jax.random.normal(ks[3], (h2,), jnp.float32),
        "w_ih": s * jax.random.normal(ks[4], (4 * lstm_hidden, h2), jnp.float32),
        "w_hh": s * jax.random.normal(ks[5], (4 * lstm_hidden, lstm_hidden), jnp.float32),
        "b_ih": s * jax.random.normal(ks[6], (4 * lstm_hidden,), jnp.float32),
        "b_hh": s * jax.random.normal(ks[7], (4 * lstm_hidden,), jnp.float32),
        "w_fc": s * jax.random.normal(ks[8], (num_classes, lstm_hidden), jnp.float32),
        "b_fc": jnp.zeros((num_classes,), jnp.float32),
        "lstm_hidden": lstm_hidden,
        "num_classes": num_classes,
    }


if __name__ == "__main__":
    # Small, deterministic problem: a batch of 4 graphs, 16 nodes, 8 features.
    B = 4
    N = 16
    in_feats = 8
    hidden_size1 = 64
    hidden_size2 = 64
    lstm_hidden = 32
    num_classes = 4

    key = jax.random.PRNGKey(0)
    k_feat, k_adj, k_param = jax.random.split(key, 3)

    features = jax.random.normal(k_feat, (B, N, in_feats), jnp.float32)

    # Random undirected graphs with self-loops, then symmetric normalization
    # A_norm = D^{-1/2} A D^{-1/2}  (DGL GraphConv norm='both').
    rnd = jax.random.uniform(k_adj, (B, N, N))
    adj = (rnd + jnp.swapaxes(rnd, -1, -2) > 1.2).astype(jnp.float32)
    adj = adj + jnp.eye(N, dtype=jnp.float32)[None]  # self-loops -> no zero degree
    adj = jnp.minimum(adj, 1.0)
    deg = jnp.sum(adj, axis=-1)
    d_inv_sqrt = 1.0 / jnp.sqrt(deg)
    a_norm = adj * d_inv_sqrt[:, :, None] * d_inv_sqrt[:, None, :]

    params = make_params(k_param, in_feats, hidden_size1, hidden_size2,
                         lstm_hidden, num_classes)

    # Batched launch (one grid step per graph, shared weights).
    out = grnn_forward_batched(a_norm, features, params)
    jax.block_until_ready(out)
    assert out.shape == (B, N, num_classes)

    # Single-graph path matching the PyTorch module's forward.
    out0 = grnn_forward(a_norm[0], features[0], params)
    jax.block_until_ready(out0)
    assert out0.shape == (N, num_classes)

    # Loose-tolerance parity check vs. f32 reference (bf16 matmuls -> ~1e-3 drift).
    ref0 = grnn_reference(a_norm[0], features[0], params)
    assert jnp.allclose(out0, ref0, rtol=5e-2, atol=5e-2), (
        float(jnp.max(jnp.abs(out0 - ref0))))

    print("KERNEL_OK")
</pallas_src>

<mosaic_0001>
module attributes {stable_mosaic.version = 11 : i64} {
  func.func @grnn_fused_kernel(%arg0: i32, %arg1: memref<1x16x16xbf16, #tpu.memory_space<vmem>>, %arg2: memref<1x16x8xbf16, #tpu.memory_space<vmem>>, %arg3: memref<8x64xbf16, #tpu.memory_space<vmem>>, %arg4: memref<1x64xf32, #tpu.memory_space<vmem>>, %arg5: memref<64x64xbf16, #tpu.memory_space<vmem>>, %arg6: memref<1x64xf32, #tpu.memory_space<vmem>>, %arg7: memref<64x512xbf16, #tpu.memory_space<vmem>>, %arg8: memref<128x512xbf16, #tpu.memory_space<vmem>>, %arg9: memref<1x512xf32, #tpu.memory_space<vmem>>, %arg10: memref<128x128xbf16, #tpu.memory_space<vmem>>, %arg11: memref<1x128xf32, #tpu.memory_space<vmem>>, %arg12: memref<1x16x128xf32, #tpu.memory_space<vmem>>) attributes {dimension_semantics = [#tpu.dimension_semantics<parallel>], iteration_bounds = array<i64: 4>, scalar_prefetch = 0 : i64, scratch_operands = 0 : i64, tpu.core_type = #tpu.core_type<tc>, window_params = [{transform_indices = @transform_0, window_bounds = array<i64: 1, 16, 16>}, {transform_indices = @transform_1, window_bounds = array<i64: 1, 16, 8>}, {pipeline_mode = #tpu.pipeline_mode<synchronous>, transform_indices = @transform_2, window_bounds = array<i64: 8, 64>}, {pipeline_mode = #tpu.pipeline_mode<synchronous>, transform_indices = @transform_3, window_bounds = array<i64: 1, 64>}, {pipeline_mode = #tpu.pipeline_mode<synchronous>, transform_indices = @transform_4, window_bounds = array<i64: 64, 64>}, {pipeline_mode = #tpu.pipeline_mode<synchronous>, transform_indices = @transform_5, window_bounds = array<i64: 1, 64>}, {pipeline_mode = #tpu.pipeline_mode<synchronous>, transform_indices = @transform_6, window_bounds = array<i64: 64, 512>}, {pipeline_mode = #tpu.pipeline_mode<synchronous>, transform_indices = @transform_7, window_bounds = array<i64: 128, 512>}, {pipeline_mode = #tpu.pipeline_mode<synchronous>, transform_indices = @transform_8, window_bounds = array<i64: 1, 512>}, {pipeline_mode = #tpu.pipeline_mode<synchronous>, transform_indices = @transform_9, window_bounds = array<i64: 128, 128>}, {pipeline_mode = #tpu.pipeline_mode<synchronous>, transform_indices = @transform_10, window_bounds = array<i64: 1, 128>}, {transform_indices = @transform_11, window_bounds = array<i64: 1, 16, 128>}]} {
    %c0 = arith.constant 0 : index
    %c0_0 = arith.constant 0 : index
    %c0_1 = arith.constant 0 : index
    %0 = vector.load %arg1[%c0, %c0_0, %c0_1] : memref<1x16x16xbf16, #tpu.memory_space<vmem>>, vector<1x16x16xbf16>
    %1 = vector.shape_cast %0 : vector<1x16x16xbf16> to vector<16x16xbf16>
    %c0_2 = arith.constant 0 : index
    %c0_3 = arith.constant 0 : index
    %c0_4 = arith.constant 0 : index
    %2 = vector.load %arg2[%c0_2, %c0_3, %c0_4] : memref<1x16x8xbf16, #tpu.memory_space<vmem>>, vector<1x16x8xbf16>
    %3 = vector.shape_cast %2 : vector<1x16x8xbf16> to vector<16x8xbf16>
    %c0_5 = arith.constant 0 : index
    %c0_6 = arith.constant 0 : index
    %4 = vector.load %arg3[%c0_5, %c0_6] : memref<8x64xbf16, #tpu.memory_space<vmem>>, vector<8x64xbf16>
    %cst = arith.constant dense<0.000000e+00> : vector<16x64xf32>
    %5 = tpu.matmul %3, %4, %cst {dimension_numbers = #tpu.dot_dimension_numbers<[1], [0], [0], [1], [0, 0, 1, 1], [], []>} : vector<16x8xbf16>, vector<8x64xbf16>, vector<16x64xf32> -> vector<16x64xf32>
    %6 = arith.truncf %5 : vector<16x64xf32> to vector<16x64xbf16>
    %cst_7 = arith.constant dense<0.000000e+00> : vector<16x64xf32>
    %7 = tpu.matmul %1, %6, %cst_7 {dimension_numbers = #tpu.dot_dimension_numbers<[1], [0], [0], [1], [0, 0, 1, 1], [], []>} : vector<16x16xbf16>, vector<16x64xbf16>, vector<16x64xf32> -> vector<16x64xf32>
    %c0_8 = arith.constant 0 : index
    %c0_9 = arith.constant 0 : index
    %8 = vector.load %arg4[%c0_8, %c0_9] : memref<1x64xf32, #tpu.memory_space<vmem>>, vector<1x64xf32>
    %9 = vector.broadcast %8 : vector<1x64xf32> to vector<16x64xf32>
    %10 = arith.addf %7, %9 : vector<16x64xf32>
    %cst_10 = arith.constant 0.000000e+00 : f32
    %11 = vector.broadcast %cst_10 : f32 to vector<16x64xf32>
    %12 = arith.maximumf %10, %11 : vector<16x64xf32>
    %13 = arith.truncf %12 : vector<16x64xf32> to vector<16x64xbf16>
    %c0_11 = arith.constant 0 : index
    %c0_12 = arith.constant 0 : index
    %14 = vector.load %arg5[%c0_11, %c0_12] : memref<64x64xbf16, #tpu.memory_space<vmem>>, vector<64x64xbf16>
    %cst_13 = arith.constant dense<0.000000e+00> : vector<16x64xf32>
    %15 = tpu.matmul %13, %14, %cst_13 {dimension_numbers = #tpu.dot_dimension_numbers<[1], [0], [0], [1], [0, 0, 1, 1], [], []>} : vector<16x64xbf16>, vector<64x64xbf16>, vector<16x64xf32> -> vector<16x64xf32>
    %16 = arith.truncf %15 : vector<16x64xf32> to vector<16x64xbf16>
    %cst_14 = arith.constant dense<0.000000e+00> : vector<16x64xf32>
    %17 = tpu.matmul %1, %16, %cst_14 {dimension_numbers = #tpu.dot_dimension_numbers<[1], [0], [0], [1], [0, 0, 1, 1], [], []>} : vector<16x16xbf16>, vector<16x64xbf16>, vector<16x64xf32> -> vector<16x64xf32>
    %c0_15 = arith.constant 0 : index
    %c0_16 = arith.constant 0 : index
    %18 = vector.load %arg6[%c0_15, %c0_16] : memref<1x64xf32, #tpu.memory_space<vmem>>, vector<1x64xf32>
    %19 = vector.broadcast %18 : vector<1x64xf32> to vector<16x64xf32>
    %20 = arith.addf %17, %19 : vector<16x64xf32>
    %cst_17 = arith.constant 0.000000e+00 : f32
    %21 = vector.broadcast %cst_17 : f32 to vector<16x64xf32>
    %22 = arith.maximumf %20, %21 : vector<16x64xf32>
    %23 = arith.truncf %22 : vector<16x64xf32> to vector<16x64xbf16>
    %c0_18 = arith.constant 0 : index
    %c0_19 = arith.constant 0 : index
    %24 = vector.load %arg7[%c0_18, %c0_19] : memref<64x512xbf16, #tpu.memory_space<vmem>>, vector<64x512xbf16>
    %cst_20 = arith.constant dense<0.000000e+00> : vector<16x512xf32>
    %25 = tpu.matmul %23, %24, %cst_20 {dimension_numbers = #tpu.dot_dimension_numbers<[1], [0], [0], [1], [0, 0, 1, 1], [], []>} : vector<16x64xbf16>, vector<64x512xbf16>, vector<16x512xf32> -> vector<16x512xf32>
    %c0_21 = arith.constant 0 : index
    %c0_22 = arith.constant 0 : index
    %26 = vector.load %arg9[%c0_21, %c0_22] : memref<1x512xf32, #tpu.memory_space<vmem>>, vector<1x512xf32>
    %27 = vector.broadcast %26 : vector<1x512xf32> to vector<16x512xf32>
    %28 = arith.addf %25, %27 : vector<16x512xf32>
    %c0_23 = arith.constant 0 : index
    %c0_24 = arith.constant 0 : index
    %29 = vector.load %arg8[%c0_23, %c0_24] : memref<128x512xbf16, #tpu.memory_space<vmem>>, vector<128x512xbf16>
    %cst_25 = arith.constant 0.000000e+00 : f32
    %30 = vector.broadcast %cst_25 : f32 to vector<1x128xf32>
    %cst_26 = arith.constant 0.000000e+00 : f32
    %31 = vector.broadcast %cst_26 : f32 to vector<1x128xf32>
    %32 = vector.extract_strided_slice %28 {offsets = [0, 0], sizes = [1, 512], strides = [1, 1]} : vector<16x512xf32> to vector<1x512xf32>
    %33 = arith.truncf %30 : vector<1x128xf32> to vector<1x128xbf16>
    %cst_27 = arith.constant dense<0.000000e+00> : vector<1x512xf32>
    %34 = tpu.matmul %33, %29, %cst_27 {dimension_numbers = #tpu.dot_dimension_numbers<[1], [0], [0], [1], [0, 0, 1, 1], [], []>} : vector<1x128xbf16>, vector<128x512xbf16>, vector<1x512xf32> -> vector<1x512xf32>
    %35 = arith.addf %32, %34 : vector<1x512xf32>
    %36 = arith.negf %35 : vector<1x512xf32>
    %37 = math.exp %36 : vector<1x512xf32>
    %cst_28 = arith.constant 1.000000e+00 : f32
    %38 = vector.broadcast %cst_28 : f32 to vector<1x512xf32>
    %39 = arith.addf %38, %37 : vector<1x512xf32>
    %40 = arith.divf %38, %39 : vector<1x512xf32>
    %41 = vector.extract_strided_slice %40 {offsets = [0, 0], sizes = [1, 128], strides = [1, 1]} : vector<1x512xf32> to vector<1x128xf32>
    %42 = vector.extract_strided_slice %40 {offsets = [0, 128], sizes = [1, 128], strides = [1, 1]} : vector<1x512xf32> to vector<1x128xf32>
    %43 = vector.extract_strided_slice %40 {offsets = [0, 384], sizes = [1, 128], strides = [1, 1]} : vector<1x512xf32> to vector<1x128xf32>
    %44 = vector.extract_strided_slice %35 {offsets = [0, 256], sizes = [1, 128], strides = [1, 1]} : vector<1x512xf32> to vector<1x128xf32>
    %45 = math.tanh %44 : vector<1x128xf32>
    %46 = arith.mulf %42, %31 : vector<1x128xf32>
    %47 = arith.mulf %41, %45 : vector<1x128xf32>
    %48 = arith.addf %46, %47 : vector<1x128xf32>
    %49 = math.tanh %48 : vector<1x128xf32>
    %50 = arith.mulf %43, %49 : vector<1x128xf32>
    %51 = vector.extract_strided_slice %28 {offsets = [1, 0], sizes = [1, 512], strides = [1, 1]} : vector<16x512xf32> to vector<1x512xf32>
    %52 = arith.truncf %50 : vector<1x128xf32> to vector<1x128xbf16>
    %cst_29 = arith.constant dense<0.000000e+00> : vector<1x512xf32>
    %53 = tpu.matmul %52, %29, %cst_29 {dimension_numbers = #tpu.dot_dimension_numbers<[1], [0], [0], [1], [0, 0, 1, 1], [], []>} : vector<1x128xbf16>, vector<128x512xbf16>, vector<1x512xf32> -> vector<1x512xf32>
    %54 = arith.addf %51, %53 : vector<1x512xf32>
    %55 = arith.negf %54 : vector<1x512xf32>
    %56 = math.exp %55 : vector<1x512xf32>
    %cst_30 = arith.constant 1.000000e+00 : f32
    %57 = vector.broadcast %cst_30 : f32 to vector<1x512xf32>
    %58 = arith.addf %57, %56 : vector<1x512xf32>
    %59 = arith.divf %57, %58 : vector<1x512xf32>
    %60 = vector.extract_strided_slice %59 {offsets = [0, 0], sizes = [1, 128], strides = [1, 1]} : vector<1x512xf32> to vector<1x128xf32>
    %61 = vector.extract_strided_slice %59 {offsets = [0, 128], sizes = [1, 128], strides = [1, 1]} : vector<1x512xf32> to vector<1x128xf32>
    %62 = vector.extract_strided_slice %59 {offsets = [0, 384], sizes = [1, 128], strides = [1, 1]} : vector<1x512xf32> to vector<1x128xf32>
    %63 = vector.extract_strided_slice %54 {offsets = [0, 256], sizes = [1, 128], strides = [1, 1]} : vector<1x512xf32> to vector<1x128xf32>
    %64 = math.tanh %63 : vector<1x128xf32>
    %65 = arith.mulf %61, %48 : vector<1x128xf32>
    %66 = arith.mulf %60, %64 : vector<1x128xf32>
    %67 = arith.addf %65, %66 : vector<1x128xf32>
    %68 = math.tanh %67 : vector<1x128xf32>
    %69 = arith.mulf %62, %68 : vector<1x128xf32>
    %70 = vector.extract_strided_slice %28 {offsets = [2, 0], sizes = [1, 512], strides = [1, 1]} : vector<16x512xf32> to vector<1x512xf32>
    %71 = arith.truncf %69 : vector<1x128xf32> to vector<1x128xbf16>
    %cst_31 = arith.constant dense<0.000000e+00> : vector<1x512xf32>
    %72 = tpu.matmul %71, %29, %cst_31 {dimension_numbers = #tpu.dot_dimension_numbers<[1], [0], [0], [1], [0, 0, 1, 1], [], []>} : vector<1x128xbf16>, vector<128x512xbf16>, vector<1x512xf32> -> vector<1x512xf32>
    %73 = arith.addf %70, %72 : vector<1x512xf32>
    %74 = arith.negf %73 : vector<1x512xf32>
    %75 = math.exp %74 : vector<1x512xf32>
    %cst_32 = arith.constant 1.000000e+00 : f32
    %76 = vector.broadcast %cst_32 : f32 to vector<1x512xf32>
    %77 = arith.addf %76, %75 : vector<1x512xf32>
    %78 = arith.divf %76, %77 : vector<1x512xf32>
    %79 = vector.extract_strided_slice %78 {offsets = [0, 0], sizes = [1, 128], strides = [1, 1]} : vector<1x512xf32> to vector<1x128xf32>
    %80 = vector.extract_strided_slice %78 {offsets = [0, 128], sizes = [1, 128], strides = [1, 1]} : vector<1x512xf32> to vector<1x128xf32>
    %81 = vector.extract_strided_slice %78 {offsets = [0, 384], sizes = [1, 128], strides = [1, 1]} : vector<1x512xf32> to vector<1x128xf32>
    %82 = vector.extract_strided_slice %73 {offsets = [0, 256], sizes = [1, 128], strides = [1, 1]} : vector<1x512xf32> to vector<1x128xf32>
    %83 = math.tanh %82 : vector<1x128xf32>
    %84 = arith.mulf %80, %67 : vector<1x128xf32>
    %85 = arith.mulf %79, %83 : vector<1x128xf32>
    %86 = arith.addf %84, %85 : vector<1x128xf32>
    %87 = math.tanh %86 : vector<1x128xf32>
    %88 = arith.mulf %81, %87 : vector<1x128xf32>
    %89 = vector.extract_strided_slice %28 {offsets = [3, 0], sizes = [1, 512], strides = [1, 1]} : vector<16x512xf32> to vector<1x512xf32>
    %90 = arith.truncf %88 : vector<1x128xf32> to vector<1x128xbf16>
    %cst_33 = arith.constant dense<0.000000e+00> : vector<1x512xf32>
    %91 = tpu.matmul %90, %29, %cst_33 {dimension_numbers = #tpu.dot_dimension_numbers<[1], [0], [0], [1], [0, 0, 1, 1], [], []>} : vector<1x128xbf16>, vector<128x512xbf16>, vector<1x512xf32> -> vector<1x512xf32>
    %92 = arith.addf %89, %91 : vector<1x512xf32>
    %93 = arith.negf %92 : vector<1x512xf32>
    %94 = math.exp %93 : vector<1x512xf32>
    %cst_34 = arith.constant 1.000000e+00 : f32
    %95 = vector.broadcast %cst_34 : f32 to vector<1x512xf32>
    %96 = arith.addf %95, %94 : vector<1x512xf32>
    %97 = arith.divf %95, %96 : vector<1x512xf32>
    %98 = vector.extract_strided_slice %97 {offsets = [0, 0], sizes = [1, 128], strides = [1, 1]} : vector<1x512xf32> to vector<1x128xf32>
    %99 = vector.extract_strided_slice %97 {offsets = [0, 128], sizes = [1, 128], strides = [1, 1]} : vector<1x512xf32> to vector<1x128xf32>
    %100 = vector.extract_strided_slice %97 {offsets = [0, 384], sizes = [1, 128], strides = [1, 1]} : vector<1x512xf32> to vector<1x128xf32>
    %101 = vector.extract_strided_slice %92 {offsets = [0, 256], sizes = [1, 128], strides = [1, 1]} : vector<1x512xf32> to vector<1x128xf32>
    %102 = math.tanh %101 : vector<1x128xf32>
    %103 = arith.mulf %99, %86 : vector<1x128xf32>
    %104 = arith.mulf %98, %102 : vector<1x128xf32>
    %105 = arith.addf %103, %104 : vector<1x128xf32>
    %106 = math.tanh %105 : vector<1x128xf32>
    %107 = arith.mulf %100, %106 : vector<1x128xf32>
    %108 = vector.extract_strided_slice %28 {offsets = [4, 0], sizes = [1, 512], strides = [1, 1]} : vector<16x512xf32> to vector<1x512xf32>
    %109 = arith.truncf %107 : vector<1x128xf32> to vector<1x128xbf16>
    %cst_35 = arith.constant dense<0.000000e+00> : vector<1x512xf32>
    %110 = tpu.matmul %109, %29, %cst_35 {dimension_numbers = #tpu.dot_dimension_numbers<[1], [0], [0], [1], [0, 0, 1, 1], [], []>} : vector<1x128xbf16>, vector<128x512xbf16>, vector<1x512xf32> -> vector<1x512xf32>
    %111 = arith.addf %108, %110 : vector<1x512xf32>
    %112 = arith.negf %111 : vector<1x512xf32>
    %113 = math.exp %112 : vector<1x512xf32>
    %cst_36 = arith.constant 1.000000e+00 : f32
    %114 = vector.broadcast %cst_36 : f32 to vector<1x512xf32>
    %115 = arith.addf %114, %113 : vector<1x512xf32>
    %116 = arith.divf %114, %115 : vector<1x512xf32>
    %117 = vector.extract_strided_slice %116 {offsets = [0, 0], sizes = [1, 128], strides = [1, 1]} : vector<1x512xf32> to vector<1x128xf32>
    %118 = vector.extract_strided_slice %116 {offsets = [0, 128], sizes = [1, 128], strides = [1, 1]} : vector<1x512xf32> to vector<1x128xf32>
    %119 = vector.extract_strided_slice %116 {offsets = [0, 384], sizes = [1, 128], strides = [1, 1]} : vector<1x512xf32> to vector<1x128xf32>
    %120 = vector.extract_strided_slice %111 {offsets = [0, 256], sizes = [1, 128], strides = [1, 1]} : vector<1x512xf32> to vector<1x128xf32>
    %121 = math.tanh %120 : vector<1x128xf32>
    %122 = arith.mulf %118, %105 : vector<1x128xf32>
    %123 = arith.mulf %117, %121 : vector<1x128xf32>
    %124 = arith.addf %122, %123 : vector<1x128xf32>
    %125 = math.tanh %124 : vector<1x128xf32>
    %126 = arith.mulf %119, %125 : vector<1x128xf32>
    %127 = vector.extract_strided_slice %28 {offsets = [5, 0], sizes = [1, 512], strides = [1, 1]} : vector<16x512xf32> to vector<1x512xf32>
    %128 = arith.truncf %126 : vector<1x128xf32> to vector<1x128xbf16>
    %cst_37 = arith.constant dense<0.000000e+00> : vector<1x512xf32>
    %129 = tpu.matmul %128, %29, %cst_37 {dimension_numbers = #tpu.dot_dimension_numbers<[1], [0], [0], [1], [0, 0, 1, 1], [], []>} : vector<1x128xbf16>, vector<128x512xbf16>, vector<1x512xf32> -> vector<1x512xf32>
    %130 = arith.addf %127, %129 : vector<1x512xf32>
    %131 = arith.negf %130 : vector<1x512xf32>
    %132 = math.exp %131 : vector<1x512xf32>
    %cst_38 = arith.constant 1.000000e+00 : f32
    %133 = vector.broadcast %cst_38 : f32 to vector<1x512xf32>
    %134 = arith.addf %133, %132 : vector<1x512xf32>
    %135 = arith.divf %133, %134 : vector<1x512xf32>
    %136 = vector.extract_strided_slice %135 {offsets = [0, 0], sizes = [1, 128], strides = [1, 1]} : vector<1x512xf32> to vector<1x128xf32>
    %137 = vector.extract_strided_slice %135 {offsets = [0, 128], sizes = [1, 128], strides = [1, 1]} : vector<1x512xf32> to vector<1x128xf32>
    %138 = vector.extract_strided_slice %135 {offsets = [0, 384], sizes = [1, 128], strides = [1, 1]} : vector<1x512xf32> to vector<1x128xf32>
    %139 = vector.extract_strided_slice %130 {offsets = [0, 256], sizes = [1, 128], strides = [1, 1]} : vector<1x512xf32> to vector<1x128xf32>
    %140 = math.tanh %139 : vector<1x128xf32>
    %141 = arith.mulf %137, %124 : vector<1x128xf32>
    %142 = arith.mulf %136, %140 : vector<1x128xf32>
    %143 = arith.addf %141, %142 : vector<1x128xf32>
    %144 = math.tanh %143 : vector<1x128xf32>
    %145 = arith.mulf %138, %144 : vector<1x128xf32>
    %146 = vector.extract_strided_slice %28 {offsets = [6, 0], sizes = [1, 512], strides = [1, 1]} : vector<16x512xf32> to vector<1x512xf32>
    %147 = arith.truncf %145 : vector<1x128xf32> to vector<1x128xbf16>
    %cst_39 = arith.constant dense<0.000000e+00> : vector<1x512xf32>
    %148 = tpu.matmul %147, %29, %cst_39 {dimension_numbers = #tpu.dot_dimension_numbers<[1], [0], [0], [1], [0, 0, 1, 1], [], []>} : vector<1x128xbf16>, vector<128x512xbf16>, vector<1x512xf32> -> vector<1x512xf32>
    %149 = arith.addf %146, %148 : vector<1x512xf32>
    %150 = arith.negf %149 : vector<1x512xf32>
    %151 = math.exp %150 : vector<1x512xf32>
    %cst_40 = arith.constant 1.000000e+00 : f32
    %152 = vector.broadcast %cst_40 : f32 to vector<1x512xf32>
    %153 = arith.addf %152, %151 : vector<1x512xf32>
    %154 = arith.divf %152, %153 : vector<1x512xf32>
    %155 = vector.extract_strided_slice %154 {offsets = [0, 0], sizes = [1, 128], strides = [1, 1]} : vector<1x512xf32> to vector<1x128xf32>
    %156 = vector.extract_strided_slice %154 {offsets = [0, 128], sizes = [1, 128], strides = [1, 1]} : vector<1x512xf32> to vector<1x128xf32>
    %157 = vector.extract_strided_slice %154 {offsets = [0, 384], sizes = [1, 128], strides = [1, 1]} : vector<1x512xf32> to vector<1x128xf32>
    %158 = vector.extract_strided_slice %149 {offsets = [0, 256], sizes = [1, 128], strides = [1, 1]} : vector<1x512xf32> to vector<1x128xf32>
    %159 = math.tanh %158 : vector<1x128xf32>
    %160 = arith.mulf %156, %143 : vector<1x128xf32>
    %161 = arith.mulf %155, %159 : vector<1x128xf32>
    %162 = arith.addf %160, %161 : vector<1x128xf32>
    %163 = math.tanh %162 : vector<1x128xf32>
    %164 = arith.mulf %157, %163 : vector<1x128xf32>
    %165 = vector.extract_strided_slice %28 {offsets = [7, 0], sizes = [1, 512], strides = [1, 1]} : vector<16x512xf32> to vector<1x512xf32>
    %166 = arith.truncf %164 : vector<1x128xf32> to vector<1x128xbf16>
    %cst_41 = arith.constant dense<0.000000e+00> : vector<1x512xf32>
    %167 = tpu.matmul %166, %29, %cst_41 {dimension_numbers = #tpu.dot_dimension_numbers<[1], [0], [0], [1], [0, 0, 1, 1], [], []>} : vector<1x128xbf16>, vector<128x512xbf16>, vector<1x512xf32> -> vector<1x512xf32>
    %168 = arith.addf %165, %167 : vector<1x512xf32>
    %169 = arith.negf %168 : vector<1x512xf32>
    %170 = math.exp %169 : vector<1x512xf32>
    %cst_42 = arith.constant 1.000000e+00 : f32
    %171 = vector.broadcast %cst_42 : f32 to vector<1x512xf32>
    %172 = arith.addf %171, %170 : vector<1x512xf32>
    %173 = arith.divf %171, %172 : vector<1x512xf32>
    %174 = vector.extract_strided_slice %173 {offsets = [0, 0], sizes = [1, 128], strides = [1, 1]} : vector<1x512xf32> to vector<1x128xf32>
    %175 = vector.extract_strided_slice %173 {offsets = [0, 128], sizes = [1, 128], strides = [1, 1]} : vector<1x512xf32> to vector<1x128xf32>
    %176 = vector.extract_strided_slice %173 {offsets = [0, 384], sizes = [1, 128], strides = [1, 1]} : vector<1x512xf32> to vector<1x128xf32>
    %177 = vector.extract_strided_slice %168 {offsets = [0, 256], sizes = [1, 128], strides = [1, 1]} : vector<1x512xf32> to vector<1x128xf32>
    %178 = math.tanh %177 : vector<1x128xf32>
    %179 = arith.mulf %175, %162 : vector<1x128xf32>
    %180 = arith.mulf %174, %178 : vector<1x128xf32>
    %181 = arith.addf %179, %180 : vector<1x128xf32>
    %182 = math.tanh %181 : vector<1x128xf32>
    %183 = arith.mulf %176, %182 : vector<1x128xf32>
    %184 = vector.extract_strided_slice %28 {offsets = [8, 0], sizes = [1, 512], strides = [1, 1]} : vector<16x512xf32> to vector<1x512xf32>
    %185 = arith.truncf %183 : vector<1x128xf32> to vector<1x128xbf16>
    %cst_43 = arith.constant dense<0.000000e+00> : vector<1x512xf32>
    %186 = tpu.matmul %185, %29, %cst_43 {dimension_numbers = #tpu.dot_dimension_numbers<[1], [0], [0], [1], [0, 0, 1, 1], [], []>} : vector<1x128xbf16>, vector<128x512xbf16>, vector<1x512xf32> -> vector<1x512xf32>
    %187 = arith.addf %184, %186 : vector<1x512xf32>
    %188 = arith.negf %187 : vector<1x512xf32>
    %189 = math.exp %188 : vector<1x512xf32>
    %cst_44 = arith.constant 1.000000e+00 : f32
    %190 = vector.broadcast %cst_44 : f32 to vector<1x512xf32>
    %191 = arith.addf %190, %189 : vector<1x512xf32>
    %192 = arith.divf %190, %191 : vector<1x512xf32>
    %193 = vector.extract_strided_slice %192 {offsets = [0, 0], sizes = [1, 128], strides = [1, 1]} : vector<1x512xf32> to vector<1x128xf32>
    %194 = vector.extract_strided_slice %192 {offsets = [0, 128], sizes = [1, 128], strides = [1, 1]} : vector<1x512xf32> to vector<1x128xf32>
    %195 = vector.extract_strided_slice %192 {offsets = [0, 384], sizes = [1, 128], strides = [1, 1]} : vector<1x512xf32> to vector<1x128xf32>
    %196 = vector.extract_strided_slice %187 {offsets = [0, 256], sizes = [1, 128], strides = [1, 1]} : vector<1x512xf32> to vector<1x128xf32>
    %197 = math.tanh %196 : vector<1x128xf32>
    %198 = arith.mulf %194, %181 : vector<1x128xf32>
    %199 = arith.mulf %193, %197 : vector<1x128xf32>
    %200 = arith.addf %198, %199 : vector<1x128xf32>
    %201 = math.tanh %200 : vector<1x128xf32>
    %202 = arith.mulf %195, %201 : vector<1x128xf32>
    %203 = vector.extract_strided_slice %28 {offsets = [9, 0], sizes = [1, 512], strides = [1, 1]} : vector<16x512xf32> to vector<1x512xf32>
    %204 = arith.truncf %202 : vector<1x128xf32> to vector<1x128xbf16>
    %cst_45 = arith.constant dense<0.000000e+00> : vector<1x512xf32>
    %205 = tpu.matmul %204, %29, %cst_45 {dimension_numbers = #tpu.dot_dimension_numbers<[1], [0], [0], [1], [0, 0, 1, 1], [], []>} : vector<1x128xbf16>, vector<128x512xbf16>, vector<1x512xf32> -> vector<1x512xf32>
    %206 = arith.addf %203, %205 : vector<1x512xf32>
    %207 = arith.negf %206 : vector<1x512xf32>
    %208 = math.exp %207 : vector<1x512xf32>
    %cst_46 = arith.constant 1.000000e+00 : f32
    %209 = vector.broadcast %cst_46 : f32 to vector<1x512xf32>
    %210 = arith.addf %209, %208 : vector<1x512xf32>
    %211 = arith.divf %209, %210 : vector<1x512xf32>
    %212 = vector.extract_strided_slice %211 {offsets = [0, 0], sizes = [1, 128], strides = [1, 1]} : vector<1x512xf32> to vector<1x128xf32>
    %213 = vector.extract_strided_slice %211 {offsets = [0, 128], sizes = [1, 128], strides = [1, 1]} : vector<1x512xf32> to vector<1x128xf32>
    %214 = vector.extract_strided_slice %211 {offsets = [0, 384], sizes = [1, 128], strides = [1, 1]} : vector<1x512xf32> to vector<1x128xf32>
    %215 = vector.extract_strided_slice %206 {offsets = [0, 256], sizes = [1, 128], strides = [1, 1]} : vector<1x512xf32> to vector<1x128xf32>
    %216 = math.tanh %215 : vector<1x128xf32>
    %217 = arith.mulf %213, %200 : vector<1x128xf32>
    %218 = arith.mulf %212, %216 : vector<1x128xf32>
    %219 = arith.addf %217, %218 : vector<1x128xf32>
    %220 = math.tanh %219 : vector<1x128xf32>
    %221 = arith.mulf %214, %220 : vector<1x128xf32>
    %222 = vector.extract_strided_slice %28 {offsets = [10, 0], sizes = [1, 512], strides = [1, 1]} : vector<16x512xf32> to vector<1x512xf32>
    %223 = arith.truncf %221 : vector<1x128xf32> to vector<1x128xbf16>
    %cst_47 = arith.constant dense<0.000000e+00> : vector<1x512xf32>
    %224 = tpu.matmul %223, %29, %cst_47 {dimension_numbers = #tpu.dot_dimension_numbers<[1], [0], [0], [1], [0, 0, 1, 1], [], []>} : vector<1x128xbf16>, vector<128x512xbf16>, vector<1x512xf32> -> vector<1x512xf32>
    %225 = arith.addf %222, %224 : vector<1x512xf32>
    %226 = arith.negf %225 : vector<1x512xf32>
    %227 = math.exp %226 : vector<1x512xf32>
    %cst_48 = arith.constant 1.000000e+00 : f32
    %228 = vector.broadcast %cst_48 : f32 to vector<1x512xf32>
    %229 = arith.addf %228, %227 : vector<1x512xf32>
    %230 = arith.divf %228, %229 : vector<1x512xf32>
    %231 = vector.extract_strided_slice %230 {offsets = [0, 0], sizes = [1, 128], strides = [1, 1]} : vector<1x512xf32> to vector<1x128xf32>
    %232 = vector.extract_strided_slice %230 {offsets = [0, 128], sizes = [1, 128], strides = [1, 1]} : vector<1x512xf32> to vector<1x128xf32>
    %233 = vector.extract_strided_slice %230 {offsets = [0, 384], sizes = [1, 128], strides = [1, 1]} : vector<1x512xf32> to vector<1x128xf32>
    %234 = vector.extract_strided_slice %225 {offsets = [0, 256], sizes = [1, 128], strides = [1, 1]} : vector<1x512xf32> to vector<1x128xf32>
    %235 = math.tanh %234 : vector<1x128xf32>
    %236 = arith.mulf %232, %219 : vector<1x128xf32>
    %237 = arith.mulf %231, %235 : vector<1x128xf32>
    %238 = arith.addf %236, %237 : vector<1x128xf32>
    %239 = math.tanh %238 : vector<1x128xf32>
    %240 = arith.mulf %233, %239 : vector<1x128xf32>
    %241 = vector.extract_strided_slice %28 {offsets = [11, 0], sizes = [1, 512], strides = [1, 1]} : vector<16x512xf32> to vector<1x512xf32>
    %242 = arith.truncf %240 : vector<1x128xf32> to vector<1x128xbf16>
    %cst_49 = arith.constant dense<0.000000e+00> : vector<1x512xf32>
    %243 = tpu.matmul %242, %29, %cst_49 {dimension_numbers = #tpu.dot_dimension_numbers<[1], [0], [0], [1], [0, 0, 1, 1], [], []>} : vector<1x128xbf16>, vector<128x512xbf16>, vector<1x512xf32> -> vector<1x512xf32>
    %244 = arith.addf %241, %243 : vector<1x512xf32>
    %245 = arith.negf %244 : vector<1x512xf32>
    %246 = math.exp %245 : vector<1x512xf32>
    %cst_50 = arith.constant 1.000000e+00 : f32
    %247 = vector.broadcast %cst_50 : f32 to vector<1x512xf32>
    %248 = arith.addf %247, %246 : vector<1x512xf32>
    %249 = arith.divf %247, %248 : vector<1x512xf32>
    %250 = vector.extract_strided_slice %249 {offsets = [0, 0], sizes = [1, 128], strides = [1, 1]} : vector<1x512xf32> to vector<1x128xf32>
    %251 = vector.extract_strided_slice %249 {offsets = [0, 128], sizes = [1, 128], strides = [1, 1]} : vector<1x512xf32> to vector<1x128xf32>
    %252 = vector.extract_strided_slice %249 {offsets = [0, 384], sizes = [1, 128], strides = [1, 1]} : vector<1x512xf32> to vector<1x128xf32>
    %253 = vector.extract_strided_slice %244 {offsets = [0, 256], sizes = [1, 128], strides = [1, 1]} : vector<1x512xf32> to vector<1x128xf32>
    %254 = math.tanh %253 : vector<1x128xf32>
    %255 = arith.mulf %251, %238 : vector<1x128xf32>
    %256 = arith.mulf %250, %254 : vector<1x128xf32>
    %257 = arith.addf %255, %256 : vector<1x128xf32>
    %258 = math.tanh %257 : vector<1x128xf32>
    %259 = arith.mulf %252, %258 : vector<1x128xf32>
    %260 = vector.extract_strided_slice %28 {offsets = [12, 0], sizes = [1, 512], strides = [1, 1]} : vector<16x512xf32> to vector<1x512xf32>
    %261 = arith.truncf %259 : vector<1x128xf32> to vector<1x128xbf16>
    %cst_51 = arith.constant dense<0.000000e+00> : vector<1x512xf32>
    %262 = tpu.matmul %261, %29, %cst_51 {dimension_numbers = #tpu.dot_dimension_numbers<[1], [0], [0], [1], [0, 0, 1, 1], [], []>} : vector<1x128xbf16>, vector<128x512xbf16>, vector<1x512xf32> -> vector<1x512xf32>
    %263 = arith.addf %260, %262 : vector<1x512xf32>
    %264 = arith.negf %263 : vector<1x512xf32>
    %265 = math.exp %264 : vector<1x512xf32>
    %cst_52 = arith.constant 1.000000e+00 : f32
    %266 = vector.broadcast %cst_52 : f32 to vector<1x512xf32>
    %267 = arith.addf %266, %265 : vector<1x512xf32>
    %268 = arith.divf %266, %267 : vector<1x512xf32>
    %269 = vector.extract_strided_slice %268 {offsets = [0, 0], sizes = [1, 128], strides = [1, 1]} : vector<1x512xf32> to vector<1x128xf32>
    %270 = vector.extract_strided_slice %268 {offsets = [0, 128], sizes = [1, 128], strides = [1, 1]} : vector<1x512xf32> to vector<1x128xf32>
    %271 = vector.extract_strided_slice %268 {offsets = [0, 384], sizes = [1, 128], strides = [1, 1]} : vector<1x512xf32> to vector<1x128xf32>
    %272 = vector.extract_strided_slice %263 {offsets = [0, 256], sizes = [1, 128], strides = [1, 1]} : vector<1x512xf32> to vector<1x128xf32>
    %273 = math.tanh %272 : vector<1x128xf32>
    %274 = arith.mulf %270, %257 : vector<1x128xf32>
    %275 = arith.mulf %269, %273 : vector<1x128xf32>
    %276 = arith.addf %274, %275 : vector<1x128xf32>
    %277 = math.tanh %276 : vector<1x128xf32>
    %278 = arith.mulf %271, %277 : vector<1x128xf32>
    %279 = vector.extract_strided_slice %28 {offsets = [13, 0], sizes = [1, 512], strides = [1, 1]} : vector<16x512xf32> to vector<1x512xf32>
    %280 = arith.truncf %278 : vector<1x128xf32> to vector<1x128xbf16>
    %cst_53 = arith.constant dense<0.000000e+00> : vector<1x512xf32>
    %281 = tpu.matmul %280, %29, %cst_53 {dimension_numbers = #tpu.dot_dimension_numbers<[1], [0], [0], [1], [0, 0, 1, 1], [], []>} : vector<1x128xbf16>, vector<128x512xbf16>, vector<1x512xf32> -> vector<1x512xf32>
    %282 = arith.addf %279, %281 : vector<1x512xf32>
    %283 = arith.negf %282 : vector<1x512xf32>
    %284 = math.exp %283 : vector<1x512xf32>
    %cst_54 = arith.constant 1.000000e+00 : f32
    %285 = vector.broadcast %cst_54 : f32 to vector<1x512xf32>
    %286 = arith.addf %285, %284 : vector<1x512xf32>
    %287 = arith.divf %285, %286 : vector<1x512xf32>
    %288 = vector.extract_strided_slice %287 {offsets = [0, 0], sizes = [1, 128], strides = [1, 1]} : vector<1x512xf32> to vector<1x128xf32>
    %289 = vector.extract_strided_slice %287 {offsets = [0, 128], sizes = [1, 128], strides = [1, 1]} : vector<1x512xf32> to vector<1x128xf32>
    %290 = vector.extract_strided_slice %287 {offsets = [0, 384], sizes = [1, 128], strides = [1, 1]} : vector<1x512xf32> to vector<1x128xf32>
    %291 = vector.extract_strided_slice %282 {offsets = [0, 256], sizes = [1, 128], strides = [1, 1]} : vector<1x512xf32> to vector<1x128xf32>
    %292 = math.tanh %291 : vector<1x128xf32>
    %293 = arith.mulf %289, %276 : vector<1x128xf32>
    %294 = arith.mulf %288, %292 : vector<1x128xf32>
    %295 = arith.addf %293, %294 : vector<1x128xf32>
    %296 = math.tanh %295 : vector<1x128xf32>
    %297 = arith.mulf %290, %296 : vector<1x128xf32>
    %298 = vector.extract_strided_slice %28 {offsets = [14, 0], sizes = [1, 512], strides = [1, 1]} : vector<16x512xf32> to vector<1x512xf32>
    %299 = arith.truncf %297 : vector<1x128xf32> to vector<1x128xbf16>
    %cst_55 = arith.constant dense<0.000000e+00> : vector<1x512xf32>
    %300 = tpu.matmul %299, %29, %cst_55 {dimension_numbers = #tpu.dot_dimension_numbers<[1], [0], [0], [1], [0, 0, 1, 1], [], []>} : vector<1x128xbf16>, vector<128x512xbf16>, vector<1x512xf32> -> vector<1x512xf32>
    %301 = arith.addf %298, %300 : vector<1x512xf32>
    %302 = arith.negf %301 : vector<1x512xf32>
    %303 = math.exp %302 : vector<1x512xf32>
    %cst_56 = arith.constant 1.000000e+00 : f32
    %304 = vector.broadcast %cst_56 : f32 to vector<1x512xf32>
    %305 = arith.addf %304, %303 : vector<1x512xf32>
    %306 = arith.divf %304, %305 : vector<1x512xf32>
    %307 = vector.extract_strided_slice %306 {offsets = [0, 0], sizes = [1, 128], strides = [1, 1]} : vector<1x512xf32> to vector<1x128xf32>
    %308 = vector.extract_strided_slice %306 {offsets = [0, 128], sizes = [1, 128], strides = [1, 1]} : vector<1x512xf32> to vector<1x128xf32>
    %309 = vector.extract_strided_slice %306 {offsets = [0, 384], sizes = [1, 128], strides = [1, 1]} : vector<1x512xf32> to vector<1x128xf32>
    %310 = vector.extract_strided_slice %301 {offsets = [0, 256], sizes = [1, 128], strides = [1, 1]} : vector<1x512xf32> to vector<1x128xf32>
    %311 = math.tanh %310 : vector<1x128xf32>
    %312 = arith.mulf %308, %295 : vector<1x128xf32>
    %313 = arith.mulf %307, %311 : vector<1x128xf32>
    %314 = arith.addf %312, %313 : vector<1x128xf32>
    %315 = math.tanh %314 : vector<1x128xf32>
    %316 = arith.mulf %309, %315 : vector<1x128xf32>
    %317 = vector.extract_strided_slice %28 {offsets = [15, 0], sizes = [1, 512], strides = [1, 1]} : vector<16x512xf32> to vector<1x512xf32>
    %318 = arith.truncf %316 : vector<1x128xf32> to vector<1x128xbf16>
    %cst_57 = arith.constant dense<0.000000e+00> : vector<1x512xf32>
    %319 = tpu.matmul %318, %29, %cst_57 {dimension_numbers = #tpu.dot_dimension_numbers<[1], [0], [0], [1], [0, 0, 1, 1], [], []>} : vector<1x128xbf16>, vector<128x512xbf16>, vector<1x512xf32> -> vector<1x512xf32>
    %320 = arith.addf %317, %319 : vector<1x512xf32>
    %321 = arith.negf %320 : vector<1x512xf32>
    %322 = math.exp %321 : vector<1x512xf32>
    %cst_58 = arith.constant 1.000000e+00 : f32
    %323 = vector.broadcast %cst_58 : f32 to vector<1x512xf32>
    %324 = arith.addf %323, %322 : vector<1x512xf32>
    %325 = arith.divf %323, %324 : vector<1x512xf32>
    %326 = vector.extract_strided_slice %325 {offsets = [0, 0], sizes = [1, 128], strides = [1, 1]} : vector<1x512xf32> to vector<1x128xf32>
    %327 = vector.extract_strided_slice %325 {offsets = [0, 128], sizes = [1, 128], strides = [1, 1]} : vector<1x512xf32> to vector<1x128xf32>
    %328 = vector.extract_strided_slice %325 {offsets = [0, 384], sizes = [1, 128], strides = [1, 1]} : vector<1x512xf32> to vector<1x128xf32>
    %329 = vector.extract_strided_slice %320 {offsets = [0, 256], sizes = [1, 128], strides = [1, 1]} : vector<1x512xf32> to vector<1x128xf32>
    %330 = math.tanh %329 : vector<1x128xf32>
    %331 = arith.mulf %327, %314 : vector<1x128xf32>
    %332 = arith.mulf %326, %330 : vector<1x128xf32>
    %333 = arith.addf %331, %332 : vector<1x128xf32>
    %334 = math.tanh %333 : vector<1x128xf32>
    %335 = arith.mulf %328, %334 : vector<1x128xf32>
    %336 = tpu.concatenate %50, %69, %88, %107, %126, %145, %164, %183, %202, %221, %240, %259, %278, %297, %316, %335 in 0 : vector<1x128xf32>, vector<1x128xf32>, vector<1x128xf32>, vector<1x128xf32>, vector<1x128xf32>, vector<1x128xf32>, vector<1x128xf32>, vector<1x128xf32>, vector<1x128xf32>, vector<1x128xf32>, vector<1x128xf32>, vector<1x128xf32>, vector<1x128xf32>, vector<1x128xf32>, vector<1x128xf32>, vector<1x128xf32> -> vector<16x128xf32>
    %337 = arith.truncf %336 : vector<16x128xf32> to vector<16x128xbf16>
    %c0_59 = arith.constant 0 : index
    %c0_60 = arith.constant 0 : index
    %338 = vector.load %arg10[%c0_59, %c0_60] : memref<128x128xbf16, #tpu.memory_space<vmem>>, vector<128x128xbf16>
    %cst_61 = arith.constant dense<0.000000e+00> : vector<16x128xf32>
    %339 = tpu.matmul %337, %338, %cst_61 {dimension_numbers = #tpu.dot_dimension_numbers<[1], [0], [0], [1], [0, 0, 1, 1], [], []>} : vector<16x128xbf16>, vector<128x128xbf16>, vector<16x128xf32> -> vector<16x128xf32>
    %c0_62 = arith.constant 0 : index
    %c0_63 = arith.constant 0 : index
    %340 = vector.load %arg11[%c0_62, %c0_63] : memref<1x128xf32, #tpu.memory_space<vmem>>, vector<1x128xf32>
    %341 = vector.broadcast %340 : vector<1x128xf32> to vector<16x128xf32>
    %342 = arith.addf %339, %341 : vector<16x128xf32>
    %c0_64 = arith.constant 0 : index
    %c0_65 = arith.constant 0 : index
    %c0_66 = arith.constant 0 : index
    %343 = vector.load %arg12[%c0_64, %c0_65, %c0_66] : memref<1x16x128xf32, #tpu.memory_space<vmem>>, vector<1x16x128xf32>
    %344 = vector.shape_cast %343 : vector<1x16x128xf32> to vector<16x128xf32>
    %345 = vector.shape_cast %342 : vector<16x128xf32> to vector<1x16x128xf32>
    tpu.vector_store %arg12[%c0_64, %c0_65, %c0_66], %345 {strides = array<i32>} : memref<1x16x128xf32, #tpu.memory_space<vmem>>, vector<1x16x128xf32>,
    return
  }
  func.func @transform_0(%arg0: i32) -> (i32, i32, i32) {
    %c0_i32 = arith.constant 0 : i32
    %c0_i32_0 = arith.constant 0 : i32
    %c0_i32_1 = arith.constant 0 : i32
    return %arg0, %c0_i32, %c0_i32_0 : i32, i32, i32
  }
  func.func @transform_1(%arg0: i32) -> (i32, i32, i32) {
    %c0_i32 = arith.constant 0 : i32
    %c0_i32_0 = arith.constant 0 : i32
    %c0_i32_1 = arith.constant 0 : i32
    return %arg0, %c0_i32, %c0_i32_0 : i32, i32, i32
  }
  func.func @transform_2(%arg0: i32) -> (i32, i32) {
    %c0_i32 = arith.constant 0 : i32
    %c0_i32_0 = arith.constant 0 : i32
    %c0_i32_1 = arith.constant 0 : i32
    return %c0_i32, %c0_i32_0 : i32, i32
  }
  func.func @transform_3(%arg0: i32) -> (i32, i32) {
    %c0_i32 = arith.constant 0 : i32
    %c0_i32_0 = arith.constant 0 : i32
    %c0_i32_1 = arith.constant 0 : i32
    return %c0_i32, %c0_i32_0 : i32, i32
  }
  func.func @transform_4(%arg0: i32) -> (i32, i32) {
    %c0_i32 = arith.constant 0 : i32
    %c0_i32_0 = arith.constant 0 : i32
    %c0_i32_1 = arith.constant 0 : i32
    return %c0_i32, %c0_i32_0 : i32, i32
  }
  func.func @transform_5(%arg0: i32) -> (i32, i32) {
    %c0_i32 = arith.constant 0 : i32
    %c0_i32_0 = arith.constant 0 : i32
    %c0_i32_1 = arith.constant 0 : i32
    return %c0_i32, %c0_i32_0 : i32, i32
  }
  func.func @transform_6(%arg0: i32) -> (i32, i32) {
    %c0_i32 = arith.constant 0 : i32
    %c0_i32_0 = arith.constant 0 : i32
    %c0_i32_1 = arith.constant 0 : i32
    return %c0_i32, %c0_i32_0 : i32, i32
  }
  func.func @transform_7(%arg0: i32) -> (i32, i32) {
    %c0_i32 = arith.constant 0 : i32
    %c0_i32_0 = arith.constant 0 : i32
    %c0_i32_1 = arith.constant 0 : i32
    return %c0_i32, %c0_i32_0 : i32, i32
  }
  func.func @transform_8(%arg0: i32) -> (i32, i32) {
    %c0_i32 = arith.constant 0 : i32
    %c0_i32_0 = arith.constant 0 : i32
    %c0_i32_1 = arith.constant 0 : i32
    return %c0_i32, %c0_i32_0 : i32, i32
  }
  func.func @transform_9(%arg0: i32) -> (i32, i32) {
    %c0_i32 = arith.constant 0 : i32
    %c0_i32_0 = arith.constant 0 : i32
    %c0_i32_1 = arith.constant 0 : i32
    return %c0_i32, %c0_i32_0 : i32, i32
  }
  func.func @transform_10(%arg0: i32) -> (i32, i32) {
    %c0_i32 = arith.constant 0 : i32
    %c0_i32_0 = arith.constant 0 : i32
    %c0_i32_1 = arith.constant 0 : i32
    return %c0_i32, %c0_i32_0 : i32, i32
  }
  func.func @transform_11(%arg0: i32) -> (i32, i32, i32) {
    %c0_i32 = arith.constant 0 : i32
    %c0_i32_0 = arith.constant 0 : i32
    %c0_i32_1 = arith.constant 0 : i32
    return %arg0, %c0_i32, %c0_i32_0 : i32, i32, i32
  }
}

</mosaic_0001>

<bundles_post_ra>
// kernel: tpu_custom_call.1
= control target key start
LH: loop header
LB: loop body
LE: loop exit
PB: predicated region body
PF: predicated region fallthrough
CT: control target
= control target key end

     0   :  { %s5669_s0 = inlined_call_operand.hbm [shape: bf16[4,16,16], index: 0, kind: input, shape index: {}]   ;;  %s5670_s1 = inlined_call_operand.vmem [shape: bf16[4,16,8], index: 1, kind: input, shape index: {}]   ;;  %s5671_s2 = inlined_call_operand.vmem [shape: bf16[8,64], index: 2, kind: input, shape index: {}]   ;;  %s5672_s3 = inlined_call_operand.vmem [shape: f32[1,64], index: 3, kind: input, shape index: {}]   ;;  %s5673_s4 = inlined_call_operand.hbm [shape: bf16[64,64], index: 4, kind: input, shape index: {}]   ;;  %s5674_s5 = inlined_call_operand.vmem [shape: f32[1,64], index: 5, kind: input, shape index: {}]   ;;  %s5675_s6 = inlined_call_operand.hbm [shape: bf16[64,512], index: 6, kind: input, shape index: {}]   ;;  %s5676_s7 = inlined_call_operand.hbm [shape: bf16[128,512], index: 7, kind: input, shape index: {}]   ;;  %s5677_s8 = inlined_call_operand.vmem [shape: f32[1,512], index: 8, kind: input, shape index: {}]   ;;  %s5678_s9 = inlined_call_operand.vmem [shape: bf16[128,128], index: 9, kind: input, shape index: {}]   ;;  %s5679_s10 = inlined_call_operand.vmem [shape: f32[1,128], index: 10, kind: input, shape index: {}]   ;;  %s5680_s11 = inlined_call_operand.hbm [shape: f32[4,16,128], index: 11, kind: output, shape index: {}]  }
   0x1   :  { %5690 = sst [smem:[#allocation17_spill]] %s5673_s4 }
   0x2   :  { %5691 = sst [smem:[#allocation18_spill]] %s5678_s9 }
   0x3   :  { %5692 = sst [smem:[#allocation19_spill]] %s5679_s10 }
   0x4   :  { %5693 = sst [smem:[#allocation20_spill]] %s5680_s11 }
   0x5   :  { %16 = vsyncpa [#allocation3], 0 }
   0x6   :  { %18 = vsyncpa [#allocation3 + $0x1], 0 }
   0x7   :  { %19 = vsyncpa [#allocation6], 0 }
   0x8   :  { %20 = vsyncpa [#allocation9], 0 }
   0x9   :  { %21 = vsyncpa [#allocation4], 0 }
   0xa   :  { %23 = vsyncpa [#allocation4 + $0x1], 0  ;;  %s4390_s17 = smov 0   ;;  %s4392_s18 = smov 0  }
   0xb   :  { %s4394_s19 = smov 0   ;;  %s4396_s20 = smov 0  }
   0xc LB: > { %5694 = sst [smem:[#allocation15_spill]] %s4302_s17  ;;  %s4411_s21 = sadd.s32 4294967295, %s4314_s20   ;;  %s4314_s20 = sphi %s4396_s20, %s5722_s20   ;;  %s4310_s19 = sphi %s4394_s19, %s5721_s19   ;;  %s4306_s18 = sphi %s4392_s18, %s5720_s18   ;;  %s4302_s17 = sphi %s4390_s17, %s5719_s17  }
   0xd   : > { %s3420_s22 = sadd.s32 4294967294, %s4314_s20   ;;  %p49_p0 = scmp.ne.s32.totalorder %s4306_s18, %s4302_s17 }
   0xe   : > { %p5681_p1 = scmp.eq.s32.totalorder %s4411_s21, 0  ;;  %p294_p3 = scmp.eq.s32.totalorder %s3420_s22, 3 }
   0xf   : > { %p3421_p5 = scmp.ge.s32.totalorder %s4314_s20, 1  ;;  %p301_p7 = scmp.lt.s32.totalorder %s4314_s20, 5 }
  0x10   : > { %p4420_p4 = por %p5681_p1, %p49_p0  ;;  %p4425_p6 = por %p294_p3, %p49_p0 }
  0x11   : > { %p4430_p8 = pnand %p3421_p5, %p301_p7  ;;  %s4316_s26 = smov [#allocation5]  }
  0x12   : > { %s5695_s23 = scalar_select %p4420_p4, 1, 0 }
  0x13   : > { %s5696_s24 = scalar_select %p4425_p6, 1, 0 }
  0x14   : > { %s5698_s25 = scalar_select %p4430_p8, 1, 0 }
  0x15   : > { %5697 = sst [smem:[#allocation16_spill]] %s5696_s24  ;;  %s319_s27 = sshll.u32 %s4316_s26, 4  ;;  %s320_s27 = int_to_ptr.vmem [resolvable:$true] %s319_s27 }
  0x16   : > { %p3650_p9 = pneg %p4430_p8  ;;  %s4317_s29 = smov [#allocation7]  }
  0x17   : > { %s335_s30 = sshll.u32 %s4317_s29, 4  ;;  %s5700_s4 = sld [smem:[#allocation17_spill]]  ;;  %s4442_s30 = int_to_ptr.vmem [resolvable:$true] %s335_s30 }
  0x18   : > { %p4438_p10 = pnand %p3650_p9, %p5681_p1 }
  0x1a   : > { %p4452_p12 = pneg %p4438_p10 }
  0x1d   : > { %s4126_s14 = scalar_lea.hbm %s5700_s4, 512 }
  0x1e   : > { %p4127_p11 = scmp.ne.s32.totalorder %s5700_s4, %s4126_s14  ;;  %p4133_p3 = scmp.lt.u32.totalorder %s4126_s14, %s5700_s4 }
  0x20   : > { %p4129_p13 = pnand %p4452_p12, %p4127_p11 }
  0x22   : > { %p4130_p0 = pneg %p4129_p13 }
  0x24   : > { %p4135_p5 = pnand %p4133_p3, %p4130_p0 }
  0x26   : > { %4138 = shalt.err (!%p4135_p5)
}
  0x27   : > { %s4139_s12 = scalar_lea.vmem %s320_s27, 512  ;;  %p4147_p2 = scmp.lt.s32.totalorder %s320_s27, %s320_s27 }
  0x28   : > { %p4140_p7 = scmp.ne.s32.totalorder %s320_s27, %s4139_s12  ;;  %p4148_p6 = scmp.lt.s32.totalorder %s4139_s12, %s4139_s12 }
  0x2a   : > { %p4142_p9 = pnand %p4140_p7, %p4452_p12  ;;  %p4149_p4 = por %p4148_p6, %p4147_p2 }
  0x2c   : > { %p4143_p1 = pneg %p4142_p9 }
  0x2e   : > { %p4150_p8 = pnand %p4149_p4, %p4143_p1 }
  0x30   : > { %4153 = shalt.err (!%p4150_p8)
}
  0x31   : > { %s5687_s13 = smov 64   ;;  %s5688_s15 = smov 4  }
  0x32   : > { %3653 = dma.hbm_to_vmem [thread:$0]  (!%p4438_p10), %s5700_s4, 512, %s320_s27, [#allocation6], %s5687_s13, %s5687_s13, %s5688_s15  }
  0x33   : > { %s4154_s24 = scalar_lea.hbm %s5675_s6, 2048 }
  0x34   : > { %p4155_p1 = scmp.ne.s32.totalorder %s5675_s6, %s4154_s24  ;;  %p4161_p6 = scmp.lt.u32.totalorder %s4154_s24, %s5675_s6 }
  0x36   : > { %p4157_p2 = pnand %p4155_p1, %p4452_p12 }
  0x38   : > { %p4158_p4 = pneg %p4157_p2 }
  0x3a   : > { %p4163_p8 = pnand %p4161_p6, %p4158_p4 }
  0x3c   : > { %4166 = shalt.err (!%p4163_p8)
}
  0x3d   : > { %s4167_s27 = scalar_lea.vmem %s4442_s30, 2048  ;;  %p4175_p3 = scmp.lt.s32.totalorder %s4442_s30, %s4442_s30 }
  0x3e   : > { %p4168_p11 = scmp.ne.s32.totalorder %s4442_s30, %s4167_s27  ;;  %p4176_p5 = scmp.lt.s32.totalorder %s4167_s27, %s4167_s27 }
  0x40   : > { %p4170_p13 = pnand %p4168_p11, %p4452_p12  ;;  %p4177_p7 = por %p4176_p5, %p4175_p3 }
  0x42   : > { %p4171_p0 = pneg %p4170_p13 }
  0x44   : > { %p4178_p9 = pnand %p4177_p7, %p4171_p0 }
  0x46   : > { %4181 = shalt.err (!%p4178_p9)
}
  0x47   : > { %s4320_s17 = smov 256   ;;  %s4321_s10 = smov 16  }
  0x48   : > { %3656 = dma.hbm_to_vmem [thread:$0]  (!%p4438_p10), %s5675_s6, 2048, %s4442_s30, [#allocation6], %s4320_s17, %s4320_s17, %s4321_s10  }
  0x49   : > { %s4322_s14 = smov [#allocation8]   ;;  %s4495_s26 = sadd.s32 1, %s4314_s20  }
  0x4a   : > { %s348_s16 = sshll.u32 %s4322_s14, 4  ;;  %s4182_s27 = scalar_lea.hbm %s5676_s7, 4096  ;;  %s349_s16 = int_to_ptr.vmem [resolvable:$true] %s348_s16 }
  0x4b   : > { %p4183_p1 = scmp.ne.s32.totalorder %s5676_s7, %s4182_s27  ;;  %p4189_p6 = scmp.lt.u32.totalorder %s4182_s27, %s5676_s7 }
  0x4d   : > { %p4185_p2 = pnand %p4183_p1, %p4452_p12 }
  0x4f   : > { %p4186_p4 = pneg %p4185_p2 }
  0x51   : > { %p4191_p8 = pnand %p4189_p6, %p4186_p4 }
  0x53   : > { %4194 = shalt.err (!%p4191_p8)
}
  0x54   : > { %s4195_s30 = scalar_lea.vmem %s349_s16, 4096  ;;  %p4203_p3 = scmp.lt.s32.totalorder %s349_s16, %s349_s16 }
  0x55   : > { %p4196_p11 = scmp.ne.s32.totalorder %s349_s16, %s4195_s30  ;;  %p4204_p5 = scmp.lt.s32.totalorder %s4195_s30, %s4195_s30 }
  0x57   : > { %p4198_p13 = pnand %p4196_p11, %p4452_p12  ;;  %p4205_p7 = por %p4204_p5, %p4203_p3 }
  0x59   : > { %p4199_p0 = pneg %p4198_p13 }
  0x5b   : > { %p4206_p9 = pnand %p4205_p7, %p4199_p0 }
  0x5d   : > { %4209 = shalt.err (!%p4206_p9)
}
  0x5e   : > { %3659 = dma.hbm_to_vmem [thread:$0]  (!%p4438_p10), %s5676_s7, 4096, %s349_s16, [#allocation9], %s4320_s17, %s4320_s17, %s4321_s10  }
  0x5f   : > { %s33_s4 = ssub.s32 %s4314_s20, %s4495_s26  ;;  %s36_s9 = sadd.s32 1, %s4310_s19 }
  0x60   : > { %p34_p12 = scmp.eq.s32.totalorder %s33_s4, 0  ;;  %p43_p1 = scmp.ne.s32.totalorder %s4310_s19, %s4306_s18 }
  0x61   : > { %p44_p2 = scmp.eq.s32.totalorder %s4314_s20, 0  ;;  %p3671_p4 = scmp.lt.s32.totalorder %s4314_s20, 4 }
  0x62   : > { %s4523_s28 = scalar_select %p34_p12, %s4310_s19, %s36_s9  }
  0x63   : > { %p45_p6 = por %p44_p2, %p43_p1  ;;  %p5702_p8 = scmp.eq.s32.totalorder %s4411_s21, 3 }
  0x64   : > { %s371_s11 = sand.u32 1, %s4310_s19   ;;  %s3561_s24 = sshll.u32 %s4314_s20, 7 }
  0x65   : > { %p4527_p11 = por %p5702_p8, %p43_p1  ;;  %s3426_s14 = sshll.u32 %s371_s11, 3 }
  0x66   : > { %s4536_s17 = scalar_lea.hbm %s5669_s0, %s3561_s24  ;;  %s375_s10 = scalar_lea.vmem [#allocation2], %s3426_s14 }
  0x67   : > { %s382_s16 = sshll.u32 %s375_s10, 4  ;;  %p4538_p10 = pnand %p3671_p4, %p45_p6  ;;  %s4542_s16 = int_to_ptr.vmem [resolvable:$true] %s382_s16 }
  0x68   : > { %s4544_s30 = scalar_lea.sflag [#allocation3], %s371_s11  ;;  %s4210_s13 = scalar_lea.hbm %s4536_s17, 128 }
  0x69   : > { %p4211_p13 = scmp.ne.s32.totalorder %s4536_s17, %s4210_s13  ;;  %p4212_p0 = pneg %p4538_p10 }
  0x6a   : > { %s4215_s9 = scalar_lea.hbm %s5669_s0, 512  ;;  %p4216_p7 = scmp.lt.u32.totalorder %s4536_s17, %s5669_s0 }
  0x6b   : > { %p4213_p3 = pnand %p4212_p0, %p4211_p13  ;;  %p4217_p9 = scmp.lt.u32.totalorder %s4215_s9, %s4210_s13 }
  0x6c   : > { %p4219_p1 = scmp.lt.u32.totalorder %s4210_s13, %s4536_s17 }
  0x6d   : > { %p4214_p5 = pneg %p4213_p3  ;;  %p4218_p12 = por %p4217_p9, %p4216_p7 }
  0x6f   : > { %p4220_p2 = por %p4219_p1, %p4218_p12 }
  0x71   : > { %p4221_p4 = pnand %p4220_p2, %p4214_p5 }
  0x73   : > { %4224 = shalt.err (!%p4221_p4)
}
  0x74   : > { %s4225_s11 = scalar_lea.vmem %s4542_s16, 128  ;;  %s4323_s29 = smov [#allocation2]  }
  0x75   : > { %p4226_p6 = scmp.ne.s32.totalorder %s4542_s16, %s4225_s11  ;;  %s4230_s12 = sshll.u32 %s4323_s29, 4  ;;  %s4231_s12 = int_to_ptr.vmem [resolvable:$false] %s4230_s12 }
  0x76   : > { %s4232_s10 = scalar_lea.vmem %s4231_s12, 256  ;;  %p4233_p3 = scmp.lt.s32.totalorder %s4542_s16, %s4231_s12 }
  0x77   : > { %p4228_p8 = pnand %p4226_p6, %p4212_p0  ;;  %p4234_p7 = scmp.lt.s32.totalorder %s4232_s10, %s4225_s11 }
  0x79   : > { %p4229_p13 = pneg %p4228_p8  ;;  %p4235_p9 = por %p4234_p7, %p4233_p3 }
  0x7b   : > { %p4236_p12 = pnand %p4235_p9, %p4229_p13 }
  0x7d   : > { %4239 = shalt.err (!%p4236_p12)
}
  0x7e   : > { %s5705_s13 = smov 4   ;;  %s5706_s15 = smov 64  }
  0x7f   : > { %3663 = dma.hbm_to_vmem [thread:$0]  (!%p4538_p10), %s4536_s17, 128, %s4542_s16, %s4544_s30, %s5706_s15, %s5706_s15, %s5705_s13  }
  0x80   : > { %p5707_p0 = scmp.ne.s32.totalorder %s5698_s25, 0 }
  0x81   : > { %s4578_s4 = sand.u32 (!%p5707_p0), 1, %s4306_s18   ;;  %p5708_p5 = scmp.ne.s32.totalorder (!%p5707_p0), %s5695_s23, 0 }
  0x82   : > { %402 = sbr.rel (%p5707_p0) target bundleno = 5518 (0x158e), region = 64  ;;  %s3430_s9 = sshll.u32 (!%p5707_p0), %s4578_s4, 3 }
  0x83   : > { %s405_s24 = scalar_lea.sflag (!%p5707_p0), [#allocation3], %s4578_s4  ;;  %s4582_s14 = scalar_lea.vmem (!%p5707_p0), [#allocation2], %s3430_s9 }
  0x89   : > { %4285 = dma.done.wait (%p5708_p5), %s405_s24, 128  }
  0x8a   : > { %4287 = vsyncadd (%p5708_p5), %s405_s24, 4294967168  ;;  %p5709_p10 = scmp.eq.s32.totalorder %s4411_s21, 0 }
  0x8c   : > { %4289 = dma.done.wait (%p5709_p10), [#allocation6], 2560   ;;  %p5710_p1 = pmov %p5709_p10 }
  0x8e   : > { %4291 = vsyncadd (%p5710_p1), [#allocation6], 4294964736  ;;  %p5711_p2 = pmov %p5710_p1 }
  0x8f   : > { %p5712_p4 = pmov %p5710_p1 }
  0x90   : > { %4293 = dma.done.wait (%p5711_p2), [#allocation9], 4096  }
  0x91   : > { %4295 = vsyncadd (%p5712_p4), [#allocation9], 4294963200  ;;  %p464_p6 = scmp.lt.s32.totalorder %s4411_s21, 3  ;;  %v4324_v0 = vmov 0.0   ;;  %vm4325_vm0 = vmmov 0   ;;  %vm484_vm1 = vcmask 1043456  }
  0x92   : > { %3584 = vmatprep.subr.bf16.mxu0 %v4324_v0  ;;  %3586 = vmatprep.mubr.msk.bf16.mxu0 %vm4325_vm0, %v4324_v0  ;;  %vm480_vm2 = vcmask 64512   ;;  %v474_v1 = vld [vmem:[%s5671_s2] sm:$0xf]  ;;  %vm542_vm3 = vcmask 130048   ;;  %v3722_v10 = vld [vmem:[#allocation5] sm:$0xff]   ;;  %v3723_v11 = vld [vmem:[#allocation5 + $0x8] sm:$0xff]  }
  0x93   : > { %s465_s23 = scalar_select %p464_p6, %s4411_s21, 3  ;;  %3608 = vmatprep.subr.bf16.mxu1 %v4324_v0  ;;  %3610 = vmatprep.mubr.msk.bf16.mxu1 %vm4325_vm0, %v4324_v0  ;;  %v486_v2 = vsel %vm484_vm1, %v474_v1, 0  ;;  %v3721_v9 = vld [vmem:[%s4582_s14] sm:$0xff]   ;;  %vm622_vm4 = vcmask 523264   ;;  %v4326_v47 = vmov 0   ;;  %vm3157_vm5 = vcmask 1040384  }
  0x94   : > { %3585 = vmatpush3.bf16.msra.mxu0 %v486_v2  ;;  %v3724_v12 = vld [vmem:[#allocation5 + $0x10] sm:$0xff]   ;;  %v3725_v13 = vld [vmem:[#allocation5 + $0x18] sm:$0xff]   ;;  %vm3159_vm6 = vcmask 1041408   ;;  %vm3161_vm7 = vcmask 1042432   ;;  %vm3164_vm8 = vcmask 1044480   ;;  %vm3166_vm9 = vcmask 1045504  }
  0x95   : > { %s3562_s25 = sshll.u32 %s465_s23, 3  ;;  %3590 = vmatprep.subr.bf16.mxu0 %v4324_v0  ;;  %v3439_v14 = vld [vmem:[%s5672_s3] ss:$0 sm:$0xff]  ;;  %v3729_v24 = vld [vmem:[#allocation7 + $0x8] ss:$16 sps:$4 sm:$0xff]   ;;  %vm3168_vm10 = vcmask 1046528  }
  0x96   : > { %s468_s27 = scalar_lea.vmem %s5670_s1, %s3562_s25  ;;  %v3731_v25 = vld [vmem:[#allocation7 + $0xc] ss:$16 sps:$4 sm:$0xff]   ;;  %v3735_v27 = vld [vmem:[#allocation7 + $0x28] ss:$16 sps:$4 sm:$0xff]   ;;  %v3728_v31 = vld [vmem:[#allocation7 + $0x4] ss:$16 sps:$4 sm:$0xff]  }
  0x97   : > { %v3720_v3 = vld [vmem:[%s468_s27] sm:$0xff]   ;;  %v3737_v26 = vld [vmem:[#allocation7 + $0x2c] ss:$16 sps:$4 sm:$0xff]   ;;  %v3741_v40 = vld [vmem:[#allocation7 + $0x48] ss:$16 sps:$4 sm:$0xff]   ;;  %s5713_s23 = sld [smem:[#allocation18_spill]] }
  0x98   : > { %3587 = vmatmul.mubr.msk.bf16.vlgmr.msra.gmra.mrb[0].mxu0 %vm480_vm2, %v3720_v3  ;;  %v3726_v34 = vld [vmem:[#allocation7] ss:$16 sps:$4 sm:$0xff]   ;;  %v3734_v35 = vld [vmem:[#allocation7 + $0x24] ss:$16 sps:$4 sm:$0xff]   ;;  %v3743_v38 = vld [vmem:[#allocation7 + $0x4c] ss:$16 sps:$4 sm:$0xff]  }
  0x99   : > { %3592 = vmatprep.mubr.msk.bf16.mxu0 %vm4325_vm0, %v4324_v0  ;;  %v3732_v36 = vld [vmem:[#allocation7 + $0x20] ss:$16 sps:$4 sm:$0xff]   ;;  %v3740_v37 = vld [vmem:[#allocation7 + $0x44] ss:$16 sps:$4 sm:$0xff]   ;;  %v3749_v42 = vld [vmem:[#allocation7 + $0x6c] ss:$16 sps:$4 sm:$0xff]  }
  0x9a   : > { %v3738_v39 = vld [vmem:[#allocation7 + $0x40] ss:$16 sps:$4 sm:$0xff]   ;;  %v3746_v41 = vld [vmem:[#allocation7 + $0x64] ss:$16 sps:$4 sm:$0xff]   ;;  %v3747_v44 = vld [vmem:[#allocation7 + $0x68] ss:$16 sps:$4 sm:$0xff]  }
  0x9b   : > { %v3744_v43 = vld [vmem:[#allocation7 + $0x60] ss:$16 sps:$4 sm:$0xff]   ;;  %v4627_v45 = vld [vmem:[#allocation8 + $0x4] ss:$16 sps:$4 sm:$0xff]   ;;  %v4629_v46 = vld [vmem:[#allocation8 + $0xc] ss:$16 sps:$4 sm:$0xff]  }
  0x9c   : > { %v3447_v48 = vld [vmem:[%s5674_s5] ss:$0 sm:$0xff]  ;;  %v4640_v58 = vld [vmem:[#allocation8 + $0x8] ss:$16 sps:$4 sm:$0xff]   ;;  %v4642_v60 = vld [vmem:[#allocation8 + $0x24] ss:$16 sps:$4 sm:$0xff]  }
  0x9d   : > { %v4638_v57 = vld [vmem:[#allocation8] ss:$16 sps:$4 sm:$0xff]   ;;  %v4644_v61 = vld [vmem:[#allocation8 + $0x2c] ss:$16 sps:$4 sm:$0xff]   ;;  %v4652_v63 = vld [vmem:[#allocation8 + $0x28] ss:$16 sps:$4 sm:$0xff]  }
  0x9e   : > { %v4650_v62 = vld [vmem:[#allocation8 + $0x20] ss:$16 sps:$4 sm:$0xff]   ;;  %v4656_v1 = vld [vmem:[#allocation8 + $0x44] ss:$16 sps:$4 sm:$0xff]   ;;  %v4658_v2 = vld [vmem:[#allocation8 + $0x4c] ss:$16 sps:$4 sm:$0xff]  }
  0x9f   : > { %v4664_v3 = vld [vmem:[#allocation8 + $0x40] ss:$16 sps:$4 sm:$0xff]   ;;  %s3434_s25 = sshll.u32 %s4578_s4, 4  ;;  %s5714_s27 = sld [smem:[#allocation19_spill]] }
  0xa0   : > { %s463_s30 = scalar_lea.vmem [#allocation10], %s3434_s25  ;;  %s3563_s29 = sshll.u32 %s4411_s21, 8 }
  0xa1   : > { %s3306_s11 = sshll.u32 %s463_s30, 4  ;;  %s5715_s13 = sld [smem:[#allocation20_spill]]  ;;  %s5621_s11 = int_to_ptr.vmem [resolvable:$true] %s3306_s11 }
  0xa2   : > { %s3293_s9 = scalar_lea.sflag [#allocation4], %s4578_s4  ;;  %s4240_s21 = scalar_lea.vmem %s5621_s11, 256 }
  0xa3   : > { %p4241_p8 = scmp.ne.s32.totalorder %s5621_s11, %s4240_s21  ;;  %s4327_s24 = smov [#allocation10]  }
  0xa4   : > { %s4244_s14 = sshll.u32 %s4327_s24, 4  ;;  %s4245_s14 = int_to_ptr.vmem [resolvable:$false] %s4244_s14 }
  0xa5   : > { %p4242_p13 = pnand %p4241_p8, %p4527_p11  ;;  %s4246_s25 = scalar_lea.vmem %s4245_s14, 512 }
  0xa6   : > { %p4247_p7 = scmp.lt.s32.totalorder %s5621_s11, %s4245_s14  ;;  %p4248_p9 = scmp.lt.s32.totalorder %s4246_s25, %s4240_s21 }
  0xa7   : > { %s5626_s15 = scalar_lea.hbm %s5715_s13, %s3563_s29  ;;  %p4243_p3 = pneg %p4242_p13 }
  0xa8   : > { %p4249_p12 = por %p4248_p9, %p4247_p7 }
  0xaa   : > { %p4250_p0 = pnand %p4249_p12, %p4243_p3 }
 0x16b   : > { %v522_v4 = vpop.f32.mrb[0].mxu0 }
 0x16c   : > { %v3588_v5 = vpop.f32.mrb[1].mxu0 }
 0x16d   : > { %v525_v6 = vpop.f32.mrb[2].mxu0  ;;  %v4670_v5 = vld [vmem:[#allocation8 + $0x64] ss:$16 sps:$4 sm:$0xff]  }
 0x16e   : > { %v529_v7 = vpack.c.bf16 %v525_v6, %v522_v4  ;;  %v3589_v8 = vpop.f32.mrb[3].mxu0  ;;  %v4666_v4 = vld [vmem:[#allocation8 + $0x48] ss:$16 sps:$4 sm:$0xff]   ;;  %v4672_v6 = vld [vmem:[#allocation8 + $0x6c] ss:$16 sps:$4 sm:$0xff]  }
 0x16f   : > { %v4678_v8 = vld [vmem:[#allocation8 + $0x68] ss:$16 sps:$4 sm:$0xff]  }
 0x170   : > { %3591 = vmatpush3.bf16.msra.mxu0 %v529_v7  ;;  %v4676_v7 = vld [vmem:[#allocation8 + $0x60] ss:$16 sps:$4 sm:$0xff]  }
 0x171   : > { %3596 = vmatprep.subr.bf16.mxu0 %v4324_v0 }
 0x173   : > { %3593 = vmatmul.mubr.msk.bf16.vlgmr.msra.gmra.mrb[4].mxu0 %vm542_vm3, %v3721_v9 }
 0x174   : > { %3597 = vmatpush3.bf16.msra.mxu0 %v3722_v10  ;;  %3604 = vmatprep.mubr.msk.bf16.mxu0 %vm4325_vm0, %v4324_v0  ;;  %v4684_v10 = vld [vmem:[#allocation8 + $0x8c] ss:$16 sps:$4 sm:$0xff]  }
 0x175   : > { %3598 = vmatprep.subr.bf16.mxu0 %v4324_v0 }
 0x178   : > { %3599 = vmatpush3.bf16.msra.mxu0 %v3723_v11  ;;  %v4688_v11 = vld [vmem:[#allocation8 + $0x80] ss:$16 sps:$4 sm:$0xff]  }
 0x179   : > { %3600 = vmatprep.subr.bf16.mxu0 %v4324_v0 }
 0x17c   : > { %3601 = vmatpush3.bf16.msra.mxu0 %v3724_v12  ;;  %v4690_v12 = vld [vmem:[#allocation8 + $0x88] ss:$16 sps:$4 sm:$0xff]  }
 0x17d   : > { %3602 = vmatprep.subr.bf16.mxu0 %v4324_v0 }
 0x180   : > { %3603 = vmatpush3.bf16.msra.mxu0 %v3725_v13  ;;  %v4694_v13 = vld [vmem:[#allocation8 + $0xa4] ss:$16 sps:$4 sm:$0xff]  }
 0x181   : > { %883 = vmatprep.subr.bf16.mxu0 %v3731_v25  ;;  %v737_v25 = vlaneseq }
 0x246   : > { %v580_v15 = vpop.f32.mrb[4].mxu0 }
 0x247   : > { %v581_v16 = vadd.f32 %v3439_v14, %v580_v15  ;;  %v3594_v17 = vpop.f32.mrb[5].mxu0  ;;  %v4700_v15 = vld [vmem:[#allocation8 + $0xa0] ss:$16 sps:$4 sm:$0xff]  }
 0x248   : > { %v583_v18 = vpop.f32.mrb[6].mxu0  ;;  %v4706_v17 = vld [vmem:[#allocation8 + $0xc4] ss:$16 sps:$4 sm:$0xff]  }
 0x249   : > { %v584_v19 = vadd.f32 %v3439_v14, %v583_v18  ;;  %v3595_v20 = vpop.f32.mrb[7].mxu0  ;;  %v587_v21 = vmax.f32 %v581_v16, 0.0  ;;  %v4696_v14 = vld [vmem:[#allocation8 + $0xac] ss:$16 sps:$4 sm:$0xff]   ;;  %v4702_v16 = vld [vmem:[#allocation8 + $0xa8] ss:$16 sps:$4 sm:$0xff]  }
 0x24a   : > { %v4708_v18 = vld [vmem:[#allocation8 + $0xcc] ss:$16 sps:$4 sm:$0xff]   ;;  %v4714_v20 = vld [vmem:[#allocation8 + $0xc8] ss:$16 sps:$4 sm:$0xff]  }
 0x24b   : > { %v588_v22 = vmax.f32 %v584_v19, 0.0  ;;  %v4712_v19 = vld [vmem:[#allocation8 + $0xc0] ss:$16 sps:$4 sm:$0xff]  }
 0x24d   : > { %v589_v23 = vpack.c.bf16 %v588_v22, %v587_v21  ;;  %v4718_v21 = vld [vmem:[#allocation8 + $0xe4] ss:$16 sps:$4 sm:$0xff]   ;;  %v4720_v22 = vld [vmem:[#allocation8 + $0xec] ss:$16 sps:$4 sm:$0xff]  }
 0x24f   : > { %3605 = vmatmul.mubr.msk.bf16.vlgmr.msra.gmra.mrb[8].mxu0 %vm622_vm4, %v589_v23  ;;  %v4724_v23 = vld [vmem:[#allocation8 + $0xe0] ss:$16 sps:$4 sm:$0xff]  }
 0x250   : > { %884 = vmatpush1.bf16.msra.mxu0 %v3729_v24  ;;  %915 = vmatprep.mubr.bf16.mxu0 %v4326_v47  ;;  %v4726_v24 = vld [vmem:[#allocation8 + $0xe8] ss:$16 sps:$4 sm:$0xff]  }
 0x251   : > { %885 = vmatprep.subr.bf16.mxu0 %v3737_v26  ;;  %v738_v26 = vshrl.u32 %v737_v25, 7 }
 0x254   : > { %886 = vmatpush1.bf16.msra.mxu0 %v3735_v27  ;;  %v739_v27 = vsub.s32 0, %v738_v26 }
 0x255   : > { %887 = vmatprep.subr.bf16.mxu0 %v3743_v38 }
 0x258   : > { %888 = vmatpush1.bf16.msra.mxu0 %v3741_v40 }
 0x259   : > { %889 = vmatprep.subr.bf16.mxu0 %v3749_v42 }
 0x25c   : > { %890 = vmatpush1.bf16.msra.mxu0 %v3747_v44 }
 0x25d   : > { %1159 = vmatprep.subr.bf16.mxu0 %v4629_v46 }
 0x322   : > { %v660_v28 = vpop.f32.mrb[8].mxu0 }
 0x323   : > { %v3606_v29 = vpop.f32.mrb[9].mxu0 }
 0x324   : > { %v663_v30 = vpop.f32.mrb[10].mxu0  ;;  %v735_v29 = vld [vmem:[%s5677_s8] sm:$0xf] }
 0x325   : > { %v667_v32 = vpack.c.bf16 %v663_v30, %v660_v28  ;;  %v3607_v33 = vpop.f32.mrb[11].mxu0  ;;  %v747_v28 = vsub.s32 2, %v738_v26  ;;  %v743_v30 = vsub.s32 1, %v738_v26 }
 0x327   : > { %3609 = vmatpush3.bf16.msra.mxu1 %v667_v32  ;;  %v744_v38 = vrot.slane %v735_v29, %v743_v30 }
 0x328   : > { %840 = vmatprep.subr.bf16.mxu1 %v3728_v31  ;;  %v751_v31 = vsub.s32 3, %v738_v26 }
 0x32a   : > { %3611 = vmatmul.mubr.msk.bf16.vlgmr.msra.gmra.mrb[0].mxu1 %vm542_vm3, %v3721_v9  ;;  %v4682_v9 = vld [vmem:[#allocation8 + $0x84] ss:$16 sps:$4 sm:$0xff]  }
 0x32b   : > { %841 = vmatpush1.bf16.msra.mxu1 %v3726_v34  ;;  %872 = vmatprep.mubr.bf16.mxu1 %v4326_v47  ;;  %v740_v34 = vrot.slane %v735_v29, %v739_v27 }
 0x32c   : > { %842 = vmatprep.subr.bf16.mxu1 %v3734_v35  ;;  %v748_v35 = vrot.slane %v735_v29, %v747_v28 }
 0x32f   : > { %843 = vmatpush1.bf16.msra.mxu1 %v3732_v36 }
 0x330   : > { %844 = vmatprep.subr.bf16.mxu1 %v3740_v37 }
 0x333   : > { %845 = vmatpush1.bf16.msra.mxu1 %v3738_v39  ;;  %v752_v39 = vrot.slane %v735_v29, %v751_v31 }
 0x334   : > { %846 = vmatprep.subr.bf16.mxu1 %v3746_v41 }
 0x337   : > { %847 = vmatpush1.bf16.msra.mxu1 %v3744_v43 }
 0x338   : > { %1118 = vmatprep.subr.bf16.mxu1 %v4627_v45 }
 0x3fd   : > { %v709_v49 = vpop.f32.mrb[0].mxu1 }
 0x3fe   : > { %v710_v50 = vadd.f32 %v3447_v48, %v709_v49  ;;  %v3612_v51 = vpop.f32.mrb[1].mxu1 }
 0x3ff   : > { %v712_v52 = vpop.f32.mrb[2].mxu1 }
 0x400   : > { %v713_v53 = vadd.f32 %v3447_v48, %v712_v52  ;;  %v3613_v54 = vpop.f32.mrb[3].mxu1  ;;  %v716_v55 = vmax.f32 %v710_v50, 0.0 }
 0x402   : > { %v717_v56 = vmax.f32 %v713_v53, 0.0 }
 0x404   : > { %v718_v59 = vpack.c.bf16 %v717_v56, %v716_v55 }
 0x406   : > { %3465 = vmatmul.mubr.msk.bf16.vlgmr.msra.gmra.mrb[4].mxu1 %vm622_vm4, %v718_v59  ;;  %3466 = vmatmul.mubr.msk.bf16.vlgmr.msra.gmra.mrb[12].mxu0 %vm622_vm4, %v718_v59 }
 0x407   : > { %1119 = vmatpush1.bf16.msra.mxu1 %v4638_v57  ;;  %1160 = vmatpush1.bf16.msra.mxu0 %v4640_v58 }
 0x408   : > { %1120 = vmatprep.subr.bf16.mxu1 %v4642_v60  ;;  %1161 = vmatprep.subr.bf16.mxu0 %v4644_v61 }
 0x409   : > { %1150 = vmatprep.mubr.bf16.mxu1 %v4326_v47  ;;  %1191 = vmatprep.mubr.bf16.mxu0 %v4326_v47 }
 0x40b   : > { %1121 = vmatpush1.bf16.msra.mxu1 %v4650_v62  ;;  %1162 = vmatpush1.bf16.msra.mxu0 %v4652_v63 }
 0x40c   : > { %1122 = vmatprep.subr.bf16.mxu1 %v4656_v1  ;;  %1163 = vmatprep.subr.bf16.mxu0 %v4658_v2 }
 0x40f   : > { %1123 = vmatpush1.bf16.msra.mxu1 %v4664_v3  ;;  %1164 = vmatpush1.bf16.msra.mxu0 %v4666_v4 }
 0x410   : > { %1124 = vmatprep.subr.bf16.mxu1 %v4670_v5  ;;  %1165 = vmatprep.subr.bf16.mxu0 %v4672_v6 }
 0x413   : > { %1125 = vmatpush1.bf16.msra.mxu1 %v4676_v7  ;;  %1166 = vmatpush1.bf16.msra.mxu0 %v4678_v8 }
 0x414   : > { %1126 = vmatprep.subr.bf16.mxu1 %v4682_v9  ;;  %1167 = vmatprep.subr.bf16.mxu0 %v4684_v10 }
 0x417   : > { %1127 = vmatpush1.bf16.msra.mxu1 %v4688_v11  ;;  %1168 = vmatpush1.bf16.msra.mxu0 %v4690_v12 }
 0x418   : > { %1128 = vmatprep.subr.bf16.mxu1 %v4694_v13  ;;  %1169 = vmatprep.subr.bf16.mxu0 %v4696_v14 }
 0x41b   : > { %1129 = vmatpush1.bf16.msra.mxu1 %v4700_v15  ;;  %1170 = vmatpush1.bf16.msra.mxu0 %v4702_v16 }
 0x41c   : > { %1130 = vmatprep.subr.bf16.mxu1 %v4706_v17  ;;  %1171 = vmatprep.subr.bf16.mxu0 %v4708_v18 }
 0x41f   : > { %1131 = vmatpush1.bf16.msra.mxu1 %v4712_v19  ;;  %1172 = vmatpush1.bf16.msra.mxu0 %v4714_v20 }
 0x420   : > { %1132 = vmatprep.subr.bf16.mxu1 %v4718_v21  ;;  %1173 = vmatprep.subr.bf16.mxu0 %v4720_v22 }
 0x423   : > { %1133 = vmatpush1.bf16.msra.mxu1 %v4724_v23  ;;  %1174 = vmatpush1.bf16.msra.mxu0 %v4726_v24 }
 0x424   : > { %1229 = vmatprep.subr.bf16.mxu1 %v4627_v45  ;;  %1270 = vmatprep.subr.bf16.mxu0 %v4629_v46 }
 0x426   : > { %1151 = vmatmul.mubr.bf16.vlgmr.msra.gmra.mrb[8].mxu1 %v4326_v47  ;;  %1192 = vmatmul.mubr.bf16.vlgmr.msra.gmra.mrb[16].mxu0 %v4326_v47 }
 0x427   : > { %1230 = vmatpush1.bf16.msra.mxu1 %v4638_v57  ;;  %1271 = vmatpush1.bf16.msra.mxu0 %v4640_v58 }
 0x428   : > { %1231 = vmatprep.subr.bf16.mxu1 %v4642_v60  ;;  %1272 = vmatprep.subr.bf16.mxu0 %v4644_v61 }
 0x429   : > { %1261 = vmatprep.mubr.bf16.mxu1 %v4326_v47  ;;  %1302 = vmatprep.mubr.bf16.mxu0 %v4326_v47 }
 0x42b   : > { %1232 = vmatpush1.bf16.msra.mxu1 %v4650_v62  ;;  %1273 = vmatpush1.bf16.msra.mxu0 %v4652_v63 }
 0x42c   : > { %1233 = vmatprep.subr.bf16.mxu1 %v4656_v1  ;;  %1274 = vmatprep.subr.bf16.mxu0 %v4658_v2 }
 0x42f   : > { %1234 = vmatpush1.bf16.msra.mxu1 %v4664_v3  ;;  %1275 = vmatpush1.bf16.msra.mxu0 %v4666_v4 }
 0x430   : > { %1235 = vmatprep.subr.bf16.mxu1 %v4670_v5  ;;  %1276 = vmatprep.subr.bf16.mxu0 %v4672_v6 }
 0x433   : > { %1236 = vmatpush1.bf16.msra.mxu1 %v4676_v7  ;;  %1277 = vmatpush1.bf16.msra.mxu0 %v4678_v8 }
 0x434   : > { %1237 = vmatprep.subr.bf16.mxu1 %v4682_v9  ;;  %1278 = vmatprep.subr.bf16.mxu0 %v4684_v10 }
 0x437   : > { %1238 = vmatpush1.bf16.msra.mxu1 %v4688_v11  ;;  %1279 = vmatpush1.bf16.msra.mxu0 %v4690_v12 }
 0x438   : > { %1239 = vmatprep.subr.bf16.mxu1 %v4694_v13  ;;  %1280 = vmatprep.subr.bf16.mxu0 %v4696_v14 }
 0x43b   : > { %1240 = vmatpush1.bf16.msra.mxu1 %v4700_v15  ;;  %1281 = vmatpush1.bf16.msra.mxu0 %v4702_v16 }
 0x43c   : > { %1241 = vmatprep.subr.bf16.mxu1 %v4706_v17  ;;  %1282 = vmatprep.subr.bf16.mxu0 %v4708_v18 }
 0x43f   : > { %1242 = vmatpush1.bf16.msra.mxu1 %v4712_v19  ;;  %1283 = vmatpush1.bf16.msra.mxu0 %v4714_v20 }
 0x440   : > { %1243 = vmatprep.subr.bf16.mxu1 %v4718_v21  ;;  %1284 = vmatprep.subr.bf16.mxu0 %v4720_v22 }
 0x443   : > { %1244 = vmatpush1.bf16.msra.mxu1 %v4724_v23  ;;  %1285 = vmatpush1.bf16.msra.mxu0 %v4726_v24 }
 0x444   : > { %1359 = vmatprep.subr.bf16.mxu1 %v4627_v45  ;;  %1400 = vmatprep.subr.bf16.mxu0 %v4629_v46 }
 0x4d9   : > { %v874_v32 = vpop.f32.mrb[4].mxu1  ;;  %v917_v33 = vpop.f32.mrb[12].mxu0 }
 0x4da   : > { %v876_v36 = vpop.f32.mrb[5].mxu1  ;;  %v919_v37 = vpop.f32.mrb[13].mxu0  ;;  %v4781_v51 = vadd.f32 %v874_v32, %v740_v34 }
 0x4db   : > { %v878_v40 = vpop.f32.mrb[6].mxu1  ;;  %v921_v41 = vpop.f32.mrb[14].mxu0  ;;  %v4783_v52 = vadd.f32 %v876_v36, %v744_v38 }
 0x4dc   : > { %v4773_v42 = vadd.f32 %v878_v40, %v740_v34  ;;  %v4775_v43 = vadd.f32 %v921_v41, %v748_v35  ;;  %v880_v44 = vpop.f32.mrb[7].mxu1  ;;  %v923_v48 = vpop.f32.mrb[15].mxu0  ;;  %v4787_v40 = vadd.f32 %v919_v37, %v752_v39  ;;  %v4790_v34 = vadd.f32 %v917_v33, %v748_v35 }
 0x4dd   : > { %v4777_v49 = vadd.f32 %v880_v44, %v744_v38  ;;  %v4779_v50 = vadd.f32 %v923_v48, %v752_v39 }
 0x4f9   : > { %v1152_v53 = vpop.f32.mrb[8].mxu1  ;;  %v1193_v54 = vpop.f32.mrb[16].mxu0 }
 0x4fa   : > { %v1200_v55 = vadd.f32 %v1152_v53, %v4781_v51  ;;  %v1154_v56 = vpop.f32.mrb[9].mxu1  ;;  %v1195_v59 = vpop.f32.mrb[17].mxu0  ;;  %v1202_v38 = vadd.f32 %v1193_v54, %v4790_v34 }
 0x4fb   : > { %v1201_v25 = vadd.f32 %v1154_v56, %v4783_v52  ;;  %v1156_v26 = vpop.f32.mrb[10].mxu1  ;;  %v1197_v27 = vpop.f32.mrb[18].mxu0  ;;  %v1203_v32 = vadd.f32 %v1195_v59, %v4787_v40 }
 0x4fc   : > { %v3499_v28 = vmul.f32 -1.442695, %v1200_v55  ;;  %v1157_v29 = vpop.f32.mrb[11].mxu1  ;;  %v1198_v30 = vpop.f32.mrb[19].mxu0 }
 0x4fd   : > { %v3500_v31 = vmul.f32 -1.442695, %v1201_v25  ;;  %v3501_v36 = vmul.f32 -1.442695, %v1203_v32 }
 0x4fe   : > { %3806 = vpow2.f32 %v3499_v28 }
 0x4ff   : > { %3808 = vpow2.f32 %v3500_v31 }
 0x500   : > { %3810 = vpow2.f32 %v3501_v36 }
 0x501   : > { %3812 = vtanh.f32 %v1202_v38 }
 0x508   : > { %v3807_v41 = vpop.eup %3806 }
 0x509   : > { %v3809_v44 = vpop.eup %3808  ;;  %v1213_v48 = vadd.f32 1.0, %v3807_v41 }
 0x50a   : > { %v1214_v53 = vadd.f32 1.0, %v3809_v44  ;;  %v3811_v55 = vpop.eup %3810 }
 0x50b   : > { %3814 = vrcp.f32 %v1213_v48  ;;  %v3813_v56 = vpop.eup %3812  ;;  %v1215_v26 = vadd.f32 1.0, %v3811_v55 }
 0x50c   : > { %3816 = vrcp.f32 %v1214_v53 }
 0x50d   : > { %3818 = vrcp.f32 %v1215_v26 }
 0x515   : > { %v3815_v37 = vpop.eup %3814 }
 0x516   : > { %v3817_v39 = vpop.eup %3816  ;;  %v1224_v25 = vmul.f32 %v3815_v37, %v3813_v56 }
 0x517   : > { %v1223_v59 = vmul.f32 0.0, %v3817_v39  ;;  %v3819_v35 = vpop.eup %3818 }
 0x519   : > { %v4793_v33 = vadd.f32 %v1224_v25, %v1223_v59 }
 0x51b   : > { %3820 = vtanh.f32 %v4793_v33 }
 0x525   : > { %v3821_v54 = vpop.eup %3820 }
 0x526   : > { %v4796_v27 = vmul.f32 %v3821_v54, %v3819_v35 }
 0x528   : > { %v1228_v28 = vpack.c.bf16 %v4796_v27, %v4796_v27 }
 0x52a   : > { %1262 = vmatmul.mubr.bf16.vlgmr.msra.gmra.mrb[12].mxu1 %v1228_v28  ;;  %1303 = vmatmul.mubr.bf16.vlgmr.msra.gmra.mrb[20].mxu0 %v1228_v28 }
 0x52b   : > { %1360 = vmatpush1.bf16.msra.mxu1 %v4638_v57  ;;  %1401 = vmatpush1.bf16.msra.mxu0 %v4640_v58 }
 0x52c   : > { %1361 = vmatprep.subr.bf16.mxu1 %v4642_v60  ;;  %1402 = vmatprep.subr.bf16.mxu0 %v4644_v61 }
 0x52d   : > { %1391 = vmatprep.mubr.bf16.mxu1 %v4326_v47  ;;  %1432 = vmatprep.mubr.bf16.mxu0 %v4326_v47 }
 0x52f   : > { %1362 = vmatpush1.bf16.msra.mxu1 %v4650_v62  ;;  %1403 = vmatpush1.bf16.msra.mxu0 %v4652_v63 }
 0x530   : > { %1363 = vmatprep.subr.bf16.mxu1 %v4656_v1  ;;  %1404 = vmatprep.subr.bf16.mxu0 %v4658_v2 }
 0x533   : > { %1364 = vmatpush1.bf16.msra.mxu1 %v4664_v3  ;;  %1405 = vmatpush1.bf16.msra.mxu0 %v4666_v4 }
 0x534   : > { %1365 = vmatprep.subr.bf16.mxu1 %v4670_v5  ;;  %1406 = vmatprep.subr.bf16.mxu0 %v4672_v6 }
 0x537   : > { %1366 = vmatpush1.bf16.msra.mxu1 %v4676_v7  ;;  %1407 = vmatpush1.bf16.msra.mxu0 %v4678_v8 }
 0x538   : > { %1367 = vmatprep.subr.bf16.mxu1 %v4682_v9  ;;  %1408 = vmatprep.subr.bf16.mxu0 %v4684_v10 }
 0x53b   : > { %1368 = vmatpush1.bf16.msra.mxu1 %v4688_v11  ;;  %1409 = vmatpush1.bf16.msra.mxu0 %v4690_v12 }
 0x53c   : > { %1369 = vmatprep.subr.bf16.mxu1 %v4694_v13  ;;  %1410 = vmatprep.subr.bf16.mxu0 %v4696_v14 }
 0x53f   : > { %1370 = vmatpush1.bf16.msra.mxu1 %v4700_v15  ;;  %1411 = vmatpush1.bf16.msra.mxu0 %v4702_v16 }
 0x540   : > { %1371 = vmatprep.subr.bf16.mxu1 %v4706_v17  ;;  %1412 = vmatprep.subr.bf16.mxu0 %v4708_v18 }
 0x543   : > { %1372 = vmatpush1.bf16.msra.mxu1 %v4712_v19  ;;  %1413 = vmatpush1.bf16.msra.mxu0 %v4714_v20 }
 0x544   : > { %1373 = vmatprep.subr.bf16.mxu1 %v4718_v21  ;;  %1414 = vmatprep.subr.bf16.mxu0 %v4720_v22 }
 0x547   : > { %1374 = vmatpush1.bf16.msra.mxu1 %v4724_v23  ;;  %1415 = vmatpush1.bf16.msra.mxu0 %v4726_v24 }
 0x548   : > { %1488 = vmatprep.subr.bf16.mxu1 %v4627_v45  ;;  %1529 = vmatprep.subr.bf16.mxu0 %v4629_v46 }
 0x5fd   : > { %v1263_v29 = vpop.f32.mrb[12].mxu1  ;;  %v1304_v30 = vpop.f32.mrb[20].mxu0 }
 0x5fe   : > { %v1315_v31 = vrot.slane %v1263_v29, 7  ;;  %v1265_v32 = vpop.f32.mrb[13].mxu1  ;;  %v1306_v36 = vpop.f32.mrb[21].mxu0  ;;  %v1317_v59 = vrot.slane %v1304_v30, 7 }
 0x5ff   : > { %v1316_v38 = vrot.slane %v1265_v32, 7  ;;  %v1267_v41 = vpop.f32.mrb[14].mxu1  ;;  %v1308_v44 = vpop.f32.mrb[22].mxu0  ;;  %v1318_v25 = vrot.slane %v1306_v36, 7  ;;  %v1347_v36 = vrot.slane %v4793_v33, 7 }
 0x600   : > { %v1323_v48 = vadd.f32 %v1315_v31, %v4781_v51  ;;  %v1268_v53 = vpop.f32.mrb[15].mxu1  ;;  %v1309_v55 = vpop.f32.mrb[23].mxu0  ;;  %v1325_v54 = vadd.f32 %v1317_v59, %v4790_v34 }
 0x601   : > { %v1324_v56 = vadd.f32 %v1316_v38, %v4783_v52  ;;  %v1326_v26 = vadd.f32 %v1318_v25, %v4787_v40 }
 0x602   : > { %v3502_v37 = vmul.f32 -1.442695, %v1323_v48 }
 0x603   : > { %v3503_v39 = vmul.f32 -1.442695, %v1324_v56  ;;  %v3504_v35 = vmul.f32 -1.442695, %v1326_v26 }
 0x604   : > { %3822 = vpow2.f32 %v3502_v37 }
 0x605   : > { %3824 = vpow2.f32 %v3503_v39 }
 0x606   : > { %3826 = vpow2.f32 %v3504_v35 }
 0x607   : > { %3828 = vtanh.f32 %v1325_v54 }
 0x60e   : > { %v3823_v28 = vpop.eup %3822 }
 0x60f   : > { %v3825_v29 = vpop.eup %3824  ;;  %v1336_v32 = vadd.f32 1.0, %v3823_v28 }
 0x610   : > { %v1337_v31 = vadd.f32 1.0, %v3825_v29  ;;  %v3827_v38 = vpop.eup %3826 }
 0x611   : > { %3830 = vrcp.f32 %v1336_v32  ;;  %v3829_v41 = vpop.eup %3828  ;;  %v1338_v55 = vadd.f32 1.0, %v3827_v38 }
 0x612   : > { %3832 = vrcp.f32 %v1337_v31 }
 0x613   : > { %3834 = vrcp.f32 %v1338_v55 }
 0x61b   : > { %v3831_v44 = vpop.eup %3830 }
 0x61c   : > { %v3833_v48 = vpop.eup %3832  ;;  %v1350_v53 = vmul.f32 %v3831_v44, %v3829_v41 }
 0x61d   : > { %v1349_v30 = vmul.f32 %v3833_v48, %v1347_v36  ;;  %v3835_v37 = vpop.eup %3834 }
 0x61f   : > { %v4839_v56 = vadd.f32 %v1350_v53, %v1349_v30 }
 0x621   : > { %3836 = vtanh.f32 %v4839_v56 }
 0x62b   : > { %v3837_v39 = vpop.eup %3836 }
 0x62c   : > { %v4842_v25 = vmul.f32 %v3837_v39, %v3835_v37 }
 0x62e   : > { %v1354_v26 = vpack.c.bf16 %v4842_v25, %v4842_v25 }
 0x630   : > { %v1356_v59 = vshrl.u32 %v1354_v26, 16 }
 0x632   : > { %1392 = vmatmul.mubr.bf16.vlgmr.msra.gmra.mrb[16].mxu1 %v1356_v59  ;;  %1433 = vmatmul.mubr.bf16.vlgmr.msra.gmra.mrb[24].mxu0 %v1356_v59 }
 0x633   : > { %1489 = vmatpush1.bf16.msra.mxu1 %v4638_v57  ;;  %1530 = vmatpush1.bf16.msra.mxu0 %v4640_v58 }
 0x634   : > { %1490 = vmatprep.subr.bf16.mxu1 %v4642_v60  ;;  %1531 = vmatprep.subr.bf16.mxu0 %v4644_v61 }
 0x635   : > { %1520 = vmatprep.mubr.bf16.mxu1 %v4326_v47  ;;  %1561 = vmatprep.mubr.bf16.mxu0 %v4326_v47 }
 0x637   : > { %1491 = vmatpush1.bf16.msra.mxu1 %v4650_v62  ;;  %1532 = vmatpush1.bf16.msra.mxu0 %v4652_v63 }
 0x638   : > { %1492 = vmatprep.subr.bf16.mxu1 %v4656_v1  ;;  %1533 = vmatprep.subr.bf16.mxu0 %v4658_v2 }
 0x63b   : > { %1493 = vmatpush1.bf16.msra.mxu1 %v4664_v3  ;;  %1534 = vmatpush1.bf16.msra.mxu0 %v4666_v4 }
 0x63c   : > { %1494 = vmatprep.subr.bf16.mxu1 %v4670_v5  ;;  %1535 = vmatprep.subr.bf16.mxu0 %v4672_v6 }
 0x63f   : > { %1495 = vmatpush1.bf16.msra.mxu1 %v4676_v7  ;;  %1536 = vmatpush1.bf16.msra.mxu0 %v4678_v8 }
 0x640   : > { %1496 = vmatprep.subr.bf16.mxu1 %v4682_v9  ;;  %1537 = vmatprep.subr.bf16.mxu0 %v4684_v10 }
 0x643   : > { %1497 = vmatpush1.bf16.msra.mxu1 %v4688_v11  ;;  %1538 = vmatpush1.bf16.msra.mxu0 %v4690_v12 }
 0x644   : > { %1498 = vmatprep.subr.bf16.mxu1 %v4694_v13  ;;  %1539 = vmatprep.subr.bf16.mxu0 %v4696_v14 }
 0x647   : > { %1499 = vmatpush1.bf16.msra.mxu1 %v4700_v15  ;;  %1540 = vmatpush1.bf16.msra.mxu0 %v4702_v16 }
 0x648   : > { %1500 = vmatprep.subr.bf16.mxu1 %v4706_v17  ;;  %1541 = vmatprep.subr.bf16.mxu0 %v4708_v18 }
 0x64b   : > { %1501 = vmatpush1.bf16.msra.mxu1 %v4712_v19  ;;  %1542 = vmatpush1.bf16.msra.mxu0 %v4714_v20 }
 0x64c   : > { %1502 = vmatprep.subr.bf16.mxu1 %v4718_v21  ;;  %1543 = vmatprep.subr.bf16.mxu0 %v4720_v22 }
 0x64f   : > { %1503 = vmatpush1.bf16.msra.mxu1 %v4724_v23  ;;  %1544 = vmatpush1.bf16.msra.mxu0 %v4726_v24 }
 0x650   : > { %1619 = vmatprep.subr.bf16.mxu1 %v4627_v45  ;;  %1660 = vmatprep.subr.bf16.mxu0 %v4629_v46 }
 0x705   : > { %v1393_v33 = vpop.f32.mrb[16].mxu1  ;;  %v1434_v35 = vpop.f32.mrb[24].mxu0 }
 0x706   : > { %v1445_v54 = vrot.slane %v1393_v33, 6  ;;  %v1395_v28 = vpop.f32.mrb[17].mxu1  ;;  %v1436_v29 = vpop.f32.mrb[25].mxu0  ;;  %v1447_v39 = vrot.slane %v1434_v35, 6 }
 0x707   : > { %v1446_v32 = vrot.slane %v1395_v28, 6  ;;  %v1397_v31 = vpop.f32.mrb[18].mxu1  ;;  %v1438_v38 = vpop.f32.mrb[26].mxu0  ;;  %v1448_v30 = vrot.slane %v1436_v29, 6  ;;  %v1477_v29 = vrot.slane %v4839_v56, 7 }
 0x708   : > { %v1453_v41 = vadd.f32 %v1445_v54, %v4781_v51  ;;  %v1398_v44 = vpop.f32.mrb[19].mxu1  ;;  %v1439_v36 = vpop.f32.mrb[27].mxu0  ;;  %v1455_v59 = vadd.f32 %v1447_v39, %v4790_v34  ;;  %v3158_v39 = vsel %vm3157_vm5, %v4796_v27, %v4842_v25 }
 0x709   : > { %v1454_v48 = vadd.f32 %v1446_v32, %v4783_v52  ;;  %v1456_v37 = vadd.f32 %v1448_v30, %v4787_v40 }
 0x70a   : > { %v3505_v53 = vmul.f32 -1.442695, %v1453_v41 }
 0x70b   : > { %v3506_v55 = vmul.f32 -1.442695, %v1454_v48  ;;  %v3507_v26 = vmul.f32 -1.442695, %v1456_v37 }
 0x70c   : > { %3838 = vpow2.f32 %v3505_v53 }
 0x70d   : > { %3840 = vpow2.f32 %v3506_v55 }
 0x70e   : > { %3842 = vpow2.f32 %v3507_v26 }
 0x70f   : > { %3844 = vtanh.f32 %v1455_v59 }
 0x716   : > { %v3839_v33 = vpop.eup %3838 }
 0x717   : > { %v3841_v28 = vpop.eup %3840  ;;  %v1466_v31 = vadd.f32 1.0, %v3839_v33 }
 0x718   : > { %v1467_v54 = vadd.f32 1.0, %v3841_v28  ;;  %v3843_v32 = vpop.eup %3842 }
 0x719   : > { %3846 = vrcp.f32 %v1466_v31  ;;  %v3845_v38 = vpop.eup %3844  ;;  %v1468_v48 = vadd.f32 1.0, %v3843_v32 }
 0x71a   : > { %3848 = vrcp.f32 %v1467_v54 }
 0x71b   : > { %3850 = vrcp.f32 %v1468_v48 }
 0x723   : > { %v3847_v41 = vpop.eup %3846 }
 0x724   : > { %v3849_v44 = vpop.eup %3848  ;;  %v1480_v36 = vmul.f32 %v3847_v41, %v3845_v38 }
 0x725   : > { %v1479_v35 = vmul.f32 %v3849_v44, %v1477_v29  ;;  %v3851_v55 = vpop.eup %3850 }
 0x727   : > { %v4885_v53 = vadd.f32 %v1480_v36, %v1479_v35 }
 0x729   : > { %3852 = vtanh.f32 %v4885_v53 }
 0x733   : > { %v3853_v30 = vpop.eup %3852 }
 0x734   : > { %v1483_v37 = vmul.f32 %v3853_v30, %v3851_v55 }
 0x736   : > { %v1484_v26 = vpack.c.bf16 %v1483_v37, %v1483_v37  ;;  %v4892_v56 = vsel %vm3159_vm6, %v3158_v39, %v1483_v37 }
 0x738   : > { %v1486_v59 = vrot.slane %v1484_v26, 1 }
 0x73a   : > { %1521 = vmatmul.mubr.bf16.vlgmr.msra.gmra.mrb[20].mxu1 %v1486_v59  ;;  %1562 = vmatmul.mubr.bf16.vlgmr.msra.gmra.mrb[28].mxu0 %v1486_v59 }
 0x73b   : > { %1620 = vmatpush1.bf16.msra.mxu1 %v4638_v57  ;;  %1661 = vmatpush1.bf16.msra.mxu0 %v4640_v58 }
 0x73c   : > { %1621 = vmatprep.subr.bf16.mxu1 %v4642_v60  ;;  %1662 = vmatprep.subr.bf16.mxu0 %v4644_v61 }
 0x73d   : > { %1651 = vmatprep.mubr.bf16.mxu1 %v4326_v47  ;;  %1692 = vmatprep.mubr.bf16.mxu0 %v4326_v47 }
 0x73f   : > { %1622 = vmatpush1.bf16.msra.mxu1 %v4650_v62  ;;  %1663 = vmatpush1.bf16.msra.mxu0 %v4652_v63 }
 0x740   : > { %1623 = vmatprep.subr.bf16.mxu1 %v4656_v1  ;;  %1664 = vmatprep.subr.bf16.mxu0 %v4658_v2 }
 0x743   : > { %1624 = vmatpush1.bf16.msra.mxu1 %v4664_v3  ;;  %1665 = vmatpush1.bf16.msra.mxu0 %v4666_v4 }
 0x744   : > { %1625 = vmatprep.subr.bf16.mxu1 %v4670_v5  ;;  %1666 = vmatprep.subr.bf16.mxu0 %v4672_v6 }
 0x747   : > { %1626 = vmatpush1.bf16.msra.mxu1 %v4676_v7  ;;  %1667 = vmatpush1.bf16.msra.mxu0 %v4678_v8 }
 0x748   : > { %1627 = vmatprep.subr.bf16.mxu1 %v4682_v9  ;;  %1668 = vmatprep.subr.bf16.mxu0 %v4684_v10 }
 0x74b   : > { %1628 = vmatpush1.bf16.msra.mxu1 %v4688_v11  ;;  %1669 = vmatpush1.bf16.msra.mxu0 %v4690_v12 }
 0x74c   : > { %1629 = vmatprep.subr.bf16.mxu1 %v4694_v13  ;;  %1670 = vmatprep.subr.bf16.mxu0 %v4696_v14 }
 0x74f   : > { %1630 = vmatpush1.bf16.msra.mxu1 %v4700_v15  ;;  %1671 = vmatpush1.bf16.msra.mxu0 %v4702_v16 }
 0x750   : > { %1631 = vmatprep.subr.bf16.mxu1 %v4706_v17  ;;  %1672 = vmatprep.subr.bf16.mxu0 %v4708_v18 }
 0x753   : > { %1632 = vmatpush1.bf16.msra.mxu1 %v4712_v19  ;;  %1673 = vmatpush1.bf16.msra.mxu0 %v4714_v20 }
 0x754   : > { %1633 = vmatprep.subr.bf16.mxu1 %v4718_v21  ;;  %1674 = vmatprep.subr.bf16.mxu0 %v4720_v22 }
 0x757   : > { %1634 = vmatpush1.bf16.msra.mxu1 %v4724_v23  ;;  %1675 = vmatpush1.bf16.msra.mxu0 %v4726_v24 }
 0x758   : > { %1748 = vmatprep.subr.bf16.mxu1 %v4627_v45  ;;  %1789 = vmatprep.subr.bf16.mxu0 %v4629_v46 }
 0x80d   : > { %v1522_v27 = vpop.f32.mrb[20].mxu1  ;;  %v1563_v25 = vpop.f32.mrb[28].mxu0 }
 0x80e   : > { %v1574_v33 = vrot.slane %v1522_v27, 5  ;;  %v1524_v28 = vpop.f32.mrb[21].mxu1  ;;  %v1565_v31 = vpop.f32.mrb[29].mxu0  ;;  %v1576_v37 = vrot.slane %v1563_v25, 5 }
 0x80f   : > { %v1575_v54 = vrot.slane %v1524_v28, 5  ;;  %v1526_v32 = vpop.f32.mrb[22].mxu1  ;;  %v1567_v38 = vpop.f32.mrb[30].mxu0  ;;  %v1577_v55 = vrot.slane %v1565_v31, 5  ;;  %v1606_v31 = vrot.slane %v4885_v53, 7 }
 0x810   : > { %v1582_v41 = vadd.f32 %v1574_v33, %v4781_v51  ;;  %v1527_v29 = vpop.f32.mrb[23].mxu1  ;;  %v1568_v44 = vpop.f32.mrb[31].mxu0  ;;  %v1584_v26 = vadd.f32 %v1576_v37, %v4790_v34 }
 0x811   : > { %v1583_v36 = vadd.f32 %v1575_v54, %v4783_v52  ;;  %v1585_v30 = vadd.f32 %v1577_v55, %v4787_v40 }
 0x812   : > { %v3508_v48 = vmul.f32 -1.442695, %v1582_v41 }
 0x813   : > { %v3509_v35 = vmul.f32 -1.442695, %v1583_v36  ;;  %v3510_v39 = vmul.f32 -1.442695, %v1585_v30 }
 0x814   : > { %3854 = vpow2.f32 %v3508_v48 }
 0x815   : > { %3856 = vpow2.f32 %v3509_v35 }
 0x816   : > { %3858 = vpow2.f32 %v3510_v39 }
 0x817   : > { %3860 = vtanh.f32 %v1584_v26 }
 0x81e   : > { %v3855_v59 = vpop.eup %3854 }
 0x81f   : > { %v3857_v27 = vpop.eup %3856  ;;  %v1595_v28 = vadd.f32 1.0, %v3855_v59 }
 0x820   : > { %v1596_v33 = vadd.f32 1.0, %v3857_v27  ;;  %v3859_v54 = vpop.eup %3858 }
 0x821   : > { %3862 = vrcp.f32 %v1595_v28  ;;  %v3861_v32 = vpop.eup %3860  ;;  %v1597_v44 = vadd.f32 1.0, %v3859_v54 }
 0x822   : > { %3864 = vrcp.f32 %v1596_v33 }
 0x823   : > { %3866 = vrcp.f32 %v1597_v44 }
 0x82b   : > { %v3863_v38 = vpop.eup %3862 }
 0x82c   : > { %v3865_v41 = vpop.eup %3864  ;;  %v1609_v29 = vmul.f32 %v3863_v38, %v3861_v32 }
 0x82d   : > { %v1608_v25 = vmul.f32 %v3865_v41, %v1606_v31  ;;  %v3867_v48 = vpop.eup %3866 }
 0x82f   : > { %v4933_v36 = vadd.f32 %v1609_v29, %v1608_v25 }
 0x831   : > { %3868 = vtanh.f32 %v4933_v36 }
 0x83b   : > { %v3869_v35 = vpop.eup %3868 }
 0x83c   : > { %v1612_v55 = vmul.f32 %v3869_v35, %v3867_v48 }
 0x83e   : > { %v1613_v30 = vpack.c.bf16 %v1612_v55, %v1612_v55  ;;  %v4938_v37 = vsel %vm3161_vm7, %v4892_v56, %v1612_v55 }
 0x840   : > { %v1615_v39 = vshrl.u32 %v1613_v30, 16 }
 0x842   : > { %v1617_v53 = vrot.slane %v1615_v39, 1 }
 0x844   : > { %1652 = vmatmul.mubr.bf16.vlgmr.msra.gmra.mrb[24].mxu1 %v1617_v53  ;;  %1693 = vmatmul.mubr.bf16.vlgmr.msra.gmra.mrb[32].mxu0 %v1617_v53 }
 0x845   : > { %1749 = vmatpush1.bf16.msra.mxu1 %v4638_v57  ;;  %1790 = vmatpush1.bf16.msra.mxu0 %v4640_v58 }
 0x846   : > { %1750 = vmatprep.subr.bf16.mxu1 %v4642_v60  ;;  %1791 = vmatprep.subr.bf16.mxu0 %v4644_v61 }
 0x847   : > { %1780 = vmatprep.mubr.bf16.mxu1 %v4326_v47  ;;  %1821 = vmatprep.mubr.bf16.mxu0 %v4326_v47 }
 0x849   : > { %1751 = vmatpush1.bf16.msra.mxu1 %v4650_v62  ;;  %1792 = vmatpush1.bf16.msra.mxu0 %v4652_v63 }
 0x84a   : > { %1752 = vmatprep.subr.bf16.mxu1 %v4656_v1  ;;  %1793 = vmatprep.subr.bf16.mxu0 %v4658_v2 }
 0x84d   : > { %1753 = vmatpush1.bf16.msra.mxu1 %v4664_v3  ;;  %1794 = vmatpush1.bf16.msra.mxu0 %v4666_v4 }
 0x84e   : > { %1754 = vmatprep.subr.bf16.mxu1 %v4670_v5  ;;  %1795 = vmatprep.subr.bf16.mxu0 %v4672_v6 }
 0x851   : > { %1755 = vmatpush1.bf16.msra.mxu1 %v4676_v7  ;;  %1796 = vmatpush1.bf16.msra.mxu0 %v4678_v8 }
 0x852   : > { %1756 = vmatprep.subr.bf16.mxu1 %v4682_v9  ;;  %1797 = vmatprep.subr.bf16.mxu0 %v4684_v10 }
 0x855   : > { %1757 = vmatpush1.bf16.msra.mxu1 %v4688_v11  ;;  %1798 = vmatpush1.bf16.msra.mxu0 %v4690_v12 }
 0x856   : > { %1758 = vmatprep.subr.bf16.mxu1 %v4694_v13  ;;  %1799 = vmatprep.subr.bf16.mxu0 %v4696_v14 }
 0x859   : > { %1759 = vmatpush1.bf16.msra.mxu1 %v4700_v15  ;;  %1800 = vmatpush1.bf16.msra.mxu0 %v4702_v16 }
 0x85a   : > { %1760 = vmatprep.subr.bf16.mxu1 %v4706_v17  ;;  %1801 = vmatprep.subr.bf16.mxu0 %v4708_v18 }
 0x85d   : > { %1761 = vmatpush1.bf16.msra.mxu1 %v4712_v19  ;;  %1802 = vmatpush1.bf16.msra.mxu0 %v4714_v20 }
 0x85e   : > { %1762 = vmatprep.subr.bf16.mxu1 %v4718_v21  ;;  %1803 = vmatprep.subr.bf16.mxu0 %v4720_v22 }
 0x861   : > { %1763 = vmatpush1.bf16.msra.mxu1 %v4724_v23  ;;  %1804 = vmatpush1.bf16.msra.mxu0 %v4726_v24 }
 0x862   : > { %1879 = vmatprep.subr.bf16.mxu1 %v4627_v45  ;;  %1920 = vmatprep.subr.bf16.mxu0 %v4629_v46 }
 0x917   : > { %v1653_v56 = vpop.f32.mrb[24].mxu1  ;;  %v1694_v26 = vpop.f32.mrb[32].mxu0 }
 0x918   : > { %v1705_v59 = vrot.slane %v1653_v56, 4  ;;  %v1655_v27 = vpop.f32.mrb[25].mxu1  ;;  %v1696_v28 = vpop.f32.mrb[33].mxu0  ;;  %v1707_v46 = vrot.slane %v1694_v26, 4 }
 0x919   : > { %v1706_v33 = vrot.slane %v1655_v27, 4  ;;  %v1657_v54 = vpop.f32.mrb[26].mxu1  ;;  %v1698_v32 = vpop.f32.mrb[34].mxu0  ;;  %v1708_v48 = vrot.slane %v1696_v28, 4  ;;  %v1737_v28 = vrot.slane %v4933_v36, 7 }
 0x91a   : > { %v1713_v38 = vadd.f32 %v1705_v59, %v4781_v51  ;;  %v1658_v31 = vpop.f32.mrb[27].mxu1  ;;  %v1699_v41 = vpop.f32.mrb[35].mxu0  ;;  %v1715_v55 = vadd.f32 %v1707_v46, %v4790_v34 }
 0x91b   : > { %v1714_v29 = vadd.f32 %v1706_v33, %v4783_v52  ;;  %v1716_v45 = vadd.f32 %v1708_v48, %v4787_v40 }
 0x91c   : > { %v3511_v44 = vmul.f32 -1.442695, %v1713_v38 }
 0x91d   : > { %v3512_v25 = vmul.f32 -1.442695, %v1714_v29  ;;  %v3513_v35 = vmul.f32 -1.442695, %v1716_v45 }
 0x91e   : > { %3870 = vpow2.f32 %v3511_v44 }
 0x91f   : > { %3872 = vpow2.f32 %v3512_v25 }
 0x920   : > { %3874 = vpow2.f32 %v3513_v35 }
 0x921   : > { %3876 = vtanh.f32 %v1715_v55 }
 0x928   : > { %v3871_v30 = vpop.eup %3870 }
 0x929   : > { %v3873_v39 = vpop.eup %3872  ;;  %v1726_v53 = vadd.f32 1.0, %v3871_v30 }
 0x92a   : > { %v1727_v56 = vadd.f32 1.0, %v3873_v39  ;;  %v3875_v59 = vpop.eup %3874 }
 0x92b   : > { %3878 = vrcp.f32 %v1726_v53  ;;  %v3877_v27 = vpop.eup %3876  ;;  %v1728_v38 = vadd.f32 1.0, %v3875_v59 }
 0x92c   : > { %3880 = vrcp.f32 %v1727_v56 }
 0x92d   : > { %3882 = vrcp.f32 %v1728_v38  ;;  %v5050_v38 = vld [vmem:[#allocation8 + $0x20] ss:$16 sps:$4 sm:$0xff]  }
 0x935   : > { %v3879_v33 = vpop.eup %3878 }
 0x936   : > { %v3881_v54 = vpop.eup %3880  ;;  %v1740_v32 = vmul.f32 %v3879_v33, %v3877_v27  ;;  %v5036_v33 = vld [vmem:[#allocation8] ss:$16 sps:$4 sm:$0xff]  }
 0x937   : > { %v1739_v26 = vmul.f32 %v3881_v54, %v1737_v28  ;;  %v3883_v41 = vpop.eup %3882  ;;  %v5039_v28 = vld [vmem:[#allocation8 + $0x8] ss:$16 sps:$4 sm:$0xff]   ;;  %v5042_v54 = vld [vmem:[#allocation8 + $0x24] ss:$16 sps:$4 sm:$0xff]  }
 0x939   : > { %v4979_v31 = vadd.f32 %v1740_v32, %v1739_v26  ;;  %v5045_v32 = vld [vmem:[#allocation8 + $0x2c] ss:$16 sps:$4 sm:$0xff]   ;;  %v5053_v26 = vld [vmem:[#allocation8 + $0x28] ss:$16 sps:$4 sm:$0xff]  }
 0x93b   : > { %3884 = vtanh.f32 %v4979_v31 }
 0x945   : > { %v3885_v29 = vpop.eup %3884 }
 0x946   : > { %v1743_v44 = vmul.f32 %v3885_v29, %v3883_v41  ;;  %v5059_v41 = vld [vmem:[#allocation8 + $0x4c] ss:$16 sps:$4 sm:$0xff]   ;;  %v5062_v29 = vld [vmem:[#allocation8 + $0x40] ss:$16 sps:$4 sm:$0xff]  }
 0x948   : > { %v1744_v25 = vpack.c.bf16 %v1743_v44, %v1743_v44  ;;  %v4984_v48 = vsel %vm484_vm1, %v4938_v37, %v1743_v44  ;;  %v5065_v44 = vld [vmem:[#allocation8 + $0x48] ss:$16 sps:$4 sm:$0xff]  }
 0x94a   : > { %v1746_v45 = vrot.slane %v1744_v25, 2  ;;  %v5068_v25 = vld [vmem:[#allocation8 + $0x64] ss:$16 sps:$4 sm:$0xff]  }
 0x94c   : > { %1781 = vmatmul.mubr.bf16.vlgmr.msra.gmra.mrb[28].mxu1 %v1746_v45  ;;  %1822 = vmatmul.mubr.bf16.vlgmr.msra.gmra.mrb[36].mxu0 %v1746_v45  ;;  %v5074_v45 = vld [vmem:[#allocation8 + $0x60] ss:$16 sps:$4 sm:$0xff]  }
 0x94d   : > { %1880 = vmatpush1.bf16.msra.mxu1 %v4638_v57  ;;  %1921 = vmatpush1.bf16.msra.mxu0 %v4640_v58  ;;  %v5018_v57 = vld [vmem:[#allocation8 + $0x4] ss:$16 sps:$4 sm:$0xff]   ;;  %v5021_v58 = vld [vmem:[#allocation8 + $0xc] ss:$16 sps:$4 sm:$0xff]  }
 0x94e   : > { %1881 = vmatprep.subr.bf16.mxu1 %v4642_v60  ;;  %1922 = vmatprep.subr.bf16.mxu0 %v4644_v61 }
 0x94f   : > { %1911 = vmatprep.mubr.bf16.mxu1 %v4326_v47  ;;  %1952 = vmatprep.mubr.bf16.mxu0 %v4326_v47 }
 0x951   : > { %1882 = vmatpush1.bf16.msra.mxu1 %v4650_v62  ;;  %1923 = vmatpush1.bf16.msra.mxu0 %v4652_v63 }
 0x952   : > { %1883 = vmatprep.subr.bf16.mxu1 %v4656_v1  ;;  %1924 = vmatprep.subr.bf16.mxu0 %v4658_v2 }
 0x955   : > { %1884 = vmatpush1.bf16.msra.mxu1 %v4664_v3  ;;  %1925 = vmatpush1.bf16.msra.mxu0 %v4666_v4 }
 0x956   : > { %1885 = vmatprep.subr.bf16.mxu1 %v4670_v5  ;;  %1926 = vmatprep.subr.bf16.mxu0 %v4672_v6 }
 0x959   : > { %1886 = vmatpush1.bf16.msra.mxu1 %v4676_v7  ;;  %1927 = vmatpush1.bf16.msra.mxu0 %v4678_v8 }
 0x95a   : > { %1887 = vmatprep.subr.bf16.mxu1 %v4682_v9  ;;  %1928 = vmatprep.subr.bf16.mxu0 %v4684_v10 }
 0x95d   : > { %1888 = vmatpush1.bf16.msra.mxu1 %v4688_v11  ;;  %1929 = vmatpush1.bf16.msra.mxu0 %v4690_v12 }
 0x95e   : > { %1889 = vmatprep.subr.bf16.mxu1 %v4694_v13  ;;  %1930 = vmatprep.subr.bf16.mxu0 %v4696_v14 }
 0x961   : > { %1890 = vmatpush1.bf16.msra.mxu1 %v4700_v15  ;;  %1931 = vmatpush1.bf16.msra.mxu0 %v4702_v16 }
 0x962   : > { %1891 = vmatprep.subr.bf16.mxu1 %v4706_v17  ;;  %1932 = vmatprep.subr.bf16.mxu0 %v4708_v18 }
 0x965   : > { %1892 = vmatpush1.bf16.msra.mxu1 %v4712_v19  ;;  %1933 = vmatpush1.bf16.msra.mxu0 %v4714_v20 }
 0x966   : > { %1893 = vmatprep.subr.bf16.mxu1 %v4718_v21  ;;  %1934 = vmatprep.subr.bf16.mxu0 %v4720_v22 }
 0x969   : > { %1894 = vmatpush1.bf16.msra.mxu1 %v4724_v23  ;;  %1935 = vmatpush1.bf16.msra.mxu0 %v4726_v24  ;;  %v1866_v23 = vrot.slane %v4979_v31, 7  ;;  %v5056_v31 = vld [vmem:[#allocation8 + $0x44] ss:$16 sps:$4 sm:$0xff]  }
 0x96a   : > { %2008 = vmatprep.subr.bf16.mxu1 %v5018_v57  ;;  %2049 = vmatprep.subr.bf16.mxu0 %v5021_v58 }
 0xa1f   : > { %v1782_v60 = vpop.f32.mrb[28].mxu1  ;;  %v1823_v61 = vpop.f32.mrb[36].mxu0 }
 0xa20   : > { %v1834_v62 = vrot.slane %v1782_v60, 3  ;;  %v1784_v63 = vpop.f32.mrb[29].mxu1  ;;  %v1825_v1 = vpop.f32.mrb[37].mxu0  ;;  %v1836_v13 = vrot.slane %v1823_v61, 3  ;;  %v5077_v60 = vld [vmem:[#allocation8 + $0x68] ss:$16 sps:$4 sm:$0xff]  }
 0xa21   : > { %v1835_v2 = vrot.slane %v1784_v63, 3  ;;  %v1786_v3 = vpop.f32.mrb[30].mxu1  ;;  %v1827_v4 = vpop.f32.mrb[38].mxu0  ;;  %v1837_v11 = vrot.slane %v1825_v1, 3  ;;  %v5080_v61 = vld [vmem:[#allocation8 + $0x84] ss:$16 sps:$4 sm:$0xff]  }
 0xa22   : > { %v1842_v5 = vadd.f32 %v1834_v62, %v4781_v51  ;;  %v1787_v6 = vpop.f32.mrb[31].mxu1  ;;  %v1828_v7 = vpop.f32.mrb[39].mxu0  ;;  %v1844_v15 = vadd.f32 %v1836_v13, %v4790_v34  ;;  %v5083_v62 = vld [vmem:[#allocation8 + $0x8c] ss:$16 sps:$4 sm:$0xff]   ;;  %v5086_v63 = vld [vmem:[#allocation8 + $0x80] ss:$16 sps:$4 sm:$0xff]  }
 0xa23   : > { %v1843_v8 = vadd.f32 %v1835_v2, %v4783_v52  ;;  %v1845_v12 = vadd.f32 %v1837_v11, %v4787_v40  ;;  %v5089_v1 = vld [vmem:[#allocation8 + $0x88] ss:$16 sps:$4 sm:$0xff]   ;;  %v5092_v2 = vld [vmem:[#allocation8 + $0xa4] ss:$16 sps:$4 sm:$0xff]   ;;  %v5095_v3 = vld [vmem:[#allocation8 + $0xac] ss:$16 sps:$4 sm:$0xff]  }
 0xa24   : > { %v3514_v9 = vmul.f32 -1.442695, %v1842_v5  ;;  %v5098_v4 = vld [vmem:[#allocation8 + $0xa0] ss:$16 sps:$4 sm:$0xff]   ;;  %v5101_v5 = vld [vmem:[#allocation8 + $0xa8] ss:$16 sps:$4 sm:$0xff]  }
 0xa25   : > { %v3515_v10 = vmul.f32 -1.442695, %v1843_v8  ;;  %v3516_v14 = vmul.f32 -1.442695, %v1845_v12  ;;  %v5104_v6 = vld [vmem:[#allocation8 + $0xc4] ss:$16 sps:$4 sm:$0xff]  }
 0xa26   : > { %3886 = vpow2.f32 %v3514_v9  ;;  %v5107_v7 = vld [vmem:[#allocation8 + $0xcc] ss:$16 sps:$4 sm:$0xff]   ;;  %v5110_v8 = vld [vmem:[#allocation8 + $0xc0] ss:$16 sps:$4 sm:$0xff]   ;;  %v5113_v9 = vld [vmem:[#allocation8 + $0xc8] ss:$16 sps:$4 sm:$0xff]  }
 0xa27   : > { %3888 = vpow2.f32 %v3515_v10  ;;  %v5116_v10 = vld [vmem:[#allocation8 + $0xe4] ss:$16 sps:$4 sm:$0xff]   ;;  %v5119_v11 = vld [vmem:[#allocation8 + $0xec] ss:$16 sps:$4 sm:$0xff]   ;;  %v5122_v12 = vld [vmem:[#allocation8 + $0xe0] ss:$16 sps:$4 sm:$0xff]  }
 0xa28   : > { %3890 = vpow2.f32 %v3516_v14  ;;  %v5125_v13 = vld [vmem:[#allocation8 + $0xe8] ss:$16 sps:$4 sm:$0xff]  }
 0xa29   : > { %3892 = vtanh.f32 %v1844_v15 }
 0xa30   : > { %v3887_v16 = vpop.eup %3886 }
 0xa31   : > { %v3889_v17 = vpop.eup %3888  ;;  %v1855_v18 = vadd.f32 1.0, %v3887_v16 }
 0xa32   : > { %v1856_v19 = vadd.f32 1.0, %v3889_v17  ;;  %v3891_v20 = vpop.eup %3890 }
 0xa33   : > { %3894 = vrcp.f32 %v1855_v18  ;;  %v3893_v21 = vpop.eup %3892  ;;  %v1857_v37 = vadd.f32 1.0, %v3891_v20 }
 0xa34   : > { %3896 = vrcp.f32 %v1856_v19 }
 0xa35   : > { %3898 = vrcp.f32 %v1857_v37 }
 0xa3d   : > { %v3895_v22 = vpop.eup %3894 }
 0xa3e   : > { %v3897_v24 = vpop.eup %3896  ;;  %v1869_v36 = vmul.f32 %v3895_v22, %v3893_v21 }
 0xa3f   : > { %v1868_v46 = vmul.f32 %v3897_v24, %v1866_v23  ;;  %v3899_v55 = vpop.eup %3898 }
 0xa41   : > { %v5029_v35 = vadd.f32 %v1869_v36, %v1868_v46 }
 0xa43   : > { %3900 = vtanh.f32 %v5029_v35 }
 0xa4d   : > { %v3901_v30 = vpop.eup %3900 }
 0xa4e   : > { %v1872_v39 = vmul.f32 %v3901_v30, %v3899_v55 }
 0xa50   : > { %v1873_v53 = vpack.c.bf16 %v1872_v39, %v1872_v39  ;;  %v5034_v56 = vsel %vm3164_vm8, %v4984_v48, %v1872_v39  ;;  %v5071_v48 = vld [vmem:[#allocation8 + $0x6c] ss:$16 sps:$4 sm:$0xff]  }
 0xa52   : > { %v1875_v59 = vshrl.u32 %v1873_v53, 16 }
 0xa54   : > { %v1877_v27 = vrot.slane %v1875_v59, 2 }
 0xa56   : > { %1912 = vmatmul.mubr.bf16.vlgmr.msra.gmra.mrb[32].mxu1 %v1877_v27  ;;  %1953 = vmatmul.mubr.bf16.vlgmr.msra.gmra.mrb[40].mxu0 %v1877_v27 }
 0xa57   : > { %2009 = vmatpush1.bf16.msra.mxu1 %v5036_v33  ;;  %2050 = vmatpush1.bf16.msra.mxu0 %v5039_v28 }
 0xa58   : > { %2010 = vmatprep.subr.bf16.mxu1 %v5042_v54  ;;  %2051 = vmatprep.subr.bf16.mxu0 %v5045_v32 }
 0xa59   : > { %2040 = vmatprep.mubr.bf16.mxu1 %v4326_v47  ;;  %2081 = vmatprep.mubr.bf16.mxu0 %v4326_v47 }
 0xa5b   : > { %2011 = vmatpush1.bf16.msra.mxu1 %v5050_v38  ;;  %2052 = vmatpush1.bf16.msra.mxu0 %v5053_v26 }
 0xa5c   : > { %2012 = vmatprep.subr.bf16.mxu1 %v5056_v31  ;;  %2053 = vmatprep.subr.bf16.mxu0 %v5059_v41 }
 0xa5f   : > { %2013 = vmatpush1.bf16.msra.mxu1 %v5062_v29  ;;  %2054 = vmatpush1.bf16.msra.mxu0 %v5065_v44 }
 0xa60   : > { %2014 = vmatprep.subr.bf16.mxu1 %v5068_v25  ;;  %2055 = vmatprep.subr.bf16.mxu0 %v5071_v48 }
 0xa63   : > { %2015 = vmatpush1.bf16.msra.mxu1 %v5074_v45  ;;  %2056 = vmatpush1.bf16.msra.mxu0 %v5077_v60 }
 0xa64   : > { %2016 = vmatprep.subr.bf16.mxu1 %v5080_v61  ;;  %2057 = vmatprep.subr.bf16.mxu0 %v5083_v62 }
 0xa67   : > { %2017 = vmatpush1.bf16.msra.mxu1 %v5086_v63  ;;  %2058 = vmatpush1.bf16.msra.mxu0 %v5089_v1 }
 0xa68   : > { %2018 = vmatprep.subr.bf16.mxu1 %v5092_v2  ;;  %2059 = vmatprep.subr.bf16.mxu0 %v5095_v3 }
 0xa6b   : > { %2019 = vmatpush1.bf16.msra.mxu1 %v5098_v4  ;;  %2060 = vmatpush1.bf16.msra.mxu0 %v5101_v5 }
 0xa6c   : > { %2020 = vmatprep.subr.bf16.mxu1 %v5104_v6  ;;  %2061 = vmatprep.subr.bf16.mxu0 %v5107_v7 }
 0xa6f   : > { %2021 = vmatpush1.bf16.msra.mxu1 %v5110_v8  ;;  %2062 = vmatpush1.bf16.msra.mxu0 %v5113_v9 }
 0xa70   : > { %2022 = vmatprep.subr.bf16.mxu1 %v5116_v10  ;;  %2063 = vmatprep.subr.bf16.mxu0 %v5119_v11 }
 0xa73   : > { %2023 = vmatpush1.bf16.msra.mxu1 %v5122_v12  ;;  %2064 = vmatpush1.bf16.msra.mxu0 %v5125_v13 }
 0xa74   : > { %2139 = vmatprep.subr.bf16.mxu1 %v5018_v57  ;;  %2180 = vmatprep.subr.bf16.mxu0 %v5021_v58 }
 0xb29   : > { %v1913_v14 = vpop.f32.mrb[32].mxu1  ;;  %v1954_v15 = vpop.f32.mrb[40].mxu0 }
 0xb2a   : > { %v1965_v16 = vrot.slane %v1913_v14, 2  ;;  %v1915_v17 = vpop.f32.mrb[33].mxu1  ;;  %v1956_v18 = vpop.f32.mrb[41].mxu0  ;;  %v1967_v39 = vrot.slane %v1954_v15, 2 }
 0xb2b   : > { %v1966_v19 = vrot.slane %v1915_v17, 2  ;;  %v1917_v20 = vpop.f32.mrb[34].mxu1  ;;  %v1958_v21 = vpop.f32.mrb[42].mxu0  ;;  %v1968_v55 = vrot.slane %v1956_v18, 2  ;;  %v1997_v18 = vrot.slane %v5029_v35, 7 }
 0xb2c   : > { %v1973_v22 = vadd.f32 %v1965_v16, %v4781_v51  ;;  %v1918_v23 = vpop.f32.mrb[35].mxu1  ;;  %v1959_v24 = vpop.f32.mrb[43].mxu0  ;;  %v1975_v59 = vadd.f32 %v1967_v39, %v4790_v34 }
 0xb2d   : > { %v1974_v36 = vadd.f32 %v1966_v19, %v4783_v52  ;;  %v1976_v30 = vadd.f32 %v1968_v55, %v4787_v40 }
 0xb2e   : > { %v3517_v37 = vmul.f32 -1.442695, %v1973_v22 }
 0xb2f   : > { %v3518_v46 = vmul.f32 -1.442695, %v1974_v36  ;;  %v3519_v53 = vmul.f32 -1.442695, %v1976_v30 }
 0xb30   : > { %3902 = vpow2.f32 %v3517_v37 }
 0xb31   : > { %3904 = vpow2.f32 %v3518_v46 }
 0xb32   : > { %3906 = vpow2.f32 %v3519_v53 }
 0xb33   : > { %3908 = vtanh.f32 %v1975_v59 }
 0xb3a   : > { %v3903_v27 = vpop.eup %3902 }
 0xb3b   : > { %v3905_v14 = vpop.eup %3904  ;;  %v1986_v17 = vadd.f32 1.0, %v3903_v27 }
 0xb3c   : > { %v1987_v16 = vadd.f32 1.0, %v3905_v14  ;;  %v3907_v19 = vpop.eup %3906 }
 0xb3d   : > { %3910 = vrcp.f32 %v1986_v17  ;;  %v3909_v20 = vpop.eup %3908  ;;  %v1988_v24 = vadd.f32 1.0, %v3907_v19 }
 0xb3e   : > { %3912 = vrcp.f32 %v1987_v16 }
 0xb3f   : > { %3914 = vrcp.f32 %v1988_v24 }
 0xb47   : > { %v3911_v21 = vpop.eup %3910 }
 0xb48   : > { %v3913_v22 = vpop.eup %3912  ;;  %v2000_v23 = vmul.f32 %v3911_v21, %v3909_v20 }
 0xb49   : > { %v1999_v15 = vmul.f32 %v3913_v22, %v1997_v18  ;;  %v3915_v37 = vpop.eup %3914 }
 0xb4b   : > { %v5135_v36 = vadd.f32 %v2000_v23, %v1999_v15 }
 0xb4d   : > { %3916 = vtanh.f32 %v5135_v36 }
 0xb57   : > { %v3917_v46 = vpop.eup %3916 }
 0xb58   : > { %v2003_v55 = vmul.f32 %v3917_v46, %v3915_v37 }
 0xb5a   : > { %v2004_v30 = vpack.c.bf16 %v2003_v55, %v2003_v55  ;;  %v5140_v39 = vsel %vm3166_vm9, %v5034_v56, %v2003_v55 }
 0xb5c   : > { %v2006_v53 = vrot.slane %v2004_v30, 3 }
 0xb5e   : > { %2041 = vmatmul.mubr.bf16.vlgmr.msra.gmra.mrb[36].mxu1 %v2006_v53  ;;  %2082 = vmatmul.mubr.bf16.vlgmr.msra.gmra.mrb[44].mxu0 %v2006_v53 }
 0xb5f   : > { %2140 = vmatpush1.bf16.msra.mxu1 %v5036_v33  ;;  %2181 = vmatpush1.bf16.msra.mxu0 %v5039_v28 }
 0xb60   : > { %2141 = vmatprep.subr.bf16.mxu1 %v5042_v54  ;;  %2182 = vmatprep.subr.bf16.mxu0 %v5045_v32 }
 0xb61   : > { %2171 = vmatprep.mubr.bf16.mxu1 %v4326_v47  ;;  %2212 = vmatprep.mubr.bf16.mxu0 %v4326_v47 }
 0xb63   : > { %2142 = vmatpush1.bf16.msra.mxu1 %v5050_v38  ;;  %2183 = vmatpush1.bf16.msra.mxu0 %v5053_v26 }
 0xb64   : > { %2143 = vmatprep.subr.bf16.mxu1 %v5056_v31  ;;  %2184 = vmatprep.subr.bf16.mxu0 %v5059_v41 }
 0xb67   : > { %2144 = vmatpush1.bf16.msra.mxu1 %v5062_v29  ;;  %2185 = vmatpush1.bf16.msra.mxu0 %v5065_v44 }
 0xb68   : > { %2145 = vmatprep.subr.bf16.mxu1 %v5068_v25  ;;  %2186 = vmatprep.subr.bf16.mxu0 %v5071_v48 }
 0xb6b   : > { %2146 = vmatpush1.bf16.msra.mxu1 %v5074_v45  ;;  %2187 = vmatpush1.bf16.msra.mxu0 %v5077_v60 }
 0xb6c   : > { %2147 = vmatprep.subr.bf16.mxu1 %v5080_v61  ;;  %2188 = vmatprep.subr.bf16.mxu0 %v5083_v62 }
 0xb6f   : > { %2148 = vmatpush1.bf16.msra.mxu1 %v5086_v63  ;;  %2189 = vmatpush1.bf16.msra.mxu0 %v5089_v1 }
 0xb70   : > { %2149 = vmatprep.subr.bf16.mxu1 %v5092_v2  ;;  %2190 = vmatprep.subr.bf16.mxu0 %v5095_v3 }
 0xb73   : > { %2150 = vmatpush1.bf16.msra.mxu1 %v5098_v4  ;;  %2191 = vmatpush1.bf16.msra.mxu0 %v5101_v5 }
 0xb74   : > { %2151 = vmatprep.subr.bf16.mxu1 %v5104_v6  ;;  %2192 = vmatprep.subr.bf16.mxu0 %v5107_v7 }
 0xb77   : > { %2152 = vmatpush1.bf16.msra.mxu1 %v5110_v8  ;;  %2193 = vmatpush1.bf16.msra.mxu0 %v5113_v9 }
 0xb78   : > { %2153 = vmatprep.subr.bf16.mxu1 %v5116_v10  ;;  %2194 = vmatprep.subr.bf16.mxu0 %v5119_v11 }
 0xb7b   : > { %2154 = vmatpush1.bf16.msra.mxu1 %v5122_v12  ;;  %2195 = vmatpush1.bf16.msra.mxu0 %v5125_v13 }
 0xb7c   : > { %2253 = vmatprep.subr.bf16.mxu1 %v5018_v57  ;;  %2294 = vmatprep.subr.bf16.mxu0 %v5021_v58 }
 0xc31   : > { %v2042_v35 = vpop.f32.mrb[36].mxu1  ;;  %v2083_v56 = vpop.f32.mrb[44].mxu0 }
 0xc32   : > { %v2094_v59 = vrot.slane %v2042_v35, 1  ;;  %v2044_v27 = vpop.f32.mrb[37].mxu1  ;;  %v2085_v14 = vpop.f32.mrb[45].mxu0  ;;  %v2096_v46 = vrot.slane %v2083_v56, 1 }
 0xc33   : > { %v2095_v17 = vrot.slane %v2044_v27, 1  ;;  %v2046_v16 = vpop.f32.mrb[38].mxu1  ;;  %v2087_v19 = vpop.f32.mrb[46].mxu0  ;;  %v2097_v15 = vrot.slane %v2085_v14, 1  ;;  %v2126_v14 = vrot.slane %v5135_v36, 7 }
 0xc34   : > { %v2102_v20 = vadd.f32 %v2094_v59, %v4781_v51  ;;  %v2047_v21 = vpop.f32.mrb[39].mxu1  ;;  %v2088_v18 = vpop.f32.mrb[47].mxu0  ;;  %v2104_v30 = vadd.f32 %v2096_v46, %v4790_v34 }
 0xc35   : > { %v2103_v22 = vadd.f32 %v2095_v17, %v4783_v52  ;;  %v2105_v37 = vadd.f32 %v2097_v15, %v4787_v40 }
 0xc36   : > { %v3520_v23 = vmul.f32 -1.442695, %v2102_v20 }
 0xc37   : > { %v3521_v24 = vmul.f32 -1.442695, %v2103_v22  ;;  %v3522_v55 = vmul.f32 -1.442695, %v2105_v37 }
 0xc38   : > { %3918 = vpow2.f32 %v3520_v23 }
 0xc39   : > { %3920 = vpow2.f32 %v3521_v24 }
 0xc3a   : > { %3922 = vpow2.f32 %v3522_v55 }
 0xc3b   : > { %3924 = vtanh.f32 %v2104_v30 }
 0xc42   : > { %v3919_v53 = vpop.eup %3918 }
 0xc43   : > { %v3921_v35 = vpop.eup %3920  ;;  %v2115_v27 = vadd.f32 1.0, %v3919_v53 }
 0xc44   : > { %v2116_v51 = vadd.f32 1.0, %v3921_v35  ;;  %v3923_v52 = vpop.eup %3922 }
 0xc45   : > { %3926 = vrcp.f32 %v2115_v27  ;;  %v3925_v59 = vpop.eup %3924  ;;  %v2117_v40 = vadd.f32 1.0, %v3923_v52 }
 0xc46   : > { %3928 = vrcp.f32 %v2116_v51 }
 0xc47   : > { %3930 = vrcp.f32 %v2117_v40 }
 0xc4f   : > { %v3927_v17 = vpop.eup %3926 }
 0xc50   : > { %v3929_v16 = vpop.eup %3928  ;;  %v2129_v19 = vmul.f32 %v3927_v17, %v3925_v59 }
 0xc51   : > { %v2128_v56 = vmul.f32 %v3929_v16, %v2126_v14  ;;  %v3931_v34 = vpop.eup %3930 }
 0xc53   : > { %v5181_v20 = vadd.f32 %v2129_v19, %v2128_v56 }
 0xc55   : > { %3932 = vtanh.f32 %v5181_v20 }
 0xc5f   : > { %v3933_v21 = vpop.eup %3932 }
 0xc60   : > { %v2132_v18 = vmul.f32 %v3933_v21, %v3931_v34 }
 0xc62   : > { %v2133_v22 = vpack.c.bf16 %v2132_v18, %v2132_v18  ;;  %v5186_v23 = vsel %vm3168_vm10, %v5140_v39, %v2132_v18 }
 0xc64   : > { %v2135_v24 = vshrl.u32 %v2133_v22, 16 }
 0xc66   : > { %v2137_v36 = vrot.slane %v2135_v24, 3  ;;  %v2245_v24 = vrot.slane %v5181_v20, 7 }
 0xc68   : > { %2172 = vmatmul.mubr.bf16.vlgmr.msra.gmra.mrb[40].mxu1 %v2137_v36  ;;  %2213 = vmatmul.mubr.bf16.vlgmr.msra.gmra.mrb[48].mxu0 %v2137_v36 }
 0xc69   : > { %2254 = vmatpush1.bf16.msra.mxu1 %v5036_v33  ;;  %2295 = vmatpush1.bf16.msra.mxu0 %v5039_v28 }
 0xc6a   : > { %2255 = vmatprep.subr.bf16.mxu1 %v5042_v54  ;;  %2296 = vmatprep.subr.bf16.mxu0 %v5045_v32 }
 0xc6b   : > { %2285 = vmatprep.mubr.bf16.mxu1 %v4326_v47  ;;  %2326 = vmatprep.mubr.bf16.mxu0 %v4326_v47 }
 0xc6d   : > { %2256 = vmatpush1.bf16.msra.mxu1 %v5050_v38  ;;  %2297 = vmatpush1.bf16.msra.mxu0 %v5053_v26 }
 0xc6e   : > { %2257 = vmatprep.subr.bf16.mxu1 %v5056_v31  ;;  %2298 = vmatprep.subr.bf16.mxu0 %v5059_v41 }
 0xc71   : > { %2258 = vmatpush1.bf16.msra.mxu1 %v5062_v29  ;;  %2299 = vmatpush1.bf16.msra.mxu0 %v5065_v44 }
 0xc72   : > { %2259 = vmatprep.subr.bf16.mxu1 %v5068_v25  ;;  %2300 = vmatprep.subr.bf16.mxu0 %v5071_v48 }
 0xc75   : > { %2260 = vmatpush1.bf16.msra.mxu1 %v5074_v45  ;;  %2301 = vmatpush1.bf16.msra.mxu0 %v5077_v60 }
 0xc76   : > { %2261 = vmatprep.subr.bf16.mxu1 %v5080_v61  ;;  %2302 = vmatprep.subr.bf16.mxu0 %v5083_v62 }
 0xc79   : > { %2262 = vmatpush1.bf16.msra.mxu1 %v5086_v63  ;;  %2303 = vmatpush1.bf16.msra.mxu0 %v5089_v1 }
 0xc7a   : > { %2263 = vmatprep.subr.bf16.mxu1 %v5092_v2  ;;  %2304 = vmatprep.subr.bf16.mxu0 %v5095_v3 }
 0xc7d   : > { %2264 = vmatpush1.bf16.msra.mxu1 %v5098_v4  ;;  %2305 = vmatpush1.bf16.msra.mxu0 %v5101_v5 }
 0xc7e   : > { %2265 = vmatprep.subr.bf16.mxu1 %v5104_v6  ;;  %2306 = vmatprep.subr.bf16.mxu0 %v5107_v7 }
 0xc81   : > { %2266 = vmatpush1.bf16.msra.mxu1 %v5110_v8  ;;  %2307 = vmatpush1.bf16.msra.mxu0 %v5113_v9 }
 0xc82   : > { %2267 = vmatprep.subr.bf16.mxu1 %v5116_v10  ;;  %2308 = vmatprep.subr.bf16.mxu0 %v5119_v11 }
 0xc85   : > { %2268 = vmatpush1.bf16.msra.mxu1 %v5122_v12  ;;  %2309 = vmatpush1.bf16.msra.mxu0 %v5125_v13 }
 0xc86   : > { %2383 = vmatprep.subr.bf16.mxu1 %v5018_v57  ;;  %2424 = vmatprep.subr.bf16.mxu0 %v5021_v58 }
 0xd3b   : > { %v2173_v39 = vpop.f32.mrb[40].mxu1  ;;  %v2214_v15 = vpop.f32.mrb[48].mxu0 }
 0xd3c   : > { %v2221_v37 = vadd.f32 %v2173_v39, %v4773_v42  ;;  %v2175_v46 = vpop.f32.mrb[41].mxu1  ;;  %v2216_v55 = vpop.f32.mrb[49].mxu0  ;;  %v2223_v16 = vadd.f32 %v2214_v15, %v4775_v43 }
 0xd3d   : > { %v2222_v30 = vadd.f32 %v2175_v46, %v4777_v49  ;;  %v2177_v53 = vpop.f32.mrb[42].mxu1  ;;  %v2218_v35 = vpop.f32.mrb[50].mxu0  ;;  %v2224_v17 = vadd.f32 %v2216_v55, %v4779_v50 }
 0xd3e   : > { %v3523_v27 = vmul.f32 -1.442695, %v2221_v37  ;;  %v2178_v51 = vpop.f32.mrb[43].mxu1  ;;  %v2219_v52 = vpop.f32.mrb[51].mxu0 }
 0xd3f   : > { %v3524_v59 = vmul.f32 -1.442695, %v2222_v30  ;;  %v3525_v14 = vmul.f32 -1.442695, %v2224_v17 }
 0xd40   : > { %3934 = vpow2.f32 %v3523_v27 }
 0xd41   : > { %3936 = vpow2.f32 %v3524_v59 }
 0xd42   : > { %3938 = vpow2.f32 %v3525_v14 }
 0xd43   : > { %3940 = vtanh.f32 %v2223_v16 }
 0xd4a   : > { %v3935_v19 = vpop.eup %3934 }
 0xd4b   : > { %v3937_v40 = vpop.eup %3936  ;;  %v2234_v56 = vadd.f32 1.0, %v3935_v19 }
 0xd4c   : > { %v2235_v34 = vadd.f32 1.0, %v3937_v40  ;;  %v3939_v21 = vpop.eup %3938 }
 0xd4d   : > { %3942 = vrcp.f32 %v2234_v56  ;;  %v3941_v18 = vpop.eup %3940  ;;  %v2236_v37 = vadd.f32 1.0, %v3939_v21 }
 0xd4e   : > { %3944 = vrcp.f32 %v2235_v34 }
 0xd4f   : > { %3946 = vrcp.f32 %v2236_v37 }
 0xd57   : > { %v3943_v22 = vpop.eup %3942 }
 0xd58   : > { %v3945_v36 = vpop.eup %3944  ;;  %v2248_v39 = vmul.f32 %v3943_v22, %v3941_v18 }
 0xd59   : > { %v2247_v46 = vmul.f32 %v3945_v36, %v2245_v24  ;;  %v3947_v15 = vpop.eup %3946 }
 0xd5b   : > { %v5227_v55 = vadd.f32 %v2248_v39, %v2247_v46 }
 0xd5d   : > { %3948 = vtanh.f32 %v5227_v55 }
 0xd67   : > { %v3949_v30 = vpop.eup %3948 }
 0xd68   : > { %v5230_v53 = vmul.f32 %v3949_v30, %v3947_v15 }
 0xd6a   : > { %v2252_v35 = vpack.c.bf16 %v5230_v53, %v5230_v53 }
 0xd6c   : > { %2286 = vmatmul.mubr.bf16.vlgmr.msra.gmra.mrb[44].mxu1 %v2252_v35  ;;  %2327 = vmatmul.mubr.bf16.vlgmr.msra.gmra.mrb[52].mxu0 %v2252_v35 }
 0xd6d   : > { %2384 = vmatpush1.bf16.msra.mxu1 %v5036_v33  ;;  %2425 = vmatpush1.bf16.msra.mxu0 %v5039_v28 }
 0xd6e   : > { %2385 = vmatprep.subr.bf16.mxu1 %v5042_v54  ;;  %2426 = vmatprep.subr.bf16.mxu0 %v5045_v32 }
 0xd6f   : > { %2415 = vmatprep.mubr.bf16.mxu1 %v4326_v47  ;;  %2456 = vmatprep.mubr.bf16.mxu0 %v4326_v47 }
 0xd71   : > { %2386 = vmatpush1.bf16.msra.mxu1 %v5050_v38  ;;  %2427 = vmatpush1.bf16.msra.mxu0 %v5053_v26 }
 0xd72   : > { %2387 = vmatprep.subr.bf16.mxu1 %v5056_v31  ;;  %2428 = vmatprep.subr.bf16.mxu0 %v5059_v41 }
 0xd75   : > { %2388 = vmatpush1.bf16.msra.mxu1 %v5062_v29  ;;  %2429 = vmatpush1.bf16.msra.mxu0 %v5065_v44 }
 0xd76   : > { %2389 = vmatprep.subr.bf16.mxu1 %v5068_v25  ;;  %2430 = vmatprep.subr.bf16.mxu0 %v5071_v48 }
 0xd79   : > { %2390 = vmatpush1.bf16.msra.mxu1 %v5074_v45  ;;  %2431 = vmatpush1.bf16.msra.mxu0 %v5077_v60 }
 0xd7a   : > { %2391 = vmatprep.subr.bf16.mxu1 %v5080_v61  ;;  %2432 = vmatprep.subr.bf16.mxu0 %v5083_v62 }
 0xd7d   : > { %2392 = vmatpush1.bf16.msra.mxu1 %v5086_v63  ;;  %2433 = vmatpush1.bf16.msra.mxu0 %v5089_v1 }
 0xd7e   : > { %2393 = vmatprep.subr.bf16.mxu1 %v5092_v2  ;;  %2434 = vmatprep.subr.bf16.mxu0 %v5095_v3 }
 0xd81   : > { %2394 = vmatpush1.bf16.msra.mxu1 %v5098_v4  ;;  %2435 = vmatpush1.bf16.msra.mxu0 %v5101_v5 }
 0xd82   : > { %2395 = vmatprep.subr.bf16.mxu1 %v5104_v6  ;;  %2436 = vmatprep.subr.bf16.mxu0 %v5107_v7 }
 0xd85   : > { %2396 = vmatpush1.bf16.msra.mxu1 %v5110_v8  ;;  %2437 = vmatpush1.bf16.msra.mxu0 %v5113_v9 }
 0xd86   : > { %2397 = vmatprep.subr.bf16.mxu1 %v5116_v10  ;;  %2438 = vmatprep.subr.bf16.mxu0 %v5119_v11 }
 0xd89   : > { %2398 = vmatpush1.bf16.msra.mxu1 %v5122_v12  ;;  %2439 = vmatpush1.bf16.msra.mxu0 %v5125_v13 }
 0xd8a   : > { %2512 = vmatprep.subr.bf16.mxu1 %v5018_v57  ;;  %2553 = vmatprep.subr.bf16.mxu0 %v5021_v58 }
 0xe3f   : > { %v2287_v20 = vpop.f32.mrb[44].mxu1  ;;  %v2328_v27 = vpop.f32.mrb[52].mxu0 }
 0xe40   : > { %v2339_v51 = vrot.slane %v2287_v20, 7  ;;  %v2289_v52 = vpop.f32.mrb[45].mxu1  ;;  %v2330_v59 = vpop.f32.mrb[53].mxu0  ;;  %v2341_v36 = vrot.slane %v2328_v27, 7 }
 0xe41   : > { %v2340_v17 = vrot.slane %v2289_v52, 7  ;;  %v2291_v14 = vpop.f32.mrb[46].mxu1  ;;  %v2332_v16 = vpop.f32.mrb[54].mxu0  ;;  %v2342_v22 = vrot.slane %v2330_v59, 7  ;;  %v2371_v59 = vrot.slane %v5227_v55, 7 }
 0xe42   : > { %v2347_v19 = vadd.f32 %v2339_v51, %v4773_v42  ;;  %v2292_v40 = vpop.f32.mrb[47].mxu1  ;;  %v2333_v56 = vpop.f32.mrb[55].mxu0  ;;  %v2349_v37 = vadd.f32 %v2341_v36, %v4775_v43 }
 0xe43   : > { %v2348_v34 = vadd.f32 %v2340_v17, %v4777_v49  ;;  %v2350_v24 = vadd.f32 %v2342_v22, %v4779_v50 }
 0xe44   : > { %v3526_v21 = vmul.f32 -1.442695, %v2347_v19 }
 0xe45   : > { %v3527_v18 = vmul.f32 -1.442695, %v2348_v34  ;;  %v3528_v39 = vmul.f32 -1.442695, %v2350_v24 }
 0xe46   : > { %3950 = vpow2.f32 %v3526_v21 }
 0xe47   : > { %3952 = vpow2.f32 %v3527_v18 }
 0xe48   : > { %3954 = vpow2.f32 %v3528_v39 }
 0xe49   : > { %3956 = vtanh.f32 %v2349_v37 }
 0xe50   : > { %v3951_v46 = vpop.eup %3950 }
 0xe51   : > { %v3953_v15 = vpop.eup %3952  ;;  %v2360_v30 = vadd.f32 1.0, %v3951_v46 }
 0xe52   : > { %v2361_v35 = vadd.f32 1.0, %v3953_v15  ;;  %v3955_v20 = vpop.eup %3954 }
 0xe53   : > { %3958 = vrcp.f32 %v2360_v30  ;;  %v3957_v51 = vpop.eup %3956  ;;  %v2362_v16 = vadd.f32 1.0, %v3955_v20 }
 0xe54   : > { %3960 = vrcp.f32 %v2361_v35 }
 0xe55   : > { %3962 = vrcp.f32 %v2362_v16 }
 0xe5d   : > { %v3959_v52 = vpop.eup %3958 }
 0xe5e   : > { %v3961_v17 = vpop.eup %3960  ;;  %v2374_v14 = vmul.f32 %v3959_v52, %v3957_v51 }
 0xe5f   : > { %v2373_v27 = vmul.f32 %v3961_v17, %v2371_v59  ;;  %v3963_v40 = vpop.eup %3962 }
 0xe61   : > { %v5273_v19 = vadd.f32 %v2374_v14, %v2373_v27 }
 0xe63   : > { %3964 = vtanh.f32 %v5273_v19 }
 0xe6d   : > { %v3965_v56 = vpop.eup %3964 }
 0xe6e   : > { %v5276_v34 = vmul.f32 %v3965_v56, %v3963_v40 }
 0xe70   : > { %v2378_v21 = vpack.c.bf16 %v5276_v34, %v5276_v34 }
 0xe72   : > { %v2380_v18 = vshrl.u32 %v2378_v21, 16 }
 0xe74   : > { %2416 = vmatmul.mubr.bf16.vlgmr.msra.gmra.mrb[48].mxu1 %v2380_v18  ;;  %2457 = vmatmul.mubr.bf16.vlgmr.msra.gmra.mrb[56].mxu0 %v2380_v18 }
 0xe75   : > { %2513 = vmatpush1.bf16.msra.mxu1 %v5036_v33  ;;  %2554 = vmatpush1.bf16.msra.mxu0 %v5039_v28 }
 0xe76   : > { %2514 = vmatprep.subr.bf16.mxu1 %v5042_v54  ;;  %2555 = vmatprep.subr.bf16.mxu0 %v5045_v32 }
 0xe77   : > { %2544 = vmatprep.mubr.bf16.mxu1 %v4326_v47  ;;  %2585 = vmatprep.mubr.bf16.mxu0 %v4326_v47 }
 0xe79   : > { %2515 = vmatpush1.bf16.msra.mxu1 %v5050_v38  ;;  %2556 = vmatpush1.bf16.msra.mxu0 %v5053_v26 }
 0xe7a   : > { %2516 = vmatprep.subr.bf16.mxu1 %v5056_v31  ;;  %2557 = vmatprep.subr.bf16.mxu0 %v5059_v41 }
 0xe7d   : > { %2517 = vmatpush1.bf16.msra.mxu1 %v5062_v29  ;;  %2558 = vmatpush1.bf16.msra.mxu0 %v5065_v44 }
 0xe7e   : > { %2518 = vmatprep.subr.bf16.mxu1 %v5068_v25  ;;  %2559 = vmatprep.subr.bf16.mxu0 %v5071_v48 }
 0xe81   : > { %2519 = vmatpush1.bf16.msra.mxu1 %v5074_v45  ;;  %2560 = vmatpush1.bf16.msra.mxu0 %v5077_v60 }
 0xe82   : > { %2520 = vmatprep.subr.bf16.mxu1 %v5080_v61  ;;  %2561 = vmatprep.subr.bf16.mxu0 %v5083_v62 }
 0xe85   : > { %2521 = vmatpush1.bf16.msra.mxu1 %v5086_v63  ;;  %2562 = vmatpush1.bf16.msra.mxu0 %v5089_v1 }
 0xe86   : > { %2522 = vmatprep.subr.bf16.mxu1 %v5092_v2  ;;  %2563 = vmatprep.subr.bf16.mxu0 %v5095_v3 }
 0xe89   : > { %2523 = vmatpush1.bf16.msra.mxu1 %v5098_v4  ;;  %2564 = vmatpush1.bf16.msra.mxu0 %v5101_v5 }
 0xe8a   : > { %2524 = vmatprep.subr.bf16.mxu1 %v5104_v6  ;;  %2565 = vmatprep.subr.bf16.mxu0 %v5107_v7 }
 0xe8d   : > { %2525 = vmatpush1.bf16.msra.mxu1 %v5110_v8  ;;  %2566 = vmatpush1.bf16.msra.mxu0 %v5113_v9 }
 0xe8e   : > { %2526 = vmatprep.subr.bf16.mxu1 %v5116_v10  ;;  %2567 = vmatprep.subr.bf16.mxu0 %v5119_v11 }
 0xe91   : > { %2527 = vmatpush1.bf16.msra.mxu1 %v5122_v12  ;;  %2568 = vmatpush1.bf16.msra.mxu0 %v5125_v13 }
 0xe92   : > { %2643 = vmatprep.subr.bf16.mxu1 %v5018_v57  ;;  %2684 = vmatprep.subr.bf16.mxu0 %v5021_v58 }
 0xf47   : > { %v2417_v55 = vpop.f32.mrb[48].mxu1  ;;  %v2458_v22 = vpop.f32.mrb[56].mxu0 }
 0xf48   : > { %v2469_v24 = vrot.slane %v2417_v55, 6  ;;  %v2419_v36 = vpop.f32.mrb[49].mxu1  ;;  %v2460_v39 = vpop.f32.mrb[57].mxu0  ;;  %v2471_v16 = vrot.slane %v2458_v22, 6 }
 0xf49   : > { %v2470_v37 = vrot.slane %v2419_v36, 6  ;;  %v2421_v46 = vpop.f32.mrb[50].mxu1  ;;  %v2462_v15 = vpop.f32.mrb[58].mxu0  ;;  %v2472_v17 = vrot.slane %v2460_v39, 6  ;;  %v2501_v39 = vrot.slane %v5273_v19, 7 }
 0xf4a   : > { %v2477_v30 = vadd.f32 %v2469_v24, %v4773_v42  ;;  %v2422_v35 = vpop.f32.mrb[51].mxu1  ;;  %v2463_v20 = vpop.f32.mrb[59].mxu0  ;;  %v2479_v40 = vadd.f32 %v2471_v16, %v4775_v43 }
 0xf4b   : > { %v2478_v51 = vadd.f32 %v2470_v37, %v4777_v49  ;;  %v2480_v14 = vadd.f32 %v2472_v17, %v4779_v50 }
 0xf4c   : > { %v3529_v52 = vmul.f32 -1.442695, %v2477_v30 }
 0xf4d   : > { %v3530_v59 = vmul.f32 -1.442695, %v2478_v51  ;;  %v3531_v27 = vmul.f32 -1.442695, %v2480_v14 }
 0xf4e   : > { %3966 = vpow2.f32 %v3529_v52 }
 0xf4f   : > { %3968 = vpow2.f32 %v3530_v59  ;;  %v3170_v59 = vsel %vm3157_vm5, %v5230_v53, %v5276_v34 }
 0xf50   : > { %3970 = vpow2.f32 %v3531_v27 }
 0xf51   : > { %3972 = vtanh.f32 %v2479_v40 }
 0xf58   : > { %v3967_v56 = vpop.eup %3966 }
 0xf59   : > { %v3969_v21 = vpop.eup %3968  ;;  %v2490_v18 = vadd.f32 1.0, %v3967_v56 }
 0xf5a   : > { %v2491_v55 = vadd.f32 1.0, %v3969_v21  ;;  %v3971_v24 = vpop.eup %3970 }
 0xf5b   : > { %3974 = vrcp.f32 %v2490_v18  ;;  %v3973_v36 = vpop.eup %3972  ;;  %v2492_v30 = vadd.f32 1.0, %v3971_v24 }
 0xf5c   : > { %3976 = vrcp.f32 %v2491_v55 }
 0xf5d   : > { %3978 = vrcp.f32 %v2492_v30 }
 0xf65   : > { %v3975_v37 = vpop.eup %3974 }
 0xf66   : > { %v3977_v46 = vpop.eup %3976  ;;  %v2504_v15 = vmul.f32 %v3975_v37, %v3973_v36 }
 0xf67   : > { %v2503_v22 = vmul.f32 %v3977_v46, %v2501_v39  ;;  %v3979_v20 = vpop.eup %3978 }
 0xf69   : > { %v5319_v35 = vadd.f32 %v2504_v15, %v2503_v22 }
 0xf6b   : > { %3980 = vtanh.f32 %v5319_v35 }
 0xf75   : > { %v3981_v51 = vpop.eup %3980 }
 0xf76   : > { %v2507_v52 = vmul.f32 %v3981_v51, %v3979_v20 }
 0xf78   : > { %v2508_v17 = vpack.c.bf16 %v2507_v52, %v2507_v52  ;;  %v5326_v14 = vsel %vm3159_vm6, %v3170_v59, %v2507_v52 }
 0xf7a   : > { %v2510_v19 = vrot.slane %v2508_v17, 1 }
 0xf7c   : > { %2545 = vmatmul.mubr.bf16.vlgmr.msra.gmra.mrb[52].mxu1 %v2510_v19  ;;  %2586 = vmatmul.mubr.bf16.vlgmr.msra.gmra.mrb[60].mxu0 %v2510_v19 }
 0xf7d   : > { %2644 = vmatpush1.bf16.msra.mxu1 %v5036_v33  ;;  %2685 = vmatpush1.bf16.msra.mxu0 %v5039_v28 }
 0xf7e   : > { %2645 = vmatprep.subr.bf16.mxu1 %v5042_v54  ;;  %2686 = vmatprep.subr.bf16.mxu0 %v5045_v32 }
 0xf7f   : > { %2675 = vmatprep.mubr.bf16.mxu1 %v4326_v47  ;;  %2716 = vmatprep.mubr.bf16.mxu0 %v4326_v47 }
 0xf81   : > { %2646 = vmatpush1.bf16.msra.mxu1 %v5050_v38  ;;  %2687 = vmatpush1.bf16.msra.mxu0 %v5053_v26 }
 0xf82   : > { %2647 = vmatprep.subr.bf16.mxu1 %v5056_v31  ;;  %2688 = vmatprep.subr.bf16.mxu0 %v5059_v41 }
 0xf85   : > { %2648 = vmatpush1.bf16.msra.mxu1 %v5062_v29  ;;  %2689 = vmatpush1.bf16.msra.mxu0 %v5065_v44 }
 0xf86   : > { %2649 = vmatprep.subr.bf16.mxu1 %v5068_v25  ;;  %2690 = vmatprep.subr.bf16.mxu0 %v5071_v48 }
 0xf89   : > { %2650 = vmatpush1.bf16.msra.mxu1 %v5074_v45  ;;  %2691 = vmatpush1.bf16.msra.mxu0 %v5077_v60 }
 0xf8a   : > { %2651 = vmatprep.subr.bf16.mxu1 %v5080_v61  ;;  %2692 = vmatprep.subr.bf16.mxu0 %v5083_v62 }
 0xf8d   : > { %2652 = vmatpush1.bf16.msra.mxu1 %v5086_v63  ;;  %2693 = vmatpush1.bf16.msra.mxu0 %v5089_v1 }
 0xf8e   : > { %2653 = vmatprep.subr.bf16.mxu1 %v5092_v2  ;;  %2694 = vmatprep.subr.bf16.mxu0 %v5095_v3 }
 0xf91   : > { %2654 = vmatpush1.bf16.msra.mxu1 %v5098_v4  ;;  %2695 = vmatpush1.bf16.msra.mxu0 %v5101_v5 }
 0xf92   : > { %2655 = vmatprep.subr.bf16.mxu1 %v5104_v6  ;;  %2696 = vmatprep.subr.bf16.mxu0 %v5107_v7 }
 0xf95   : > { %2656 = vmatpush1.bf16.msra.mxu1 %v5110_v8  ;;  %2697 = vmatpush1.bf16.msra.mxu0 %v5113_v9 }
 0xf96   : > { %2657 = vmatprep.subr.bf16.mxu1 %v5116_v10  ;;  %2698 = vmatprep.subr.bf16.mxu0 %v5119_v11 }
 0xf99   : > { %2658 = vmatpush1.bf16.msra.mxu1 %v5122_v12  ;;  %2699 = vmatpush1.bf16.msra.mxu0 %v5125_v13 }
 0xf9a   : > { %2772 = vmatprep.subr.bf16.mxu1 %v5018_v57  ;;  %2813 = vmatprep.subr.bf16.mxu0 %v5021_v58 }
0x104f   : > { %v2546_v53 = vpop.f32.mrb[52].mxu1  ;;  %v2587_v34 = vpop.f32.mrb[60].mxu0 }
0x1050   : > { %v2598_v16 = vrot.slane %v2546_v53, 5  ;;  %v2548_v27 = vpop.f32.mrb[53].mxu1  ;;  %v2589_v40 = vpop.f32.mrb[61].mxu0  ;;  %v2600_v58 = vrot.slane %v2587_v34, 5 }
0x1051   : > { %v2599_v56 = vrot.slane %v2548_v27, 5  ;;  %v2550_v21 = vpop.f32.mrb[54].mxu1  ;;  %v2591_v18 = vpop.f32.mrb[62].mxu0  ;;  %v2601_v15 = vrot.slane %v2589_v40, 5 }
0x1052   : > { %v2606_v55 = vadd.f32 %v2598_v16, %v4773_v42  ;;  %v2551_v24 = vpop.f32.mrb[55].mxu1  ;;  %v2592_v36 = vpop.f32.mrb[63].mxu0  ;;  %v2608_v22 = vadd.f32 %v2600_v58, %v4775_v43  ;;  %v2630_v16 = vrot.slane %v5319_v35, 7 }
0x1053   : > { %v2607_v37 = vadd.f32 %v2599_v56, %v4777_v49  ;;  %v2609_v57 = vadd.f32 %v2601_v15, %v4779_v50 }
0x1054   : > { %v3532_v39 = vmul.f32 -1.442695, %v2606_v55 }
0x1055   : > { %v3533_v46 = vmul.f32 -1.442695, %v2607_v37  ;;  %v3534_v30 = vmul.f32 -1.442695, %v2609_v57 }
0x1056   : > { %3982 = vpow2.f32 %v3532_v39 }
0x1057   : > { %3984 = vpow2.f32 %v3533_v46 }
0x1058   : > { %3986 = vpow2.f32 %v3534_v30 }
0x1059   : > { %3988 = vtanh.f32 %v2608_v22 }
0x1060   : > { %v3983_v20 = vpop.eup %3982 }
0x1061   : > { %v3985_v51 = vpop.eup %3984  ;;  %v2619_v52 = vadd.f32 1.0, %v3983_v20 }
0x1062   : > { %v2620_v59 = vadd.f32 1.0, %v3985_v51  ;;  %v3987_v17 = vpop.eup %3986 }
0x1063   : > { %3990 = vrcp.f32 %v2619_v52  ;;  %v3989_v19 = vpop.eup %3988  ;;  %v2621_v56 = vadd.f32 1.0, %v3987_v17  ;;  %v5427_v17 = vld [vmem:[#allocation8 + $0x8] ss:$16 sps:$4 sm:$0xff]  }
0x1064   : > { %3992 = vrcp.f32 %v2620_v59  ;;  %v5424_v59 = vld [vmem:[#allocation8] ss:$16 sps:$4 sm:$0xff]  }
0x1065   : > { %3994 = vrcp.f32 %v2621_v56  ;;  %v5447_v56 = vld [vmem:[#allocation8 + $0x4c] ss:$16 sps:$4 sm:$0xff]  }
0x106d   : > { %v3991_v53 = vpop.eup %3990 }
0x106e   : > { %v3993_v27 = vpop.eup %3992  ;;  %v2633_v40 = vmul.f32 %v3991_v53, %v3989_v19  ;;  %v5430_v19 = vld [vmem:[#allocation8 + $0x24] ss:$16 sps:$4 sm:$0xff]   ;;  %v5433_v53 = vld [vmem:[#allocation8 + $0x2c] ss:$16 sps:$4 sm:$0xff]  }
0x106f   : > { %v2632_v34 = vmul.f32 %v3993_v27, %v2630_v16  ;;  %v3995_v18 = vpop.eup %3994  ;;  %v5438_v16 = vld [vmem:[#allocation8 + $0x20] ss:$16 sps:$4 sm:$0xff]   ;;  %v5441_v27 = vld [vmem:[#allocation8 + $0x28] ss:$16 sps:$4 sm:$0xff]  }
0x1071   : > { %v5367_v21 = vadd.f32 %v2633_v40, %v2632_v34  ;;  %v5444_v40 = vld [vmem:[#allocation8 + $0x44] ss:$16 sps:$4 sm:$0xff]   ;;  %v5450_v34 = vld [vmem:[#allocation8 + $0x40] ss:$16 sps:$4 sm:$0xff]  }
0x1073   : > { %3996 = vtanh.f32 %v5367_v21 }
0x107d   : > { %v3997_v55 = vpop.eup %3996 }
0x107e   : > { %v2636_v24 = vmul.f32 %v3997_v55, %v3995_v18  ;;  %v5456_v18 = vld [vmem:[#allocation8 + $0x64] ss:$16 sps:$4 sm:$0xff]   ;;  %v5459_v55 = vld [vmem:[#allocation8 + $0x6c] ss:$16 sps:$4 sm:$0xff]  }
0x1080   : > { %v2637_v36 = vpack.c.bf16 %v2636_v24, %v2636_v24  ;;  %v5372_v37 = vsel %vm3161_vm7, %v5326_v14, %v2636_v24  ;;  %v5462_v24 = vld [vmem:[#allocation8 + $0x60] ss:$16 sps:$4 sm:$0xff]  }
0x1082   : > { %v2639_v39 = vshrl.u32 %v2637_v36, 16  ;;  %v5465_v36 = vld [vmem:[#allocation8 + $0x68] ss:$16 sps:$4 sm:$0xff]  }
0x1084   : > { %v2641_v46 = vrot.slane %v2639_v39, 1  ;;  %v5471_v39 = vld [vmem:[#allocation8 + $0x8c] ss:$16 sps:$4 sm:$0xff]  }
0x1086   : > { %2676 = vmatmul.mubr.bf16.vlgmr.msra.gmra.mrb[56].mxu1 %v2641_v46  ;;  %2717 = vmatmul.mubr.bf16.vlgmr.msra.gmra.mrb[64].mxu0 %v2641_v46  ;;  %v5474_v46 = vld [vmem:[#allocation8 + $0x80] ss:$16 sps:$4 sm:$0xff]  }
0x1087   : > { %2773 = vmatpush1.bf16.msra.mxu1 %v5036_v33  ;;  %2814 = vmatpush1.bf16.msra.mxu0 %v5039_v28  ;;  %v5406_v33 = vld [vmem:[#allocation8 + $0x4] ss:$16 sps:$4 sm:$0xff]   ;;  %v5409_v28 = vld [vmem:[#allocation8 + $0xc] ss:$16 sps:$4 sm:$0xff]  }
0x1088   : > { %2774 = vmatprep.subr.bf16.mxu1 %v5042_v54  ;;  %2815 = vmatprep.subr.bf16.mxu0 %v5045_v32 }
0x1089   : > { %2804 = vmatprep.mubr.bf16.mxu1 %v4326_v47  ;;  %2845 = vmatprep.mubr.bf16.mxu0 %v4326_v47 }
0x108b   : > { %2775 = vmatpush1.bf16.msra.mxu1 %v5050_v38  ;;  %2816 = vmatpush1.bf16.msra.mxu0 %v5053_v26 }
0x108c   : > { %2776 = vmatprep.subr.bf16.mxu1 %v5056_v31  ;;  %2817 = vmatprep.subr.bf16.mxu0 %v5059_v41 }
0x108f   : > { %2777 = vmatpush1.bf16.msra.mxu1 %v5062_v29  ;;  %2818 = vmatpush1.bf16.msra.mxu0 %v5065_v44 }
0x1090   : > { %2778 = vmatprep.subr.bf16.mxu1 %v5068_v25  ;;  %2819 = vmatprep.subr.bf16.mxu0 %v5071_v48 }
0x1093   : > { %2779 = vmatpush1.bf16.msra.mxu1 %v5074_v45  ;;  %2820 = vmatpush1.bf16.msra.mxu0 %v5077_v60 }
0x1094   : > { %2780 = vmatprep.subr.bf16.mxu1 %v5080_v61  ;;  %2821 = vmatprep.subr.bf16.mxu0 %v5083_v62 }
0x1097   : > { %2781 = vmatpush1.bf16.msra.mxu1 %v5086_v63  ;;  %2822 = vmatpush1.bf16.msra.mxu0 %v5089_v1 }
0x1098   : > { %2782 = vmatprep.subr.bf16.mxu1 %v5092_v2  ;;  %2823 = vmatprep.subr.bf16.mxu0 %v5095_v3 }
0x109b   : > { %2783 = vmatpush1.bf16.msra.mxu1 %v5098_v4  ;;  %2824 = vmatpush1.bf16.msra.mxu0 %v5101_v5 }
0x109c   : > { %2784 = vmatprep.subr.bf16.mxu1 %v5104_v6  ;;  %2825 = vmatprep.subr.bf16.mxu0 %v5107_v7 }
0x109f   : > { %2785 = vmatpush1.bf16.msra.mxu1 %v5110_v8  ;;  %2826 = vmatpush1.bf16.msra.mxu0 %v5113_v9 }
0x10a0   : > { %2786 = vmatprep.subr.bf16.mxu1 %v5116_v10  ;;  %2827 = vmatprep.subr.bf16.mxu0 %v5119_v11 }
0x10a3   : > { %2787 = vmatpush1.bf16.msra.mxu1 %v5122_v12  ;;  %2828 = vmatpush1.bf16.msra.mxu0 %v5125_v13  ;;  %v2761_v12 = vrot.slane %v5367_v21, 7  ;;  %v5453_v21 = vld [vmem:[#allocation8 + $0x48] ss:$16 sps:$4 sm:$0xff]  }
0x10a4   : > { %2903 = vmatprep.subr.bf16.mxu1 %v5406_v33  ;;  %2944 = vmatprep.subr.bf16.mxu0 %v5409_v28 }
0x1159   : > { %v2677_v54 = vpop.f32.mrb[56].mxu1  ;;  %v2718_v32 = vpop.f32.mrb[64].mxu0 }
0x115a   : > { %v2729_v38 = vrot.slane %v2677_v54, 4  ;;  %v2679_v26 = vpop.f32.mrb[57].mxu1  ;;  %v2720_v31 = vpop.f32.mrb[65].mxu0  ;;  %v2731_v2 = vrot.slane %v2718_v32, 4  ;;  %v5477_v54 = vld [vmem:[#allocation8 + $0x88] ss:$16 sps:$4 sm:$0xff]  }
0x115b   : > { %v2730_v41 = vrot.slane %v2679_v26, 4  ;;  %v2681_v29 = vpop.f32.mrb[58].mxu1  ;;  %v2722_v44 = vpop.f32.mrb[66].mxu0  ;;  %v2732_v63 = vrot.slane %v2720_v31, 4  ;;  %v5480_v32 = vld [vmem:[#allocation8 + $0xa4] ss:$16 sps:$4 sm:$0xff]  }
0x115c   : > { %v2737_v25 = vadd.f32 %v2729_v38, %v4773_v42  ;;  %v2682_v48 = vpop.f32.mrb[59].mxu1  ;;  %v2723_v45 = vpop.f32.mrb[67].mxu0  ;;  %v2739_v4 = vadd.f32 %v2731_v2, %v4775_v43  ;;  %v5483_v38 = vld [vmem:[#allocation8 + $0xac] ss:$16 sps:$4 sm:$0xff]   ;;  %v5486_v26 = vld [vmem:[#allocation8 + $0xa0] ss:$16 sps:$4 sm:$0xff]  }
0x115d   : > { %v2738_v60 = vadd.f32 %v2730_v41, %v4777_v49  ;;  %v2740_v1 = vadd.f32 %v2732_v63, %v4779_v50  ;;  %v5489_v31 = vld [vmem:[#allocation8 + $0xa8] ss:$16 sps:$4 sm:$0xff]   ;;  %v5492_v41 = vld [vmem:[#allocation8 + $0xc4] ss:$16 sps:$4 sm:$0xff]   ;;  %v5495_v29 = vld [vmem:[#allocation8 + $0xcc] ss:$16 sps:$4 sm:$0xff]  }
0x115e   : > { %v3535_v61 = vmul.f32 -1.442695, %v2737_v25  ;;  %v5498_v44 = vld [vmem:[#allocation8 + $0xc0] ss:$16 sps:$4 sm:$0xff]   ;;  %v5501_v25 = vld [vmem:[#allocation8 + $0xc8] ss:$16 sps:$4 sm:$0xff]  }
0x115f   : > { %v3536_v62 = vmul.f32 -1.442695, %v2738_v60  ;;  %v3537_v3 = vmul.f32 -1.442695, %v2740_v1  ;;  %v5504_v48 = vld [vmem:[#allocation8 + $0xe4] ss:$16 sps:$4 sm:$0xff]  }
0x1160   : > { %3998 = vpow2.f32 %v3535_v61  ;;  %v5507_v45 = vld [vmem:[#allocation8 + $0xec] ss:$16 sps:$4 sm:$0xff]   ;;  %v5510_v60 = vld [vmem:[#allocation8 + $0xe0] ss:$16 sps:$4 sm:$0xff]   ;;  %v5513_v61 = vld [vmem:[#allocation8 + $0xe8] ss:$16 sps:$4 sm:$0xff]  }
0x1161   : > { %4000 = vpow2.f32 %v3536_v62 }
0x1162   : > { %4002 = vpow2.f32 %v3537_v3 }
0x1163   : > { %4004 = vtanh.f32 %v2739_v4 }
0x116a   : > { %v3999_v5 = vpop.eup %3998 }
0x116b   : > { %v4001_v6 = vpop.eup %4000  ;;  %v2750_v7 = vadd.f32 1.0, %v3999_v5 }
0x116c   : > { %v2751_v8 = vadd.f32 1.0, %v4001_v6  ;;  %v4003_v9 = vpop.eup %4002 }
0x116d   : > { %4006 = vrcp.f32 %v2750_v7  ;;  %v4005_v10 = vpop.eup %4004  ;;  %v2752_v14 = vadd.f32 1.0, %v4003_v9 }
0x116e   : > { %4008 = vrcp.f32 %v2751_v8 }
0x116f   : > { %4010 = vrcp.f32 %v2752_v14 }
0x1177   : > { %v4007_v11 = vpop.eup %4006 }
0x1178   : > { %v4009_v13 = vpop.eup %4008  ;;  %v2764_v35 = vmul.f32 %v4007_v11, %v4005_v10 }
0x1179   : > { %v2763_v15 = vmul.f32 %v4009_v13, %v2761_v12  ;;  %v4011_v58 = vpop.eup %4010 }
0x117b   : > { %v5417_v57 = vadd.f32 %v2764_v35, %v2763_v15 }
0x117d   : > { %4012 = vtanh.f32 %v5417_v57 }
0x1187   : > { %v4013_v30 = vpop.eup %4012 }
0x1188   : > { %v2767_v22 = vmul.f32 %v4013_v30, %v4011_v58 }
0x118a   : > { %v2768_v20 = vpack.c.bf16 %v2767_v22, %v2767_v22  ;;  %v5422_v51 = vsel %vm484_vm1, %v5372_v37, %v2767_v22  ;;  %v5468_v37 = vld [vmem:[#allocation8 + $0x84] ss:$16 sps:$4 sm:$0xff]  }
0x118c   : > { %v2770_v52 = vrot.slane %v2768_v20, 2 }
0x118e   : > { %2805 = vmatmul.mubr.bf16.vlgmr.msra.gmra.mrb[60].mxu1 %v2770_v52  ;;  %2846 = vmatmul.mubr.bf16.vlgmr.msra.gmra.mrb[68].mxu0 %v2770_v52 }
0x118f   : > { %2904 = vmatpush1.bf16.msra.mxu1 %v5424_v59  ;;  %2945 = vmatpush1.bf16.msra.mxu0 %v5427_v17 }
0x1190   : > { %2905 = vmatprep.subr.bf16.mxu1 %v5430_v19  ;;  %2946 = vmatprep.subr.bf16.mxu0 %v5433_v53 }
0x1191   : > { %2935 = vmatprep.mubr.bf16.mxu1 %v4326_v47  ;;  %2976 = vmatprep.mubr.bf16.mxu0 %v4326_v47 }
0x1193   : > { %2906 = vmatpush1.bf16.msra.mxu1 %v5438_v16  ;;  %2947 = vmatpush1.bf16.msra.mxu0 %v5441_v27 }
0x1194   : > { %2907 = vmatprep.subr.bf16.mxu1 %v5444_v40  ;;  %2948 = vmatprep.subr.bf16.mxu0 %v5447_v56 }
0x1197   : > { %2908 = vmatpush1.bf16.msra.mxu1 %v5450_v34  ;;  %2949 = vmatpush1.bf16.msra.mxu0 %v5453_v21 }
0x1198   : > { %2909 = vmatprep.subr.bf16.mxu1 %v5456_v18  ;;  %2950 = vmatprep.subr.bf16.mxu0 %v5459_v55 }
0x119b   : > { %2910 = vmatpush1.bf16.msra.mxu1 %v5462_v24  ;;  %2951 = vmatpush1.bf16.msra.mxu0 %v5465_v36 }
0x119c   : > { %2911 = vmatprep.subr.bf16.mxu1 %v5468_v37  ;;  %2952 = vmatprep.subr.bf16.mxu0 %v5471_v39 }
0x119f   : > { %2912 = vmatpush1.bf16.msra.mxu1 %v5474_v46  ;;  %2953 = vmatpush1.bf16.msra.mxu0 %v5477_v54 }
0x11a0   : > { %2913 = vmatprep.subr.bf16.mxu1 %v5480_v32  ;;  %2954 = vmatprep.subr.bf16.mxu0 %v5483_v38 }
0x11a3   : > { %2914 = vmatpush1.bf16.msra.mxu1 %v5486_v26  ;;  %2955 = vmatpush1.bf16.msra.mxu0 %v5489_v31 }
0x11a4   : > { %2915 = vmatprep.subr.bf16.mxu1 %v5492_v41  ;;  %2956 = vmatprep.subr.bf16.mxu0 %v5495_v29 }
0x11a7   : > { %2916 = vmatpush1.bf16.msra.mxu1 %v5498_v44  ;;  %2957 = vmatpush1.bf16.msra.mxu0 %v5501_v25 }
0x11a8   : > { %2917 = vmatprep.subr.bf16.mxu1 %v5504_v48  ;;  %2958 = vmatprep.subr.bf16.mxu0 %v5507_v45 }
0x11ab   : > { %2918 = vmatpush1.bf16.msra.mxu1 %v5510_v60  ;;  %2959 = vmatpush1.bf16.msra.mxu0 %v5513_v61 }
0x11ac   : > { %3032 = vmatprep.subr.bf16.mxu1 %v5406_v33  ;;  %3073 = vmatprep.subr.bf16.mxu0 %v5409_v28 }
0x1261   : > { %v2806_v62 = vpop.f32.mrb[60].mxu1  ;;  %v2847_v63 = vpop.f32.mrb[68].mxu0 }
0x1262   : > { %v2858_v1 = vrot.slane %v2806_v62, 3  ;;  %v2808_v2 = vpop.f32.mrb[61].mxu1  ;;  %v2849_v3 = vpop.f32.mrb[69].mxu0  ;;  %v2860_v28 = vrot.slane %v2847_v63, 3 }
0x1263   : > { %v2859_v4 = vrot.slane %v2808_v2, 3  ;;  %v2810_v5 = vpop.f32.mrb[62].mxu1  ;;  %v2851_v6 = vpop.f32.mrb[70].mxu0  ;;  %v2861_v13 = vrot.slane %v2849_v3, 3 }
0x1264   : > { %v2866_v7 = vadd.f32 %v2858_v1, %v4773_v42  ;;  %v2811_v8 = vpop.f32.mrb[63].mxu1  ;;  %v2852_v9 = vpop.f32.mrb[71].mxu0  ;;  %v2868_v14 = vadd.f32 %v2860_v28, %v4775_v43  ;;  %v2890_v1 = vrot.slane %v5417_v57, 7 }
0x1265   : > { %v2867_v10 = vadd.f32 %v2859_v4, %v4777_v49  ;;  %v2869_v33 = vadd.f32 %v2861_v13, %v4779_v50 }
0x1266   : > { %v3538_v11 = vmul.f32 -1.442695, %v2866_v7 }
0x1267   : > { %v3539_v12 = vmul.f32 -1.442695, %v2867_v10  ;;  %v3540_v35 = vmul.f32 -1.442695, %v2869_v33 }
0x1268   : > { %4014 = vpow2.f32 %v3538_v11 }
0x1269   : > { %4016 = vpow2.f32 %v3539_v12 }
0x126a   : > { %4018 = vpow2.f32 %v3540_v35 }
0x126b   : > { %4020 = vtanh.f32 %v2868_v14 }
0x1272   : > { %v4015_v15 = vpop.eup %4014 }
0x1273   : > { %v4017_v58 = vpop.eup %4016  ;;  %v2879_v30 = vadd.f32 1.0, %v4015_v15  ;;  %v3798_v15 = vld [vmem:[%s5713_s23] sm:$0xff]  }
0x1274   : > { %v2880_v22 = vadd.f32 1.0, %v4017_v58  ;;  %v4019_v20 = vpop.eup %4018  ;;  %v3799_v58 = vld [vmem:[%s5713_s23 + $0x8] sm:$0xff]  }
0x1275   : > { %4022 = vrcp.f32 %v2879_v30  ;;  %v4021_v52 = vpop.eup %4020  ;;  %v2881_v4 = vadd.f32 1.0, %v4019_v20  ;;  %v3800_v30 = vld [vmem:[%s5713_s23 + $0x10] sm:$0xff]   ;;  %v3802_v20 = vld [vmem:[%s5713_s23 + $0x20] sm:$0xff]  }
0x1276   : > { %4024 = vrcp.f32 %v2880_v22  ;;  %v3801_v22 = vld [vmem:[%s5713_s23 + $0x18] sm:$0xff]  }
0x1277   : > { %4026 = vrcp.f32 %v2881_v4 }
0x127f   : > { %v4023_v62 = vpop.eup %4022 }
0x1280   : > { %v4025_v2 = vpop.eup %4024  ;;  %v2893_v3 = vmul.f32 %v4023_v62, %v4021_v52  ;;  %v3803_v52 = vld [vmem:[%s5713_s23 + $0x28] sm:$0xff]   ;;  %v3804_v62 = vld [vmem:[%s5713_s23 + $0x30] sm:$0xff]  }
0x1281   : > { %v2892_v63 = vmul.f32 %v4025_v2, %v2890_v1  ;;  %v4027_v6 = vpop.eup %4026  ;;  %v3805_v1 = vld [vmem:[%s5713_s23 + $0x38] sm:$0xff]  }
0x1283   : > { %v5523_v5 = vadd.f32 %v2893_v3, %v2892_v63 }
0x1285   : > { %4028 = vtanh.f32 %v5523_v5 }
0x128f   : > { %v4029_v7 = vpop.eup %4028 }
0x1290   : > { %v2896_v8 = vmul.f32 %v4029_v7, %v4027_v6 }
0x1292   : > { %v2897_v9 = vpack.c.bf16 %v2896_v8, %v2896_v8  ;;  %v5528_v10 = vsel %vm3164_vm8, %v5422_v51, %v2896_v8 }
0x1294   : > { %v2899_v11 = vshrl.u32 %v2897_v9, 16 }
0x1296   : > { %v2901_v12 = vrot.slane %v2899_v11, 2 }
0x1298   : > { %2936 = vmatmul.mubr.bf16.vlgmr.msra.gmra.mrb[64].mxu1 %v2901_v12  ;;  %2977 = vmatmul.mubr.bf16.vlgmr.msra.gmra.mrb[72].mxu0 %v2901_v12 }
0x1299   : > { %3033 = vmatpush1.bf16.msra.mxu1 %v5424_v59  ;;  %3074 = vmatpush1.bf16.msra.mxu0 %v5427_v17 }
0x129a   : > { %3034 = vmatprep.subr.bf16.mxu1 %v5430_v19  ;;  %3075 = vmatprep.subr.bf16.mxu0 %v5433_v53 }
0x129b   : > { %3064 = vmatprep.mubr.bf16.mxu1 %v4326_v47  ;;  %3105 = vmatprep.mubr.bf16.mxu0 %v4326_v47 }
0x129d   : > { %3035 = vmatpush1.bf16.msra.mxu1 %v5438_v16  ;;  %3076 = vmatpush1.bf16.msra.mxu0 %v5441_v27 }
0x129e   : > { %3036 = vmatprep.subr.bf16.mxu1 %v5444_v40  ;;  %3077 = vmatprep.subr.bf16.mxu0 %v5447_v56 }
0x12a1   : > { %3037 = vmatpush1.bf16.msra.mxu1 %v5450_v34  ;;  %3078 = vmatpush1.bf16.msra.mxu0 %v5453_v21 }
0x12a2   : > { %3038 = vmatprep.subr.bf16.mxu1 %v5456_v18  ;;  %3079 = vmatprep.subr.bf16.mxu0 %v5459_v55 }
0x12a5   : > { %3039 = vmatpush1.bf16.msra.mxu1 %v5462_v24  ;;  %3080 = vmatpush1.bf16.msra.mxu0 %v5465_v36 }
0x12a6   : > { %3040 = vmatprep.subr.bf16.mxu1 %v5468_v37  ;;  %3081 = vmatprep.subr.bf16.mxu0 %v5471_v39 }
0x12a9   : > { %3041 = vmatpush1.bf16.msra.mxu1 %v5474_v46  ;;  %3082 = vmatpush1.bf16.msra.mxu0 %v5477_v54 }
0x12aa   : > { %3042 = vmatprep.subr.bf16.mxu1 %v5480_v32  ;;  %3083 = vmatprep.subr.bf16.mxu0 %v5483_v38 }
0x12ad   : > { %3043 = vmatpush1.bf16.msra.mxu1 %v5486_v26  ;;  %3084 = vmatpush1.bf16.msra.mxu0 %v5489_v31 }
0x12ae   : > { %3044 = vmatprep.subr.bf16.mxu1 %v5492_v41  ;;  %3085 = vmatprep.subr.bf16.mxu0 %v5495_v29  ;;  %v3021_v29 = vrot.slane %v5523_v5, 7 }
0x12b1   : > { %3045 = vmatpush1.bf16.msra.mxu1 %v5498_v44  ;;  %3086 = vmatpush1.bf16.msra.mxu0 %v5501_v25 }
0x12b2   : > { %3046 = vmatprep.subr.bf16.mxu1 %v5504_v48  ;;  %3087 = vmatprep.subr.bf16.mxu0 %v5507_v45 }
0x12b5   : > { %3047 = vmatpush1.bf16.msra.mxu1 %v5510_v60  ;;  %3088 = vmatpush1.bf16.msra.mxu0 %v5513_v61 }
0x12b6   : > { %3614 = vmatprep.subr.bf16.mxu1 %v4324_v0 }
0x136b   : > { %v2937_v47 = vpop.f32.mrb[64].mxu1  ;;  %v2978_v57 = vpop.f32.mrb[72].mxu0 }
0x136c   : > { %v2989_v51 = vrot.slane %v2937_v47, 2  ;;  %v2939_v59 = vpop.f32.mrb[65].mxu1  ;;  %v2980_v17 = vpop.f32.mrb[73].mxu0  ;;  %v2991_v36 = vrot.slane %v2978_v57, 2 }
0x136d   : > { %v2990_v19 = vrot.slane %v2939_v59, 2  ;;  %v2941_v53 = vpop.f32.mrb[66].mxu1  ;;  %v2982_v16 = vpop.f32.mrb[74].mxu0  ;;  %v2992_v55 = vrot.slane %v2980_v17, 2 }
0x136e   : > { %v2997_v27 = vadd.f32 %v2989_v51, %v4773_v42  ;;  %v2942_v40 = vpop.f32.mrb[67].mxu1  ;;  %v2983_v56 = vpop.f32.mrb[75].mxu0  ;;  %v2999_v39 = vadd.f32 %v2991_v36, %v4775_v43 }
0x136f   : > { %v2998_v34 = vadd.f32 %v2990_v19, %v4777_v49  ;;  %v3000_v24 = vadd.f32 %v2992_v55, %v4779_v50 }
0x1370   : > { %v3541_v21 = vmul.f32 -1.442695, %v2997_v27 }
0x1371   : > { %v3542_v18 = vmul.f32 -1.442695, %v2998_v34  ;;  %v3543_v37 = vmul.f32 -1.442695, %v3000_v24 }
0x1372   : > { %4030 = vpow2.f32 %v3541_v21 }
0x1373   : > { %4032 = vpow2.f32 %v3542_v18 }
0x1374   : > { %4034 = vpow2.f32 %v3543_v37 }
0x1375   : > { %4036 = vtanh.f32 %v2999_v39 }
0x137c   : > { %v4031_v46 = vpop.eup %4030 }
0x137d   : > { %v4033_v54 = vpop.eup %4032  ;;  %v3010_v32 = vadd.f32 1.0, %v4031_v46 }
0x137e   : > { %v3011_v38 = vadd.f32 1.0, %v4033_v54  ;;  %v4035_v26 = vpop.eup %4034  ;;  %v3547_v54 = vld [vmem:[%s5714_s27] ss:$0 sm:$0xff] }
0x137f   : > { %4038 = vrcp.f32 %v3010_v32  ;;  %v4037_v31 = vpop.eup %4036  ;;  %v3012_v48 = vadd.f32 1.0, %v4035_v26 }
0x1380   : > { %4040 = vrcp.f32 %v3011_v38 }
0x1381   : > { %4042 = vrcp.f32 %v3012_v48 }
0x1389   : > { %v4039_v41 = vpop.eup %4038 }
0x138a   : > { %v4041_v44 = vpop.eup %4040  ;;  %v3024_v25 = vmul.f32 %v4039_v41, %v4037_v31 }
0x138b   : > { %v3023_v45 = vmul.f32 %v4041_v44, %v3021_v29  ;;  %v4043_v61 = vpop.eup %4042 }
0x138d   : > { %v5568_v60 = vadd.f32 %v3024_v25, %v3023_v45 }
0x138f   : > { %4044 = vtanh.f32 %v5568_v60  ;;  %v3150_v34 = vrot.slane %v5568_v60, 7 }
0x1399   : > { %v4045_v13 = vpop.eup %4044 }
0x139a   : > { %v3027_v33 = vmul.f32 %v4045_v13, %v4043_v61 }
0x139c   : > { %v3028_v28 = vpack.c.bf16 %v3027_v33, %v3027_v33  ;;  %v5573_v35 = vsel %vm3166_vm9, %v5528_v10, %v3027_v33 }
0x139e   : > { %v3030_v14 = vrot.slane %v3028_v28, 3 }
0x13a0   : > { %3065 = vmatmul.mubr.bf16.vlgmr.msra.gmra.mrb[68].mxu1 %v3030_v14  ;;  %3106 = vmatmul.mubr.bf16.vlgmr.msra.gmra.mrb[76].mxu0 %v3030_v14 }
0x13a1   : > { %3630 = vmatprep.mubr.msk.bf16.mxu1 %vm4325_vm0, %v4324_v0  ;;  %3615 = vmatpush3.bf16.msra.mxu1 %v3798_v15 }
0x13a2   : > { %3616 = vmatprep.subr.bf16.mxu1 %v4324_v0 }
0x13a5   : > { %3617 = vmatpush3.bf16.msra.mxu1 %v3799_v58 }
0x13a6   : > { %3618 = vmatprep.subr.bf16.mxu1 %v4324_v0 }
0x13a9   : > { %3619 = vmatpush3.bf16.msra.mxu1 %v3800_v30 }
0x13aa   : > { %3620 = vmatprep.subr.bf16.mxu1 %v4324_v0 }
0x13ad   : > { %3621 = vmatpush3.bf16.msra.mxu1 %v3801_v22 }
0x13ae   : > { %3622 = vmatprep.subr.bf16.mxu1 %v4324_v0 }
0x13b1   : > { %3623 = vmatpush3.bf16.msra.mxu1 %v3802_v20 }
0x13b2   : > { %3624 = vmatprep.subr.bf16.mxu1 %v4324_v0 }
0x13b5   : > { %3625 = vmatpush3.bf16.msra.mxu1 %v3803_v52 }
0x13b6   : > { %3626 = vmatprep.subr.bf16.mxu1 %v4324_v0 }
0x13b9   : > { %3627 = vmatpush3.bf16.msra.mxu1 %v3804_v62 }
0x13ba   : > { %3628 = vmatprep.subr.bf16.mxu1 %v4324_v0 }
0x13bd   : > { %3629 = vmatpush3.bf16.msra.mxu1 %v3805_v1 }
0x1473   : > { %v3066_v2 = vpop.f32.mrb[68].mxu1  ;;  %v3107_v3 = vpop.f32.mrb[76].mxu0 }
0x1474   : > { %v3118_v4 = vrot.slane %v3066_v2, 1  ;;  %v3068_v63 = vpop.f32.mrb[69].mxu1  ;;  %v3109_v5 = vpop.f32.mrb[77].mxu0  ;;  %v3120_v59 = vrot.slane %v3107_v3, 1 }
0x1475   : > { %v3119_v6 = vrot.slane %v3068_v63, 1  ;;  %v3070_v7 = vpop.f32.mrb[70].mxu1  ;;  %v3111_v8 = vpop.f32.mrb[78].mxu0  ;;  %v3121_v51 = vrot.slane %v3109_v5, 1 }
0x1476   : > { %v3126_v9 = vadd.f32 %v3118_v4, %v4773_v42  ;;  %v3071_v10 = vpop.f32.mrb[71].mxu1  ;;  %v3112_v11 = vpop.f32.mrb[79].mxu0  ;;  %v3128_v19 = vadd.f32 %v3120_v59, %v4775_v43 }
0x1477   : > { %v3127_v12 = vadd.f32 %v3119_v6, %v4777_v49  ;;  %v3129_v0 = vadd.f32 %v3121_v51, %v4779_v50 }
0x1478   : > { %v3544_v47 = vmul.f32 -1.442695, %v3126_v9 }
0x1479   : > { %v3545_v57 = vmul.f32 -1.442695, %v3127_v12  ;;  %v3546_v17 = vmul.f32 -1.442695, %v3129_v0 }
0x147a   : > { %4046 = vpow2.f32 %v3544_v47 }
0x147b   : > { %4048 = vpow2.f32 %v3545_v57 }
0x147c   : > { %4050 = vpow2.f32 %v3546_v17 }
0x147d   : > { %4052 = vtanh.f32 %v3128_v19 }
0x1484   : > { %v4047_v53 = vpop.eup %4046 }
0x1485   : > { %v4049_v16 = vpop.eup %4048  ;;  %v3139_v27 = vadd.f32 1.0, %v4047_v53 }
0x1486   : > { %v3140_v42 = vadd.f32 1.0, %v4049_v16  ;;  %v4051_v49 = vpop.eup %4050 }
0x1487   : > { %4054 = vrcp.f32 %v3139_v27  ;;  %v4053_v40 = vpop.eup %4052  ;;  %v3141_v18 = vadd.f32 1.0, %v4051_v49 }
0x1488   : > { %4056 = vrcp.f32 %v3140_v42 }
0x1489   : > { %4058 = vrcp.f32 %v3141_v18 }
0x1491   : > { %v4055_v56 = vpop.eup %4054 }
0x1492   : > { %v4057_v21 = vpop.eup %4056  ;;  %v3153_v50 = vmul.f32 %v4055_v56, %v4053_v40 }
0x1493   : > { %v3152_v55 = vmul.f32 %v4057_v21, %v3150_v34  ;;  %v4059_v24 = vpop.eup %4058 }
0x1495   : > { %v3154_v43 = vadd.f32 %v3153_v50, %v3152_v55 }
0x1497   : > { %4060 = vtanh.f32 %v3154_v43 }
0x14a1   : > { %v4061_v36 = vpop.eup %4060 }
0x14a2   : > { %v3156_v37 = vmul.f32 %v4061_v36, %v4059_v24 }
0x14a4   : > { %v3176_v39 = vsel %vm3168_vm10, %v5573_v35, %v3156_v37 }
0x14a5   : > { %v3177_v46 = vpack.c.bf16 %v3176_v39, %v5186_v23 }
0x14a7   : > { %3631 = vmatmul.mubr.bf16.vlgmr.msra.gmra.mrb[72].mxu1 %v3177_v46 }
0x157a   : > { %v3283_v32 = vpop.f32.mrb[72].mxu1 }
0x157b   : > { %v3284_v38 = vadd.f32 %v3547_v54, %v3283_v32  ;;  %v3632_v26 = vpop.f32.mrb[73].mxu1 }
0x157c   : > { %v3286_v23 = vpop.f32.mrb[74].mxu1 }
0x157d   : > { %3290 = vst [vmem:[%s463_s30] sm:$0xff] %v3284_v38  ;;  %v3287_v31 = vadd.f32 %v3547_v54, %v3286_v23  ;;  %v3633_v41 = vpop.f32.mrb[75].mxu1 }
0x157f   : > { %3291 = vst [vmem:[%s463_s30 + $0x8] sm:$0xff] %v3287_v31 }
0x1580   : > { %4253 = shalt.err (!%p4250_p0)
}
0x1581   : > { %s4254_s17 = scalar_lea.hbm %s5626_s15, 256  ;;  %s4258_s30 = scalar_lea.hbm %s5715_s13, 1024 }
0x1582   : > { %p4255_p5 = scmp.ne.s32.totalorder %s5626_s15, %s4254_s17  ;;  %p4259_p2 = scmp.lt.u32.totalorder %s5626_s15, %s5715_s13 }
0x1583   : > { %p4260_p4 = scmp.lt.u32.totalorder %s4258_s30, %s4254_s17  ;;  %p4262_p8 = scmp.lt.u32.totalorder %s4254_s17, %s5626_s15 }
0x1584   : > { %p4256_p10 = pnand %p4255_p5, %p4527_p11 }
0x1585   : > { %p4261_p6 = por %p4260_p4, %p4259_p2 }
0x1586   : > { %p4257_p1 = pneg %p4256_p10 }
0x1587   : > { %p4263_p13 = por %p4262_p8, %p4261_p6 }
0x1589   : > { %p4264_p3 = pnand %p4263_p13, %p4257_p1 }
0x158b   : > { %4267 = shalt.err (!%p4264_p3)
}
0x158c   : > { %s4328_s10 = smov 128   ;;  %s4329_s21 = smov 8  }
0x158d   : > { %3648 = dma.vmem_to_hbm [thread:$0]  (%p4527_p11), %s5621_s11, 256, %s5626_s15, %s3293_s9, %s4328_s10, %s4328_s10, %s4329_s21  }
0x158e PF: > { %s5716_s24 = sld [smem:[#allocation15_spill]]  ;;  %s5717_s14 = sld [smem:[#allocation16_spill]] }
0x158f   : > { %p3675_p7 = scmp.ge.s32.totalorder %s4314_s20, 2 }
0x1594   : > { %s3321_s25 = sand.u32 1, %s5716_s24   ;;  %p5718_p9 = scmp.ne.s32.totalorder %s5717_s14, 0 }
0x1595   : > { %s3322_s17 = scalar_lea.sflag [#allocation4], %s3321_s25 }
0x1596   : > { %p3665_p12 = pnand %p3675_p7, %p5718_p9 }
0x1598   : > { %4297 = dma.done.wait (!%p3665_p12), %s3322_s17, 256  }
0x1599   : > { %4299 = vsyncadd (!%p3665_p12), %s3322_s17, 4294967040  ;;  %p26_p0 = scmp.ge.s32.totalorder %s4495_s26, 6   ;;  %s5719_s17 = smov %s4306_s18 }
0x159a   : > { %s5720_s18 = smov %s4310_s19  ;;  %s5721_s19 = smov %s4523_s28 }
0x159b   : > { %s5722_s20 = smov %s4495_s26  ;;  %28 = sbr.rel (!%p26_p0) target bundleno = 12 (0xc), region = 124 }
0x15a2   :  { %3327 = vsyncpa [#allocation3], 1 }
0x15a3   :  { %3329 = vsyncpa [#allocation3 + $0x1], 1 }
0x15a4   :  { %3330 = vsyncpa [#allocation6], 1 }
0x15a5   :  { %3331 = vsyncpa [#allocation9], 1 }
0x15a6   :  { %3332 = vsyncpa [#allocation4], 1 }
0x15a7   :  { %3334 = vsyncpa [#allocation4 + $0x1], 1 }

</bundles_post_ra>
